<compile_context>
chip_gen: v7x
topology: tpu7x:2x2x1
jax: 0.10.0
libtpu: 0.0.40
codegen_flags: <defaults>
</compile_context>

<pallas_src>
import jax
import jax.numpy as jnp
from jax.experimental import pallas as pl
from jax.experimental.pallas import tpu as pltpu

K = 3        # conv kernel size
PAD = 1      # conv padding ("same" for stride 1)
C1 = 16      # conv1d_1 out_channels
C2 = 32      # conv1d_2 out_channels
HID = 50     # LSTM hidden size (real)
GP = 128     # per-gate lane padding (gate slices land on vreg boundaries)
D1 = 32      # dense1 out_features
OUT = 1      # dense2 out_features (out_channel)


def conv1d_lstm_kernel(xp_ref, cw1_ref, cb1_ref, cw2_ref, cb2_ref,
                       wih_ref, whh_ref, bl_ref,
                       fw1_ref, fb1_ref, fw2_ref, fb2_ref, out_ref):
    Lp2, BB, Cin = xp_ref.shape        # time-major, time already zero-padded by the wrapper
    L = Lp2 - 2

    xp = xp_ref[...]                                                    # (L+2, BB, Cin)

    # ---- conv1d_1 (k=3, p=1): tap-sum of three MXU matmuls over leading-axis slices ----
    acc1 = jnp.zeros((L * BB, C1), jnp.float32)
    for k in range(K):
        tap = xp[k:k + L].reshape(L * BB, Cin)                          # tile-aligned slice
        acc1 = acc1 + jnp.dot(tap, cw1_ref[k], preferred_element_type=jnp.float32)
    h1 = acc1 + cb1_ref[...]                                            # (L*BB, C1)

    # ---- conv1d_2 (k=3, p=1): pad along the LEADING (time) axis, tap-sum again ----
    h1_3d = h1.reshape(L, BB, C1)
    zrow = jnp.zeros((PAD, BB, C1), jnp.float32)
    h1p = jnp.concatenate([zrow, h1_3d, zrow], axis=0)                  # (L+2, BB, C1)
    acc2 = jnp.zeros((L * BB, C2), jnp.float32)
    for k in range(K):
        tap = h1p[k:k + L].reshape(L * BB, C1)
        acc2 = acc2 + jnp.dot(tap, cw2_ref[k], preferred_element_type=jnp.float32)
    h2 = acc2 + cb2_ref[...]                                            # (L*BB, C2)

    # ---- LSTM: precompute gate-padded input->gate projection for every timestep at once ----
    xg = jnp.dot(h2, wih_ref[...], preferred_element_type=jnp.float32) + bl_ref[...]
    xg = xg.reshape(L, BB, 4 * GP)                                      # time-major: xg[t]

    whh = whh_ref[...]                                                  # (GP, 4*GP)
    h = jnp.zeros((BB, GP), jnp.float32)
    c = jnp.zeros((BB, GP), jnp.float32)
    # L is small & static -> unrolled recurrence. Each gate slice starts on a 128-lane boundary.
    # TODO(synk): for L >> 32 switch to lax.fori_loop(..., unroll=4) to bound live ranges.
    for t in range(L):
        g = xg[t] + jnp.dot(h, whh, preferred_element_type=jnp.float32)   # (BB, 4*GP)
        i = jax.nn.sigmoid(g[:, 0 * GP:1 * GP])     # PyTorch gate order: i, f, g, o
        f = jax.nn.sigmoid(g[:, 1 * GP:2 * GP])
        gg = jnp.tanh(g[:, 2 * GP:3 * GP])
        o = jax.nn.sigmoid(g[:, 3 * GP:4 * GP])
        c = f * c + i * gg
        h = o * jnp.tanh(c)
        # Padded lanes (HID..GP-1): weights/bias are 0 -> i=f=o=0.5, gg=0 -> c,h stay exactly 0.

    # ---- dropout(0.5): identity at inference ----
    # TODO(synk): training-mode dropout mask (pltpu PRNG) not implemented; inference semantics only.

    # ---- dense1 (50 -> 32): fw1 padded to GP rows so no unaligned slice of h is needed ----
    d1 = jnp.dot(h, fw1_ref[...], preferred_element_type=jnp.float32) + fb1_ref[...]   # (BB, D1)
    # ---- dense2 (32 -> 1): VPU multiply + lane reduction instead of an N=1 MXU matmul ----
    out = jnp.sum(d1 * fw2_ref[...], axis=-1, keepdims=True) + fb2_ref[...]            # (BB, 1)
    out_ref[...] = out.astype(out_ref.dtype)


def conv1d_lstm_forward(x_blc, kparams, *, max_block_b=256):
    """x_blc: (B, L, num_col) float32 (module's native batch_first input). Returns (B, 1)."""
    B, L, Cin = x_blc.shape
    # Pad batch to a multiple of 8 sublanes; block the batch for VMEM bounding / megacore.
    bp8 = ((max(B, 8) + 7) // 8) * 8
    block_b = min(bp8, max_block_b)
    BP = ((bp8 + block_b - 1) // block_b) * block_b

    # Time-major layout + one-time zero padding along time (k=3, p=1) and batch.
    x_t = jnp.transpose(x_blc, (1, 0, 2))                               # (L, B, Cin)
    x_t = jnp.pad(x_t, ((PAD, PAD), (0, BP - B), (0, 0)))               # (L+2, BP, Cin)

    out = pl.pallas_call(
        conv1d_lstm_kernel,
        out_shape=jax.ShapeDtypeStruct((BP, OUT), jnp.float32),
        grid=(BP // block_b,),
        in_specs=[
            pl.BlockSpec((L + 2, block_b, Cin), lambda b: (0, b, 0)),   # activations: batch-blocked
            pl.BlockSpec((K, Cin, C1), lambda b: (0, 0, 0)),            # weights: constant index maps
            pl.BlockSpec((1, C1), lambda b: (0, 0)),
            pl.BlockSpec((K, C1, C2), lambda b: (0, 0, 0)),
            pl.BlockSpec((1, C2), lambda b: (0, 0)),
            pl.BlockSpec((C2, 4 * GP), lambda b: (0, 0)),
            pl.BlockSpec((GP, 4 * GP), lambda b: (0, 0)),
            pl.BlockSpec((1, 4 * GP), lambda b: (0, 0)),
            pl.BlockSpec((GP, D1), lambda b: (0, 0)),
            pl.BlockSpec((1, D1), lambda b: (0, 0)),
            pl.BlockSpec((1, D1), lambda b: (0, 0)),
            pl.BlockSpec((1, OUT), lambda b: (0, 0)),
        ],
        out_specs=pl.BlockSpec((block_b, OUT), lambda b: (b, 0)),
        compiler_params=pltpu.CompilerParams(
            dimension_semantics=("parallel",)),                         # shards across TCs on v7x
    )(x_t, kparams["cw1"], kparams["cb1"], kparams["cw2"], kparams["cb2"],
      kparams["w_ih"], kparams["w_hh"], kparams["b_l"],
      kparams["fw1"], kparams["fb1"], kparams["fw2"], kparams["fb2"])
    return out[:B]


def init_params(key, num_col):
    """Deterministic synthetic parameters in 'real' (unpadded) layout.

    Mapping from real PyTorch weights:
      cw1 / cw2 : Conv1d weight (Cout, Cin, K) -> transpose(2, 1, 0)  (tap-major (K, Cin, Cout))
      w_ih/w_hh : LSTM weight_ih_l0/_hh_l0 (4*HID, in) -> .T ; gate order i, f, g, o
      b_l       : bias_ih_l0 + bias_hh_l0, shape (1, 4*HID)
      fw1       : dense1.weight.T ; fw2 : dense2.weight (OUT, D1)
    """
    ks = jax.random.split(key, 11)
    s = 0.1
    return {
        "cw1": jax.random.normal(ks[0], (K, num_col, C1), jnp.float32) * s,
        "cb1": jax.random.normal(ks[1], (1, C1), jnp.float32) * s,
        "cw2": jax.random.normal(ks[2], (K, C1, C2), jnp.float32) * s,
        "cb2": jax.random.normal(ks[3], (1, C2), jnp.float32) * s,
        "w_ih": jax.random.normal(ks[4], (C2, 4 * HID), jnp.float32) * s,
        "w_hh": jax.random.normal(ks[5], (HID, 4 * HID), jnp.float32) * s,
        "b_l": jax.random.normal(ks[6], (1, 4 * HID), jnp.float32) * s,
        "fw1": jax.random.normal(ks[7], (HID, D1), jnp.float32) * s,
        "fb1": jax.random.normal(ks[8], (1, D1), jnp.float32) * s,
        "fw2": jax.random.normal(ks[9], (OUT, D1), jnp.float32) * s,
        "fb2": jax.random.normal(ks[10], (1, OUT), jnp.float32) * s,
    }


def pack_params(p):
    """Repack LSTM/dense weights so every gate starts on a 128-lane boundary (zero padding)."""
    GP4 = 4 * GP

    def pad_gate_cols(w):  # (rows, 4*HID) -> (rows, 4*GP), gate k at columns [k*GP, k*GP+HID)
        out = jnp.zeros((w.shape[0], GP4), w.dtype)
        for k in range(4):
            out = out.at[:, k * GP:k * GP + HID].set(w[:, k * HID:(k + 1) * HID])
        return out

    w_ih_p = pad_gate_cols(p["w_ih"])                                        # (C2, 4*GP)
    w_hh_p = jnp.zeros((GP, GP4), jnp.float32).at[:HID, :].set(pad_gate_cols(p["w_hh"]))
    b_p = pad_gate_cols(p["b_l"])                                            # (1, 4*GP)
    fw1_p = jnp.zeros((GP, D1), jnp.float32).at[:HID, :].set(p["fw1"])       # (GP, D1)
    return {
        "cw1": p["cw1"], "cb1": p["cb1"], "cw2": p["cw2"], "cb2": p["cb2"],
        "w_ih": w_ih_p, "w_hh": w_hh_p, "b_l": b_p,
        "fw1": fw1_p, "fb1": p["fb1"], "fw2": p["fw2"], "fb2": p["fb2"],
    }


def reference_forward(x, p):
    """Independent pure-JAX reference (lax.conv + explicit 50-wide LSTM, PyTorch layouts)."""
    B, L, _ = x.shape
    xt = jnp.transpose(x, (0, 2, 1))                                    # (B, Cin, L), NCL
    w1 = jnp.transpose(p["cw1"], (2, 1, 0))                             # -> (C1, Cin, K) torch layout
    h = jax.lax.conv_general_dilated(xt, w1, window_strides=(1,), padding=[(PAD, PAD)],
                                     dimension_numbers=("NCH", "OIH", "NCH"))
    h = h + p["cb1"].reshape(1, C1, 1)
    w2 = jnp.transpose(p["cw2"], (2, 1, 0))
    h = jax.lax.conv_general_dilated(h, w2, window_strides=(1,), padding=[(PAD, PAD)],
                                     dimension_numbers=("NCH", "OIH", "NCH"))
    h = h + p["cb2"].reshape(1, C2, 1)
    seq = jnp.transpose(h, (0, 2, 1))                                   # (B, L, C2)

    hh = jnp.zeros((B, HID), jnp.float32)
    cc = jnp.zeros((B, HID), jnp.float32)
    for t in range(L):
        g = seq[:, t, :] @ p["w_ih"] + hh @ p["w_hh"] + p["b_l"]
        i = jax.nn.sigmoid(g[:, :HID])
        f = jax.nn.sigmoid(g[:, HID:2 * HID])
        gg = jnp.tanh(g[:, 2 * HID:3 * HID])
        o = jax.nn.sigmoid(g[:, 3 * HID:])
        cc = f * cc + i * gg
        hh = o * jnp.tanh(cc)

    d1 = hh @ p["fw1"] + p["fb1"]
    return d1 @ p["fw2"].T + p["fb2"]


if __name__ == "__main__":
    num_col, seq_len, batch = 4, 16, 2

    key = jax.random.PRNGKey(0)
    k_params, k_x = jax.random.split(key)
    params = init_params(k_params, num_col)
    kparams = pack_params(params)
    x = jax.random.normal(k_x, (batch, seq_len, num_col), jnp.float32)

    out = jax.block_until_ready(conv1d_lstm_forward(x, kparams))
    ref = jax.block_until_ready(reference_forward(x, params))

    assert out.shape == (batch, OUT)
    assert jnp.allclose(out, ref, atol=1e-4, rtol=1e-4), (out, ref)

    print("KERNEL_OK")
</pallas_src>

<mosaic_0001>
module attributes {stable_mosaic.version = 11 : i64} {
  func.func @conv1d_lstm_kernel(%arg0: i32, %arg1: memref<18x8x4xf32, #tpu.memory_space<vmem>>, %arg2: memref<3x4x16xf32, #tpu.memory_space<vmem>>, %arg3: memref<1x16xf32, #tpu.memory_space<vmem>>, %arg4: memref<3x16x32xf32, #tpu.memory_space<vmem>>, %arg5: memref<1x32xf32, #tpu.memory_space<vmem>>, %arg6: memref<32x512xf32, #tpu.memory_space<vmem>>, %arg7: memref<128x512xf32, #tpu.memory_space<vmem>>, %arg8: memref<1x512xf32, #tpu.memory_space<vmem>>, %arg9: memref<128x32xf32, #tpu.memory_space<vmem>>, %arg10: memref<1x32xf32, #tpu.memory_space<vmem>>, %arg11: memref<1x32xf32, #tpu.memory_space<vmem>>, %arg12: memref<1x1xf32, #tpu.memory_space<vmem>>, %arg13: memref<8x1xf32, #tpu.memory_space<vmem>>) attributes {dimension_semantics = [#tpu.dimension_semantics<parallel>], iteration_bounds = array<i64: 1>, scalar_prefetch = 0 : i64, scratch_operands = 0 : i64, tpu.core_type = #tpu.core_type<tc>, window_params = [{transform_indices = @transform_0, window_bounds = array<i64: 18, 8, 4>}, {pipeline_mode = #tpu.pipeline_mode<synchronous>, transform_indices = @transform_1, window_bounds = array<i64: 3, 4, 16>}, {pipeline_mode = #tpu.pipeline_mode<synchronous>, transform_indices = @transform_2, window_bounds = array<i64: 1, 16>}, {pipeline_mode = #tpu.pipeline_mode<synchronous>, transform_indices = @transform_3, window_bounds = array<i64: 3, 16, 32>}, {pipeline_mode = #tpu.pipeline_mode<synchronous>, transform_indices = @transform_4, window_bounds = array<i64: 1, 32>}, {pipeline_mode = #tpu.pipeline_mode<synchronous>, transform_indices = @transform_5, window_bounds = array<i64: 32, 512>}, {pipeline_mode = #tpu.pipeline_mode<synchronous>, transform_indices = @transform_6, window_bounds = array<i64: 128, 512>}, {pipeline_mode = #tpu.pipeline_mode<synchronous>, transform_indices = @transform_7, window_bounds = array<i64: 1, 512>}, {pipeline_mode = #tpu.pipeline_mode<synchronous>, transform_indices = @transform_8, window_bounds = array<i64: 128, 32>}, {pipeline_mode = #tpu.pipeline_mode<synchronous>, transform_indices = @transform_9, window_bounds = array<i64: 1, 32>}, {pipeline_mode = #tpu.pipeline_mode<synchronous>, transform_indices = @transform_10, window_bounds = array<i64: 1, 32>}, {pipeline_mode = #tpu.pipeline_mode<synchronous>, transform_indices = @transform_11, window_bounds = array<i64: 1, 1>}, {transform_indices = @transform_12, window_bounds = array<i64: 8, 1>}]} {
    %c0 = arith.constant 0 : index
    %c0_0 = arith.constant 0 : index
    %c0_1 = arith.constant 0 : index
    %0 = vector.load %arg1[%c0, %c0_0, %c0_1] : memref<18x8x4xf32, #tpu.memory_space<vmem>>, vector<18x8x4xf32>
    %cst = arith.constant 0.000000e+00 : f32
    %1 = vector.broadcast %cst : f32 to vector<128x16xf32>
    %2 = vector.extract_strided_slice %0 {offsets = [0, 0, 0], sizes = [16, 8, 4], strides = [1, 1, 1]} : vector<18x8x4xf32> to vector<16x8x4xf32>
    %3 = vector.shape_cast %2 : vector<16x8x4xf32> to vector<128x4xf32>
    %c0_2 = arith.constant 0 : index
    %c0_3 = arith.constant 0 : index
    %c0_4 = arith.constant 0 : index
    %4 = vector.load %arg2[%c0_2, %c0_3, %c0_4] : memref<3x4x16xf32, #tpu.memory_space<vmem>>, vector<1x4x16xf32>
    %5 = vector.shape_cast %4 : vector<1x4x16xf32> to vector<4x16xf32>
    %cst_5 = arith.constant dense<0.000000e+00> : vector<128x16xf32>
    %6 = tpu.matmul %3, %5, %cst_5 {dimension_numbers = #tpu.dot_dimension_numbers<[1], [0], [0], [1], [0, 0, 1, 1], [], []>} : vector<128x4xf32>, vector<4x16xf32>, vector<128x16xf32> -> vector<128x16xf32>
    %7 = arith.addf %1, %6 : vector<128x16xf32>
    %8 = vector.extract_strided_slice %0 {offsets = [1, 0, 0], sizes = [16, 8, 4], strides = [1, 1, 1]} : vector<18x8x4xf32> to vector<16x8x4xf32>
    %9 = vector.shape_cast %8 : vector<16x8x4xf32> to vector<128x4xf32>
    %c1 = arith.constant 1 : index
    %c0_6 = arith.constant 0 : index
    %c0_7 = arith.constant 0 : index
    %10 = vector.load %arg2[%c1, %c0_6, %c0_7] : memref<3x4x16xf32, #tpu.memory_space<vmem>>, vector<1x4x16xf32>
    %11 = vector.shape_cast %10 : vector<1x4x16xf32> to vector<4x16xf32>
    %cst_8 = arith.constant dense<0.000000e+00> : vector<128x16xf32>
    %12 = tpu.matmul %9, %11, %cst_8 {dimension_numbers = #tpu.dot_dimension_numbers<[1], [0], [0], [1], [0, 0, 1, 1], [], []>} : vector<128x4xf32>, vector<4x16xf32>, vector<128x16xf32> -> vector<128x16xf32>
    %13 = arith.addf %7, %12 : vector<128x16xf32>
    %14 = vector.extract_strided_slice %0 {offsets = [2, 0, 0], sizes = [16, 8, 4], strides = [1, 1, 1]} : vector<18x8x4xf32> to vector<16x8x4xf32>
    %15 = vector.shape_cast %14 : vector<16x8x4xf32> to vector<128x4xf32>
    %c2 = arith.constant 2 : index
    %c0_9 = arith.constant 0 : index
    %c0_10 = arith.constant 0 : index
    %16 = vector.load %arg2[%c2, %c0_9, %c0_10] : memref<3x4x16xf32, #tpu.memory_space<vmem>>, vector<1x4x16xf32>
    %17 = vector.shape_cast %16 : vector<1x4x16xf32> to vector<4x16xf32>
    %cst_11 = arith.constant dense<0.000000e+00> : vector<128x16xf32>
    %18 = tpu.matmul %15, %17, %cst_11 {dimension_numbers = #tpu.dot_dimension_numbers<[1], [0], [0], [1], [0, 0, 1, 1], [], []>} : vector<128x4xf32>, vector<4x16xf32>, vector<128x16xf32> -> vector<128x16xf32>
    %19 = arith.addf %13, %18 : vector<128x16xf32>
    %c0_12 = arith.constant 0 : index
    %c0_13 = arith.constant 0 : index
    %20 = vector.load %arg3[%c0_12, %c0_13] : memref<1x16xf32, #tpu.memory_space<vmem>>, vector<1x16xf32>
    %21 = vector.broadcast %20 : vector<1x16xf32> to vector<128x16xf32>
    %22 = arith.addf %19, %21 : vector<128x16xf32>
    %23 = vector.shape_cast %22 : vector<128x16xf32> to vector<16x8x16xf32>
    %cst_14 = arith.constant 0.000000e+00 : f32
    %24 = vector.broadcast %cst_14 : f32 to vector<1x8x16xf32>
    %25 = tpu.concatenate %24, %23, %24 in 0 : vector<1x8x16xf32>, vector<16x8x16xf32>, vector<1x8x16xf32> -> vector<18x8x16xf32>
    %cst_15 = arith.constant 0.000000e+00 : f32
    %26 = vector.broadcast %cst_15 : f32 to vector<128x32xf32>
    %27 = vector.extract_strided_slice %25 {offsets = [0, 0, 0], sizes = [16, 8, 16], strides = [1, 1, 1]} : vector<18x8x16xf32> to vector<16x8x16xf32>
    %28 = vector.shape_cast %27 : vector<16x8x16xf32> to vector<128x16xf32>
    %c0_16 = arith.constant 0 : index
    %c0_17 = arith.constant 0 : index
    %c0_18 = arith.constant 0 : index
    %29 = vector.load %arg4[%c0_16, %c0_17, %c0_18] : memref<3x16x32xf32, #tpu.memory_space<vmem>>, vector<1x16x32xf32>
    %30 = vector.shape_cast %29 : vector<1x16x32xf32> to vector<16x32xf32>
    %cst_19 = arith.constant dense<0.000000e+00> : vector<128x32xf32>
    %31 = tpu.matmul %28, %30, %cst_19 {dimension_numbers = #tpu.dot_dimension_numbers<[1], [0], [0], [1], [0, 0, 1, 1], [], []>} : vector<128x16xf32>, vector<16x32xf32>, vector<128x32xf32> -> vector<128x32xf32>
    %32 = arith.addf %26, %31 : vector<128x32xf32>
    %33 = vector.extract_strided_slice %25 {offsets = [1, 0, 0], sizes = [16, 8, 16], strides = [1, 1, 1]} : vector<18x8x16xf32> to vector<16x8x16xf32>
    %34 = vector.shape_cast %33 : vector<16x8x16xf32> to vector<128x16xf32>
    %c1_20 = arith.constant 1 : index
    %c0_21 = arith.constant 0 : index
    %c0_22 = arith.constant 0 : index
    %35 = vector.load %arg4[%c1_20, %c0_21, %c0_22] : memref<3x16x32xf32, #tpu.memory_space<vmem>>, vector<1x16x32xf32>
    %36 = vector.shape_cast %35 : vector<1x16x32xf32> to vector<16x32xf32>
    %cst_23 = arith.constant dense<0.000000e+00> : vector<128x32xf32>
    %37 = tpu.matmul %34, %36, %cst_23 {dimension_numbers = #tpu.dot_dimension_numbers<[1], [0], [0], [1], [0, 0, 1, 1], [], []>} : vector<128x16xf32>, vector<16x32xf32>, vector<128x32xf32> -> vector<128x32xf32>
    %38 = arith.addf %32, %37 : vector<128x32xf32>
    %39 = vector.extract_strided_slice %25 {offsets = [2, 0, 0], sizes = [16, 8, 16], strides = [1, 1, 1]} : vector<18x8x16xf32> to vector<16x8x16xf32>
    %40 = vector.shape_cast %39 : vector<16x8x16xf32> to vector<128x16xf32>
    %c2_24 = arith.constant 2 : index
    %c0_25 = arith.constant 0 : index
    %c0_26 = arith.constant 0 : index
    %41 = vector.load %arg4[%c2_24, %c0_25, %c0_26] : memref<3x16x32xf32, #tpu.memory_space<vmem>>, vector<1x16x32xf32>
    %42 = vector.shape_cast %41 : vector<1x16x32xf32> to vector<16x32xf32>
    %cst_27 = arith.constant dense<0.000000e+00> : vector<128x32xf32>
    %43 = tpu.matmul %40, %42, %cst_27 {dimension_numbers = #tpu.dot_dimension_numbers<[1], [0], [0], [1], [0, 0, 1, 1], [], []>} : vector<128x16xf32>, vector<16x32xf32>, vector<128x32xf32> -> vector<128x32xf32>
    %44 = arith.addf %38, %43 : vector<128x32xf32>
    %c0_28 = arith.constant 0 : index
    %c0_29 = arith.constant 0 : index
    %45 = vector.load %arg5[%c0_28, %c0_29] : memref<1x32xf32, #tpu.memory_space<vmem>>, vector<1x32xf32>
    %46 = vector.broadcast %45 : vector<1x32xf32> to vector<128x32xf32>
    %47 = arith.addf %44, %46 : vector<128x32xf32>
    %c0_30 = arith.constant 0 : index
    %c0_31 = arith.constant 0 : index
    %48 = vector.load %arg6[%c0_30, %c0_31] : memref<32x512xf32, #tpu.memory_space<vmem>>, vector<32x512xf32>
    %cst_32 = arith.constant dense<0.000000e+00> : vector<128x512xf32>
    %49 = tpu.matmul %47, %48, %cst_32 {dimension_numbers = #tpu.dot_dimension_numbers<[1], [0], [0], [1], [0, 0, 1, 1], [], []>} : vector<128x32xf32>, vector<32x512xf32>, vector<128x512xf32> -> vector<128x512xf32>
    %c0_33 = arith.constant 0 : index
    %c0_34 = arith.constant 0 : index
    %50 = vector.load %arg8[%c0_33, %c0_34] : memref<1x512xf32, #tpu.memory_space<vmem>>, vector<1x512xf32>
    %51 = vector.broadcast %50 : vector<1x512xf32> to vector<128x512xf32>
    %52 = arith.addf %49, %51 : vector<128x512xf32>
    %53 = vector.shape_cast %52 : vector<128x512xf32> to vector<16x8x512xf32>
    %c0_35 = arith.constant 0 : index
    %c0_36 = arith.constant 0 : index
    %54 = vector.load %arg7[%c0_35, %c0_36] : memref<128x512xf32, #tpu.memory_space<vmem>>, vector<128x512xf32>
    %cst_37 = arith.constant 0.000000e+00 : f32
    %55 = vector.broadcast %cst_37 : f32 to vector<8x128xf32>
    %cst_38 = arith.constant 0.000000e+00 : f32
    %56 = vector.broadcast %cst_38 : f32 to vector<8x128xf32>
    %57 = vector.extract_strided_slice %53 {offsets = [0, 0, 0], sizes = [1, 8, 512], strides = [1, 1, 1]} : vector<16x8x512xf32> to vector<1x8x512xf32>
    %58 = vector.shape_cast %57 : vector<1x8x512xf32> to vector<8x512xf32>
    %cst_39 = arith.constant dense<0.000000e+00> : vector<8x512xf32>
    %59 = tpu.matmul %55, %54, %cst_39 {dimension_numbers = #tpu.dot_dimension_numbers<[1], [0], [0], [1], [0, 0, 1, 1], [], []>} : vector<8x128xf32>, vector<128x512xf32>, vector<8x512xf32> -> vector<8x512xf32>
    %60 = arith.addf %58, %59 : vector<8x512xf32>
    %61 = vector.extract_strided_slice %60 {offsets = [0, 0], sizes = [8, 128], strides = [1, 1]} : vector<8x512xf32> to vector<8x128xf32>
    %62 = arith.negf %61 : vector<8x128xf32>
    %63 = math.exp %62 : vector<8x128xf32>
    %cst_40 = arith.constant 1.000000e+00 : f32
    %64 = vector.broadcast %cst_40 : f32 to vector<8x128xf32>
    %65 = arith.addf %64, %63 : vector<8x128xf32>
    %66 = arith.divf %64, %65 : vector<8x128xf32>
    %67 = vector.extract_strided_slice %60 {offsets = [0, 128], sizes = [8, 128], strides = [1, 1]} : vector<8x512xf32> to vector<8x128xf32>
    %68 = arith.negf %67 : vector<8x128xf32>
    %69 = math.exp %68 : vector<8x128xf32>
    %cst_41 = arith.constant 1.000000e+00 : f32
    %70 = vector.broadcast %cst_41 : f32 to vector<8x128xf32>
    %71 = arith.addf %70, %69 : vector<8x128xf32>
    %72 = arith.divf %70, %71 : vector<8x128xf32>
    %73 = vector.extract_strided_slice %60 {offsets = [0, 256], sizes = [8, 128], strides = [1, 1]} : vector<8x512xf32> to vector<8x128xf32>
    %74 = math.tanh %73 : vector<8x128xf32>
    %75 = vector.extract_strided_slice %60 {offsets = [0, 384], sizes = [8, 128], strides = [1, 1]} : vector<8x512xf32> to vector<8x128xf32>
    %76 = arith.negf %75 : vector<8x128xf32>
    %77 = math.exp %76 : vector<8x128xf32>
    %cst_42 = arith.constant 1.000000e+00 : f32
    %78 = vector.broadcast %cst_42 : f32 to vector<8x128xf32>
    %79 = arith.addf %78, %77 : vector<8x128xf32>
    %80 = arith.divf %78, %79 : vector<8x128xf32>
    %81 = arith.mulf %72, %56 : vector<8x128xf32>
    %82 = arith.mulf %66, %74 : vector<8x128xf32>
    %83 = arith.addf %81, %82 : vector<8x128xf32>
    %84 = math.tanh %83 : vector<8x128xf32>
    %85 = arith.mulf %80, %84 : vector<8x128xf32>
    %86 = vector.extract_strided_slice %53 {offsets = [1, 0, 0], sizes = [1, 8, 512], strides = [1, 1, 1]} : vector<16x8x512xf32> to vector<1x8x512xf32>
    %87 = vector.shape_cast %86 : vector<1x8x512xf32> to vector<8x512xf32>
    %cst_43 = arith.constant dense<0.000000e+00> : vector<8x512xf32>
    %88 = tpu.matmul %85, %54, %cst_43 {dimension_numbers = #tpu.dot_dimension_numbers<[1], [0], [0], [1], [0, 0, 1, 1], [], []>} : vector<8x128xf32>, vector<128x512xf32>, vector<8x512xf32> -> vector<8x512xf32>
    %89 = arith.addf %87, %88 : vector<8x512xf32>
    %90 = vector.extract_strided_slice %89 {offsets = [0, 0], sizes = [8, 128], strides = [1, 1]} : vector<8x512xf32> to vector<8x128xf32>
    %91 = arith.negf %90 : vector<8x128xf32>
    %92 = math.exp %91 : vector<8x128xf32>
    %cst_44 = arith.constant 1.000000e+00 : f32
    %93 = vector.broadcast %cst_44 : f32 to vector<8x128xf32>
    %94 = arith.addf %93, %92 : vector<8x128xf32>
    %95 = arith.divf %93, %94 : vector<8x128xf32>
    %96 = vector.extract_strided_slice %89 {offsets = [0, 128], sizes = [8, 128], strides = [1, 1]} : vector<8x512xf32> to vector<8x128xf32>
    %97 = arith.negf %96 : vector<8x128xf32>
    %98 = math.exp %97 : vector<8x128xf32>
    %cst_45 = arith.constant 1.000000e+00 : f32
    %99 = vector.broadcast %cst_45 : f32 to vector<8x128xf32>
    %100 = arith.addf %99, %98 : vector<8x128xf32>
    %101 = arith.divf %99, %100 : vector<8x128xf32>
    %102 = vector.extract_strided_slice %89 {offsets = [0, 256], sizes = [8, 128], strides = [1, 1]} : vector<8x512xf32> to vector<8x128xf32>
    %103 = math.tanh %102 : vector<8x128xf32>
    %104 = vector.extract_strided_slice %89 {offsets = [0, 384], sizes = [8, 128], strides = [1, 1]} : vector<8x512xf32> to vector<8x128xf32>
    %105 = arith.negf %104 : vector<8x128xf32>
    %106 = math.exp %105 : vector<8x128xf32>
    %cst_46 = arith.constant 1.000000e+00 : f32
    %107 = vector.broadcast %cst_46 : f32 to vector<8x128xf32>
    %108 = arith.addf %107, %106 : vector<8x128xf32>
    %109 = arith.divf %107, %108 : vector<8x128xf32>
    %110 = arith.mulf %101, %83 : vector<8x128xf32>
    %111 = arith.mulf %95, %103 : vector<8x128xf32>
    %112 = arith.addf %110, %111 : vector<8x128xf32>
    %113 = math.tanh %112 : vector<8x128xf32>
    %114 = arith.mulf %109, %113 : vector<8x128xf32>
    %115 = vector.extract_strided_slice %53 {offsets = [2, 0, 0], sizes = [1, 8, 512], strides = [1, 1, 1]} : vector<16x8x512xf32> to vector<1x8x512xf32>
    %116 = vector.shape_cast %115 : vector<1x8x512xf32> to vector<8x512xf32>
    %cst_47 = arith.constant dense<0.000000e+00> : vector<8x512xf32>
    %117 = tpu.matmul %114, %54, %cst_47 {dimension_numbers = #tpu.dot_dimension_numbers<[1], [0], [0], [1], [0, 0, 1, 1], [], []>} : vector<8x128xf32>, vector<128x512xf32>, vector<8x512xf32> -> vector<8x512xf32>
    %118 = arith.addf %116, %117 : vector<8x512xf32>
    %119 = vector.extract_strided_slice %118 {offsets = [0, 0], sizes = [8, 128], strides = [1, 1]} : vector<8x512xf32> to vector<8x128xf32>
    %120 = arith.negf %119 : vector<8x128xf32>
    %121 = math.exp %120 : vector<8x128xf32>
    %cst_48 = arith.constant 1.000000e+00 : f32
    %122 = vector.broadcast %cst_48 : f32 to vector<8x128xf32>
    %123 = arith.addf %122, %121 : vector<8x128xf32>
    %124 = arith.divf %122, %123 : vector<8x128xf32>
    %125 = vector.extract_strided_slice %118 {offsets = [0, 128], sizes = [8, 128], strides = [1, 1]} : vector<8x512xf32> to vector<8x128xf32>
    %126 = arith.negf %125 : vector<8x128xf32>
    %127 = math.exp %126 : vector<8x128xf32>
    %cst_49 = arith.constant 1.000000e+00 : f32
    %128 = vector.broadcast %cst_49 : f32 to vector<8x128xf32>
    %129 = arith.addf %128, %127 : vector<8x128xf32>
    %130 = arith.divf %128, %129 : vector<8x128xf32>
    %131 = vector.extract_strided_slice %118 {offsets = [0, 256], sizes = [8, 128], strides = [1, 1]} : vector<8x512xf32> to vector<8x128xf32>
    %132 = math.tanh %131 : vector<8x128xf32>
    %133 = vector.extract_strided_slice %118 {offsets = [0, 384], sizes = [8, 128], strides = [1, 1]} : vector<8x512xf32> to vector<8x128xf32>
    %134 = arith.negf %133 : vector<8x128xf32>
    %135 = math.exp %134 : vector<8x128xf32>
    %cst_50 = arith.constant 1.000000e+00 : f32
    %136 = vector.broadcast %cst_50 : f32 to vector<8x128xf32>
    %137 = arith.addf %136, %135 : vector<8x128xf32>
    %138 = arith.divf %136, %137 : vector<8x128xf32>
    %139 = arith.mulf %130, %112 : vector<8x128xf32>
    %140 = arith.mulf %124, %132 : vector<8x128xf32>
    %141 = arith.addf %139, %140 : vector<8x128xf32>
    %142 = math.tanh %141 : vector<8x128xf32>
    %143 = arith.mulf %138, %142 : vector<8x128xf32>
    %144 = vector.extract_strided_slice %53 {offsets = [3, 0, 0], sizes = [1, 8, 512], strides = [1, 1, 1]} : vector<16x8x512xf32> to vector<1x8x512xf32>
    %145 = vector.shape_cast %144 : vector<1x8x512xf32> to vector<8x512xf32>
    %cst_51 = arith.constant dense<0.000000e+00> : vector<8x512xf32>
    %146 = tpu.matmul %143, %54, %cst_51 {dimension_numbers = #tpu.dot_dimension_numbers<[1], [0], [0], [1], [0, 0, 1, 1], [], []>} : vector<8x128xf32>, vector<128x512xf32>, vector<8x512xf32> -> vector<8x512xf32>
    %147 = arith.addf %145, %146 : vector<8x512xf32>
    %148 = vector.extract_strided_slice %147 {offsets = [0, 0], sizes = [8, 128], strides = [1, 1]} : vector<8x512xf32> to vector<8x128xf32>
    %149 = arith.negf %148 : vector<8x128xf32>
    %150 = math.exp %149 : vector<8x128xf32>
    %cst_52 = arith.constant 1.000000e+00 : f32
    %151 = vector.broadcast %cst_52 : f32 to vector<8x128xf32>
    %152 = arith.addf %151, %150 : vector<8x128xf32>
    %153 = arith.divf %151, %152 : vector<8x128xf32>
    %154 = vector.extract_strided_slice %147 {offsets = [0, 128], sizes = [8, 128], strides = [1, 1]} : vector<8x512xf32> to vector<8x128xf32>
    %155 = arith.negf %154 : vector<8x128xf32>
    %156 = math.exp %155 : vector<8x128xf32>
    %cst_53 = arith.constant 1.000000e+00 : f32
    %157 = vector.broadcast %cst_53 : f32 to vector<8x128xf32>
    %158 = arith.addf %157, %156 : vector<8x128xf32>
    %159 = arith.divf %157, %158 : vector<8x128xf32>
    %160 = vector.extract_strided_slice %147 {offsets = [0, 256], sizes = [8, 128], strides = [1, 1]} : vector<8x512xf32> to vector<8x128xf32>
    %161 = math.tanh %160 : vector<8x128xf32>
    %162 = vector.extract_strided_slice %147 {offsets = [0, 384], sizes = [8, 128], strides = [1, 1]} : vector<8x512xf32> to vector<8x128xf32>
    %163 = arith.negf %162 : vector<8x128xf32>
    %164 = math.exp %163 : vector<8x128xf32>
    %cst_54 = arith.constant 1.000000e+00 : f32
    %165 = vector.broadcast %cst_54 : f32 to vector<8x128xf32>
    %166 = arith.addf %165, %164 : vector<8x128xf32>
    %167 = arith.divf %165, %166 : vector<8x128xf32>
    %168 = arith.mulf %159, %141 : vector<8x128xf32>
    %169 = arith.mulf %153, %161 : vector<8x128xf32>
    %170 = arith.addf %168, %169 : vector<8x128xf32>
    %171 = math.tanh %170 : vector<8x128xf32>
    %172 = arith.mulf %167, %171 : vector<8x128xf32>
    %173 = vector.extract_strided_slice %53 {offsets = [4, 0, 0], sizes = [1, 8, 512], strides = [1, 1, 1]} : vector<16x8x512xf32> to vector<1x8x512xf32>
    %174 = vector.shape_cast %173 : vector<1x8x512xf32> to vector<8x512xf32>
    %cst_55 = arith.constant dense<0.000000e+00> : vector<8x512xf32>
    %175 = tpu.matmul %172, %54, %cst_55 {dimension_numbers = #tpu.dot_dimension_numbers<[1], [0], [0], [1], [0, 0, 1, 1], [], []>} : vector<8x128xf32>, vector<128x512xf32>, vector<8x512xf32> -> vector<8x512xf32>
    %176 = arith.addf %174, %175 : vector<8x512xf32>
    %177 = vector.extract_strided_slice %176 {offsets = [0, 0], sizes = [8, 128], strides = [1, 1]} : vector<8x512xf32> to vector<8x128xf32>
    %178 = arith.negf %177 : vector<8x128xf32>
    %179 = math.exp %178 : vector<8x128xf32>
    %cst_56 = arith.constant 1.000000e+00 : f32
    %180 = vector.broadcast %cst_56 : f32 to vector<8x128xf32>
    %181 = arith.addf %180, %179 : vector<8x128xf32>
    %182 = arith.divf %180, %181 : vector<8x128xf32>
    %183 = vector.extract_strided_slice %176 {offsets = [0, 128], sizes = [8, 128], strides = [1, 1]} : vector<8x512xf32> to vector<8x128xf32>
    %184 = arith.negf %183 : vector<8x128xf32>
    %185 = math.exp %184 : vector<8x128xf32>
    %cst_57 = arith.constant 1.000000e+00 : f32
    %186 = vector.broadcast %cst_57 : f32 to vector<8x128xf32>
    %187 = arith.addf %186, %185 : vector<8x128xf32>
    %188 = arith.divf %186, %187 : vector<8x128xf32>
    %189 = vector.extract_strided_slice %176 {offsets = [0, 256], sizes = [8, 128], strides = [1, 1]} : vector<8x512xf32> to vector<8x128xf32>
    %190 = math.tanh %189 : vector<8x128xf32>
    %191 = vector.extract_strided_slice %176 {offsets = [0, 384], sizes = [8, 128], strides = [1, 1]} : vector<8x512xf32> to vector<8x128xf32>
    %192 = arith.negf %191 : vector<8x128xf32>
    %193 = math.exp %192 : vector<8x128xf32>
    %cst_58 = arith.constant 1.000000e+00 : f32
    %194 = vector.broadcast %cst_58 : f32 to vector<8x128xf32>
    %195 = arith.addf %194, %193 : vector<8x128xf32>
    %196 = arith.divf %194, %195 : vector<8x128xf32>
    %197 = arith.mulf %188, %170 : vector<8x128xf32>
    %198 = arith.mulf %182, %190 : vector<8x128xf32>
    %199 = arith.addf %197, %198 : vector<8x128xf32>
    %200 = math.tanh %199 : vector<8x128xf32>
    %201 = arith.mulf %196, %200 : vector<8x128xf32>
    %202 = vector.extract_strided_slice %53 {offsets = [5, 0, 0], sizes = [1, 8, 512], strides = [1, 1, 1]} : vector<16x8x512xf32> to vector<1x8x512xf32>
    %203 = vector.shape_cast %202 : vector<1x8x512xf32> to vector<8x512xf32>
    %cst_59 = arith.constant dense<0.000000e+00> : vector<8x512xf32>
    %204 = tpu.matmul %201, %54, %cst_59 {dimension_numbers = #tpu.dot_dimension_numbers<[1], [0], [0], [1], [0, 0, 1, 1], [], []>} : vector<8x128xf32>, vector<128x512xf32>, vector<8x512xf32> -> vector<8x512xf32>
    %205 = arith.addf %203, %204 : vector<8x512xf32>
    %206 = vector.extract_strided_slice %205 {offsets = [0, 0], sizes = [8, 128], strides = [1, 1]} : vector<8x512xf32> to vector<8x128xf32>
    %207 = arith.negf %206 : vector<8x128xf32>
    %208 = math.exp %207 : vector<8x128xf32>
    %cst_60 = arith.constant 1.000000e+00 : f32
    %209 = vector.broadcast %cst_60 : f32 to vector<8x128xf32>
    %210 = arith.addf %209, %208 : vector<8x128xf32>
    %211 = arith.divf %209, %210 : vector<8x128xf32>
    %212 = vector.extract_strided_slice %205 {offsets = [0, 128], sizes = [8, 128], strides = [1, 1]} : vector<8x512xf32> to vector<8x128xf32>
    %213 = arith.negf %212 : vector<8x128xf32>
    %214 = math.exp %213 : vector<8x128xf32>
    %cst_61 = arith.constant 1.000000e+00 : f32
    %215 = vector.broadcast %cst_61 : f32 to vector<8x128xf32>
    %216 = arith.addf %215, %214 : vector<8x128xf32>
    %217 = arith.divf %215, %216 : vector<8x128xf32>
    %218 = vector.extract_strided_slice %205 {offsets = [0, 256], sizes = [8, 128], strides = [1, 1]} : vector<8x512xf32> to vector<8x128xf32>
    %219 = math.tanh %218 : vector<8x128xf32>
    %220 = vector.extract_strided_slice %205 {offsets = [0, 384], sizes = [8, 128], strides = [1, 1]} : vector<8x512xf32> to vector<8x128xf32>
    %221 = arith.negf %220 : vector<8x128xf32>
    %222 = math.exp %221 : vector<8x128xf32>
    %cst_62 = arith.constant 1.000000e+00 : f32
    %223 = vector.broadcast %cst_62 : f32 to vector<8x128xf32>
    %224 = arith.addf %223, %222 : vector<8x128xf32>
    %225 = arith.divf %223, %224 : vector<8x128xf32>
    %226 = arith.mulf %217, %199 : vector<8x128xf32>
    %227 = arith.mulf %211, %219 : vector<8x128xf32>
    %228 = arith.addf %226, %227 : vector<8x128xf32>
    %229 = math.tanh %228 : vector<8x128xf32>
    %230 = arith.mulf %225, %229 : vector<8x128xf32>
    %231 = vector.extract_strided_slice %53 {offsets = [6, 0, 0], sizes = [1, 8, 512], strides = [1, 1, 1]} : vector<16x8x512xf32> to vector<1x8x512xf32>
    %232 = vector.shape_cast %231 : vector<1x8x512xf32> to vector<8x512xf32>
    %cst_63 = arith.constant dense<0.000000e+00> : vector<8x512xf32>
    %233 = tpu.matmul %230, %54, %cst_63 {dimension_numbers = #tpu.dot_dimension_numbers<[1], [0], [0], [1], [0, 0, 1, 1], [], []>} : vector<8x128xf32>, vector<128x512xf32>, vector<8x512xf32> -> vector<8x512xf32>
    %234 = arith.addf %232, %233 : vector<8x512xf32>
    %235 = vector.extract_strided_slice %234 {offsets = [0, 0], sizes = [8, 128], strides = [1, 1]} : vector<8x512xf32> to vector<8x128xf32>
    %236 = arith.negf %235 : vector<8x128xf32>
    %237 = math.exp %236 : vector<8x128xf32>
    %cst_64 = arith.constant 1.000000e+00 : f32
    %238 = vector.broadcast %cst_64 : f32 to vector<8x128xf32>
    %239 = arith.addf %238, %237 : vector<8x128xf32>
    %240 = arith.divf %238, %239 : vector<8x128xf32>
    %241 = vector.extract_strided_slice %234 {offsets = [0, 128], sizes = [8, 128], strides = [1, 1]} : vector<8x512xf32> to vector<8x128xf32>
    %242 = arith.negf %241 : vector<8x128xf32>
    %243 = math.exp %242 : vector<8x128xf32>
    %cst_65 = arith.constant 1.000000e+00 : f32
    %244 = vector.broadcast %cst_65 : f32 to vector<8x128xf32>
    %245 = arith.addf %244, %243 : vector<8x128xf32>
    %246 = arith.divf %244, %245 : vector<8x128xf32>
    %247 = vector.extract_strided_slice %234 {offsets = [0, 256], sizes = [8, 128], strides = [1, 1]} : vector<8x512xf32> to vector<8x128xf32>
    %248 = math.tanh %247 : vector<8x128xf32>
    %249 = vector.extract_strided_slice %234 {offsets = [0, 384], sizes = [8, 128], strides = [1, 1]} : vector<8x512xf32> to vector<8x128xf32>
    %250 = arith.negf %249 : vector<8x128xf32>
    %251 = math.exp %250 : vector<8x128xf32>
    %cst_66 = arith.constant 1.000000e+00 : f32
    %252 = vector.broadcast %cst_66 : f32 to vector<8x128xf32>
    %253 = arith.addf %252, %251 : vector<8x128xf32>
    %254 = arith.divf %252, %253 : vector<8x128xf32>
    %255 = arith.mulf %246, %228 : vector<8x128xf32>
    %256 = arith.mulf %240, %248 : vector<8x128xf32>
    %257 = arith.addf %255, %256 : vector<8x128xf32>
    %258 = math.tanh %257 : vector<8x128xf32>
    %259 = arith.mulf %254, %258 : vector<8x128xf32>
    %260 = vector.extract_strided_slice %53 {offsets = [7, 0, 0], sizes = [1, 8, 512], strides = [1, 1, 1]} : vector<16x8x512xf32> to vector<1x8x512xf32>
    %261 = vector.shape_cast %260 : vector<1x8x512xf32> to vector<8x512xf32>
    %cst_67 = arith.constant dense<0.000000e+00> : vector<8x512xf32>
    %262 = tpu.matmul %259, %54, %cst_67 {dimension_numbers = #tpu.dot_dimension_numbers<[1], [0], [0], [1], [0, 0, 1, 1], [], []>} : vector<8x128xf32>, vector<128x512xf32>, vector<8x512xf32> -> vector<8x512xf32>
    %263 = arith.addf %261, %262 : vector<8x512xf32>
    %264 = vector.extract_strided_slice %263 {offsets = [0, 0], sizes = [8, 128], strides = [1, 1]} : vector<8x512xf32> to vector<8x128xf32>
    %265 = arith.negf %264 : vector<8x128xf32>
    %266 = math.exp %265 : vector<8x128xf32>
    %cst_68 = arith.constant 1.000000e+00 : f32
    %267 = vector.broadcast %cst_68 : f32 to vector<8x128xf32>
    %268 = arith.addf %267, %266 : vector<8x128xf32>
    %269 = arith.divf %267, %268 : vector<8x128xf32>
    %270 = vector.extract_strided_slice %263 {offsets = [0, 128], sizes = [8, 128], strides = [1, 1]} : vector<8x512xf32> to vector<8x128xf32>
    %271 = arith.negf %270 : vector<8x128xf32>
    %272 = math.exp %271 : vector<8x128xf32>
    %cst_69 = arith.constant 1.000000e+00 : f32
    %273 = vector.broadcast %cst_69 : f32 to vector<8x128xf32>
    %274 = arith.addf %273, %272 : vector<8x128xf32>
    %275 = arith.divf %273, %274 : vector<8x128xf32>
    %276 = vector.extract_strided_slice %263 {offsets = [0, 256], sizes = [8, 128], strides = [1, 1]} : vector<8x512xf32> to vector<8x128xf32>
    %277 = math.tanh %276 : vector<8x128xf32>
    %278 = vector.extract_strided_slice %263 {offsets = [0, 384], sizes = [8, 128], strides = [1, 1]} : vector<8x512xf32> to vector<8x128xf32>
    %279 = arith.negf %278 : vector<8x128xf32>
    %280 = math.exp %279 : vector<8x128xf32>
    %cst_70 = arith.constant 1.000000e+00 : f32
    %281 = vector.broadcast %cst_70 : f32 to vector<8x128xf32>
    %282 = arith.addf %281, %280 : vector<8x128xf32>
    %283 = arith.divf %281, %282 : vector<8x128xf32>
    %284 = arith.mulf %275, %257 : vector<8x128xf32>
    %285 = arith.mulf %269, %277 : vector<8x128xf32>
    %286 = arith.addf %284, %285 : vector<8x128xf32>
    %287 = math.tanh %286 : vector<8x128xf32>
    %288 = arith.mulf %283, %287 : vector<8x128xf32>
    %289 = vector.extract_strided_slice %53 {offsets = [8, 0, 0], sizes = [1, 8, 512], strides = [1, 1, 1]} : vector<16x8x512xf32> to vector<1x8x512xf32>
    %290 = vector.shape_cast %289 : vector<1x8x512xf32> to vector<8x512xf32>
    %cst_71 = arith.constant dense<0.000000e+00> : vector<8x512xf32>
    %291 = tpu.matmul %288, %54, %cst_71 {dimension_numbers = #tpu.dot_dimension_numbers<[1], [0], [0], [1], [0, 0, 1, 1], [], []>} : vector<8x128xf32>, vector<128x512xf32>, vector<8x512xf32> -> vector<8x512xf32>
    %292 = arith.addf %290, %291 : vector<8x512xf32>
    %293 = vector.extract_strided_slice %292 {offsets = [0, 0], sizes = [8, 128], strides = [1, 1]} : vector<8x512xf32> to vector<8x128xf32>
    %294 = arith.negf %293 : vector<8x128xf32>
    %295 = math.exp %294 : vector<8x128xf32>
    %cst_72 = arith.constant 1.000000e+00 : f32
    %296 = vector.broadcast %cst_72 : f32 to vector<8x128xf32>
    %297 = arith.addf %296, %295 : vector<8x128xf32>
    %298 = arith.divf %296, %297 : vector<8x128xf32>
    %299 = vector.extract_strided_slice %292 {offsets = [0, 128], sizes = [8, 128], strides = [1, 1]} : vector<8x512xf32> to vector<8x128xf32>
    %300 = arith.negf %299 : vector<8x128xf32>
    %301 = math.exp %300 : vector<8x128xf32>
    %cst_73 = arith.constant 1.000000e+00 : f32
    %302 = vector.broadcast %cst_73 : f32 to vector<8x128xf32>
    %303 = arith.addf %302, %301 : vector<8x128xf32>
    %304 = arith.divf %302, %303 : vector<8x128xf32>
    %305 = vector.extract_strided_slice %292 {offsets = [0, 256], sizes = [8, 128], strides = [1, 1]} : vector<8x512xf32> to vector<8x128xf32>
    %306 = math.tanh %305 : vector<8x128xf32>
    %307 = vector.extract_strided_slice %292 {offsets = [0, 384], sizes = [8, 128], strides = [1, 1]} : vector<8x512xf32> to vector<8x128xf32>
    %308 = arith.negf %307 : vector<8x128xf32>
    %309 = math.exp %308 : vector<8x128xf32>
    %cst_74 = arith.constant 1.000000e+00 : f32
    %310 = vector.broadcast %cst_74 : f32 to vector<8x128xf32>
    %311 = arith.addf %310, %309 : vector<8x128xf32>
    %312 = arith.divf %310, %311 : vector<8x128xf32>
    %313 = arith.mulf %304, %286 : vector<8x128xf32>
    %314 = arith.mulf %298, %306 : vector<8x128xf32>
    %315 = arith.addf %313, %314 : vector<8x128xf32>
    %316 = math.tanh %315 : vector<8x128xf32>
    %317 = arith.mulf %312, %316 : vector<8x128xf32>
    %318 = vector.extract_strided_slice %53 {offsets = [9, 0, 0], sizes = [1, 8, 512], strides = [1, 1, 1]} : vector<16x8x512xf32> to vector<1x8x512xf32>
    %319 = vector.shape_cast %318 : vector<1x8x512xf32> to vector<8x512xf32>
    %cst_75 = arith.constant dense<0.000000e+00> : vector<8x512xf32>
    %320 = tpu.matmul %317, %54, %cst_75 {dimension_numbers = #tpu.dot_dimension_numbers<[1], [0], [0], [1], [0, 0, 1, 1], [], []>} : vector<8x128xf32>, vector<128x512xf32>, vector<8x512xf32> -> vector<8x512xf32>
    %321 = arith.addf %319, %320 : vector<8x512xf32>
    %322 = vector.extract_strided_slice %321 {offsets = [0, 0], sizes = [8, 128], strides = [1, 1]} : vector<8x512xf32> to vector<8x128xf32>
    %323 = arith.negf %322 : vector<8x128xf32>
    %324 = math.exp %323 : vector<8x128xf32>
    %cst_76 = arith.constant 1.000000e+00 : f32
    %325 = vector.broadcast %cst_76 : f32 to vector<8x128xf32>
    %326 = arith.addf %325, %324 : vector<8x128xf32>
    %327 = arith.divf %325, %326 : vector<8x128xf32>
    %328 = vector.extract_strided_slice %321 {offsets = [0, 128], sizes = [8, 128], strides = [1, 1]} : vector<8x512xf32> to vector<8x128xf32>
    %329 = arith.negf %328 : vector<8x128xf32>
    %330 = math.exp %329 : vector<8x128xf32>
    %cst_77 = arith.constant 1.000000e+00 : f32
    %331 = vector.broadcast %cst_77 : f32 to vector<8x128xf32>
    %332 = arith.addf %331, %330 : vector<8x128xf32>
    %333 = arith.divf %331, %332 : vector<8x128xf32>
    %334 = vector.extract_strided_slice %321 {offsets = [0, 256], sizes = [8, 128], strides = [1, 1]} : vector<8x512xf32> to vector<8x128xf32>
    %335 = math.tanh %334 : vector<8x128xf32>
    %336 = vector.extract_strided_slice %321 {offsets = [0, 384], sizes = [8, 128], strides = [1, 1]} : vector<8x512xf32> to vector<8x128xf32>
    %337 = arith.negf %336 : vector<8x128xf32>
    %338 = math.exp %337 : vector<8x128xf32>
    %cst_78 = arith.constant 1.000000e+00 : f32
    %339 = vector.broadcast %cst_78 : f32 to vector<8x128xf32>
    %340 = arith.addf %339, %338 : vector<8x128xf32>
    %341 = arith.divf %339, %340 : vector<8x128xf32>
    %342 = arith.mulf %333, %315 : vector<8x128xf32>
    %343 = arith.mulf %327, %335 : vector<8x128xf32>
    %344 = arith.addf %342, %343 : vector<8x128xf32>
    %345 = math.tanh %344 : vector<8x128xf32>
    %346 = arith.mulf %341, %345 : vector<8x128xf32>
    %347 = vector.extract_strided_slice %53 {offsets = [10, 0, 0], sizes = [1, 8, 512], strides = [1, 1, 1]} : vector<16x8x512xf32> to vector<1x8x512xf32>
    %348 = vector.shape_cast %347 : vector<1x8x512xf32> to vector<8x512xf32>
    %cst_79 = arith.constant dense<0.000000e+00> : vector<8x512xf32>
    %349 = tpu.matmul %346, %54, %cst_79 {dimension_numbers = #tpu.dot_dimension_numbers<[1], [0], [0], [1], [0, 0, 1, 1], [], []>} : vector<8x128xf32>, vector<128x512xf32>, vector<8x512xf32> -> vector<8x512xf32>
    %350 = arith.addf %348, %349 : vector<8x512xf32>
    %351 = vector.extract_strided_slice %350 {offsets = [0, 0], sizes = [8, 128], strides = [1, 1]} : vector<8x512xf32> to vector<8x128xf32>
    %352 = arith.negf %351 : vector<8x128xf32>
    %353 = math.exp %352 : vector<8x128xf32>
    %cst_80 = arith.constant 1.000000e+00 : f32
    %354 = vector.broadcast %cst_80 : f32 to vector<8x128xf32>
    %355 = arith.addf %354, %353 : vector<8x128xf32>
    %356 = arith.divf %354, %355 : vector<8x128xf32>
    %357 = vector.extract_strided_slice %350 {offsets = [0, 128], sizes = [8, 128], strides = [1, 1]} : vector<8x512xf32> to vector<8x128xf32>
    %358 = arith.negf %357 : vector<8x128xf32>
    %359 = math.exp %358 : vector<8x128xf32>
    %cst_81 = arith.constant 1.000000e+00 : f32
    %360 = vector.broadcast %cst_81 : f32 to vector<8x128xf32>
    %361 = arith.addf %360, %359 : vector<8x128xf32>
    %362 = arith.divf %360, %361 : vector<8x128xf32>
    %363 = vector.extract_strided_slice %350 {offsets = [0, 256], sizes = [8, 128], strides = [1, 1]} : vector<8x512xf32> to vector<8x128xf32>
    %364 = math.tanh %363 : vector<8x128xf32>
    %365 = vector.extract_strided_slice %350 {offsets = [0, 384], sizes = [8, 128], strides = [1, 1]} : vector<8x512xf32> to vector<8x128xf32>
    %366 = arith.negf %365 : vector<8x128xf32>
    %367 = math.exp %366 : vector<8x128xf32>
    %cst_82 = arith.constant 1.000000e+00 : f32
    %368 = vector.broadcast %cst_82 : f32 to vector<8x128xf32>
    %369 = arith.addf %368, %367 : vector<8x128xf32>
    %370 = arith.divf %368, %369 : vector<8x128xf32>
    %371 = arith.mulf %362, %344 : vector<8x128xf32>
    %372 = arith.mulf %356, %364 : vector<8x128xf32>
    %373 = arith.addf %371, %372 : vector<8x128xf32>
    %374 = math.tanh %373 : vector<8x128xf32>
    %375 = arith.mulf %370, %374 : vector<8x128xf32>
    %376 = vector.extract_strided_slice %53 {offsets = [11, 0, 0], sizes = [1, 8, 512], strides = [1, 1, 1]} : vector<16x8x512xf32> to vector<1x8x512xf32>
    %377 = vector.shape_cast %376 : vector<1x8x512xf32> to vector<8x512xf32>
    %cst_83 = arith.constant dense<0.000000e+00> : vector<8x512xf32>
    %378 = tpu.matmul %375, %54, %cst_83 {dimension_numbers = #tpu.dot_dimension_numbers<[1], [0], [0], [1], [0, 0, 1, 1], [], []>} : vector<8x128xf32>, vector<128x512xf32>, vector<8x512xf32> -> vector<8x512xf32>
    %379 = arith.addf %377, %378 : vector<8x512xf32>
    %380 = vector.extract_strided_slice %379 {offsets = [0, 0], sizes = [8, 128], strides = [1, 1]} : vector<8x512xf32> to vector<8x128xf32>
    %381 = arith.negf %380 : vector<8x128xf32>
    %382 = math.exp %381 : vector<8x128xf32>
    %cst_84 = arith.constant 1.000000e+00 : f32
    %383 = vector.broadcast %cst_84 : f32 to vector<8x128xf32>
    %384 = arith.addf %383, %382 : vector<8x128xf32>
    %385 = arith.divf %383, %384 : vector<8x128xf32>
    %386 = vector.extract_strided_slice %379 {offsets = [0, 128], sizes = [8, 128], strides = [1, 1]} : vector<8x512xf32> to vector<8x128xf32>
    %387 = arith.negf %386 : vector<8x128xf32>
    %388 = math.exp %387 : vector<8x128xf32>
    %cst_85 = arith.constant 1.000000e+00 : f32
    %389 = vector.broadcast %cst_85 : f32 to vector<8x128xf32>
    %390 = arith.addf %389, %388 : vector<8x128xf32>
    %391 = arith.divf %389, %390 : vector<8x128xf32>
    %392 = vector.extract_strided_slice %379 {offsets = [0, 256], sizes = [8, 128], strides = [1, 1]} : vector<8x512xf32> to vector<8x128xf32>
    %393 = math.tanh %392 : vector<8x128xf32>
    %394 = vector.extract_strided_slice %379 {offsets = [0, 384], sizes = [8, 128], strides = [1, 1]} : vector<8x512xf32> to vector<8x128xf32>
    %395 = arith.negf %394 : vector<8x128xf32>
    %396 = math.exp %395 : vector<8x128xf32>
    %cst_86 = arith.constant 1.000000e+00 : f32
    %397 = vector.broadcast %cst_86 : f32 to vector<8x128xf32>
    %398 = arith.addf %397, %396 : vector<8x128xf32>
    %399 = arith.divf %397, %398 : vector<8x128xf32>
    %400 = arith.mulf %391, %373 : vector<8x128xf32>
    %401 = arith.mulf %385, %393 : vector<8x128xf32>
    %402 = arith.addf %400, %401 : vector<8x128xf32>
    %403 = math.tanh %402 : vector<8x128xf32>
    %404 = arith.mulf %399, %403 : vector<8x128xf32>
    %405 = vector.extract_strided_slice %53 {offsets = [12, 0, 0], sizes = [1, 8, 512], strides = [1, 1, 1]} : vector<16x8x512xf32> to vector<1x8x512xf32>
    %406 = vector.shape_cast %405 : vector<1x8x512xf32> to vector<8x512xf32>
    %cst_87 = arith.constant dense<0.000000e+00> : vector<8x512xf32>
    %407 = tpu.matmul %404, %54, %cst_87 {dimension_numbers = #tpu.dot_dimension_numbers<[1], [0], [0], [1], [0, 0, 1, 1], [], []>} : vector<8x128xf32>, vector<128x512xf32>, vector<8x512xf32> -> vector<8x512xf32>
    %408 = arith.addf %406, %407 : vector<8x512xf32>
    %409 = vector.extract_strided_slice %408 {offsets = [0, 0], sizes = [8, 128], strides = [1, 1]} : vector<8x512xf32> to vector<8x128xf32>
    %410 = arith.negf %409 : vector<8x128xf32>
    %411 = math.exp %410 : vector<8x128xf32>
    %cst_88 = arith.constant 1.000000e+00 : f32
    %412 = vector.broadcast %cst_88 : f32 to vector<8x128xf32>
    %413 = arith.addf %412, %411 : vector<8x128xf32>
    %414 = arith.divf %412, %413 : vector<8x128xf32>
    %415 = vector.extract_strided_slice %408 {offsets = [0, 128], sizes = [8, 128], strides = [1, 1]} : vector<8x512xf32> to vector<8x128xf32>
    %416 = arith.negf %415 : vector<8x128xf32>
    %417 = math.exp %416 : vector<8x128xf32>
    %cst_89 = arith.constant 1.000000e+00 : f32
    %418 = vector.broadcast %cst_89 : f32 to vector<8x128xf32>
    %419 = arith.addf %418, %417 : vector<8x128xf32>
    %420 = arith.divf %418, %419 : vector<8x128xf32>
    %421 = vector.extract_strided_slice %408 {offsets = [0, 256], sizes = [8, 128], strides = [1, 1]} : vector<8x512xf32> to vector<8x128xf32>
    %422 = math.tanh %421 : vector<8x128xf32>
    %423 = vector.extract_strided_slice %408 {offsets = [0, 384], sizes = [8, 128], strides = [1, 1]} : vector<8x512xf32> to vector<8x128xf32>
    %424 = arith.negf %423 : vector<8x128xf32>
    %425 = math.exp %424 : vector<8x128xf32>
    %cst_90 = arith.constant 1.000000e+00 : f32
    %426 = vector.broadcast %cst_90 : f32 to vector<8x128xf32>
    %427 = arith.addf %426, %425 : vector<8x128xf32>
    %428 = arith.divf %426, %427 : vector<8x128xf32>
    %429 = arith.mulf %420, %402 : vector<8x128xf32>
    %430 = arith.mulf %414, %422 : vector<8x128xf32>
    %431 = arith.addf %429, %430 : vector<8x128xf32>
    %432 = math.tanh %431 : vector<8x128xf32>
    %433 = arith.mulf %428, %432 : vector<8x128xf32>
    %434 = vector.extract_strided_slice %53 {offsets = [13, 0, 0], sizes = [1, 8, 512], strides = [1, 1, 1]} : vector<16x8x512xf32> to vector<1x8x512xf32>
    %435 = vector.shape_cast %434 : vector<1x8x512xf32> to vector<8x512xf32>
    %cst_91 = arith.constant dense<0.000000e+00> : vector<8x512xf32>
    %436 = tpu.matmul %433, %54, %cst_91 {dimension_numbers = #tpu.dot_dimension_numbers<[1], [0], [0], [1], [0, 0, 1, 1], [], []>} : vector<8x128xf32>, vector<128x512xf32>, vector<8x512xf32> -> vector<8x512xf32>
    %437 = arith.addf %435, %436 : vector<8x512xf32>
    %438 = vector.extract_strided_slice %437 {offsets = [0, 0], sizes = [8, 128], strides = [1, 1]} : vector<8x512xf32> to vector<8x128xf32>
    %439 = arith.negf %438 : vector<8x128xf32>
    %440 = math.exp %439 : vector<8x128xf32>
    %cst_92 = arith.constant 1.000000e+00 : f32
    %441 = vector.broadcast %cst_92 : f32 to vector<8x128xf32>
    %442 = arith.addf %441, %440 : vector<8x128xf32>
    %443 = arith.divf %441, %442 : vector<8x128xf32>
    %444 = vector.extract_strided_slice %437 {offsets = [0, 128], sizes = [8, 128], strides = [1, 1]} : vector<8x512xf32> to vector<8x128xf32>
    %445 = arith.negf %444 : vector<8x128xf32>
    %446 = math.exp %445 : vector<8x128xf32>
    %cst_93 = arith.constant 1.000000e+00 : f32
    %447 = vector.broadcast %cst_93 : f32 to vector<8x128xf32>
    %448 = arith.addf %447, %446 : vector<8x128xf32>
    %449 = arith.divf %447, %448 : vector<8x128xf32>
    %450 = vector.extract_strided_slice %437 {offsets = [0, 256], sizes = [8, 128], strides = [1, 1]} : vector<8x512xf32> to vector<8x128xf32>
    %451 = math.tanh %450 : vector<8x128xf32>
    %452 = vector.extract_strided_slice %437 {offsets = [0, 384], sizes = [8, 128], strides = [1, 1]} : vector<8x512xf32> to vector<8x128xf32>
    %453 = arith.negf %452 : vector<8x128xf32>
    %454 = math.exp %453 : vector<8x128xf32>
    %cst_94 = arith.constant 1.000000e+00 : f32
    %455 = vector.broadcast %cst_94 : f32 to vector<8x128xf32>
    %456 = arith.addf %455, %454 : vector<8x128xf32>
    %457 = arith.divf %455, %456 : vector<8x128xf32>
    %458 = arith.mulf %449, %431 : vector<8x128xf32>
    %459 = arith.mulf %443, %451 : vector<8x128xf32>
    %460 = arith.addf %458, %459 : vector<8x128xf32>
    %461 = math.tanh %460 : vector<8x128xf32>
    %462 = arith.mulf %457, %461 : vector<8x128xf32>
    %463 = vector.extract_strided_slice %53 {offsets = [14, 0, 0], sizes = [1, 8, 512], strides = [1, 1, 1]} : vector<16x8x512xf32> to vector<1x8x512xf32>
    %464 = vector.shape_cast %463 : vector<1x8x512xf32> to vector<8x512xf32>
    %cst_95 = arith.constant dense<0.000000e+00> : vector<8x512xf32>
    %465 = tpu.matmul %462, %54, %cst_95 {dimension_numbers = #tpu.dot_dimension_numbers<[1], [0], [0], [1], [0, 0, 1, 1], [], []>} : vector<8x128xf32>, vector<128x512xf32>, vector<8x512xf32> -> vector<8x512xf32>
    %466 = arith.addf %464, %465 : vector<8x512xf32>
    %467 = vector.extract_strided_slice %466 {offsets = [0, 0], sizes = [8, 128], strides = [1, 1]} : vector<8x512xf32> to vector<8x128xf32>
    %468 = arith.negf %467 : vector<8x128xf32>
    %469 = math.exp %468 : vector<8x128xf32>
    %cst_96 = arith.constant 1.000000e+00 : f32
    %470 = vector.broadcast %cst_96 : f32 to vector<8x128xf32>
    %471 = arith.addf %470, %469 : vector<8x128xf32>
    %472 = arith.divf %470, %471 : vector<8x128xf32>
    %473 = vector.extract_strided_slice %466 {offsets = [0, 128], sizes = [8, 128], strides = [1, 1]} : vector<8x512xf32> to vector<8x128xf32>
    %474 = arith.negf %473 : vector<8x128xf32>
    %475 = math.exp %474 : vector<8x128xf32>
    %cst_97 = arith.constant 1.000000e+00 : f32
    %476 = vector.broadcast %cst_97 : f32 to vector<8x128xf32>
    %477 = arith.addf %476, %475 : vector<8x128xf32>
    %478 = arith.divf %476, %477 : vector<8x128xf32>
    %479 = vector.extract_strided_slice %466 {offsets = [0, 256], sizes = [8, 128], strides = [1, 1]} : vector<8x512xf32> to vector<8x128xf32>
    %480 = math.tanh %479 : vector<8x128xf32>
    %481 = vector.extract_strided_slice %466 {offsets = [0, 384], sizes = [8, 128], strides = [1, 1]} : vector<8x512xf32> to vector<8x128xf32>
    %482 = arith.negf %481 : vector<8x128xf32>
    %483 = math.exp %482 : vector<8x128xf32>
    %cst_98 = arith.constant 1.000000e+00 : f32
    %484 = vector.broadcast %cst_98 : f32 to vector<8x128xf32>
    %485 = arith.addf %484, %483 : vector<8x128xf32>
    %486 = arith.divf %484, %485 : vector<8x128xf32>
    %487 = arith.mulf %478, %460 : vector<8x128xf32>
    %488 = arith.mulf %472, %480 : vector<8x128xf32>
    %489 = arith.addf %487, %488 : vector<8x128xf32>
    %490 = math.tanh %489 : vector<8x128xf32>
    %491 = arith.mulf %486, %490 : vector<8x128xf32>
    %492 = vector.extract_strided_slice %53 {offsets = [15, 0, 0], sizes = [1, 8, 512], strides = [1, 1, 1]} : vector<16x8x512xf32> to vector<1x8x512xf32>
    %493 = vector.shape_cast %492 : vector<1x8x512xf32> to vector<8x512xf32>
    %cst_99 = arith.constant dense<0.000000e+00> : vector<8x512xf32>
    %494 = tpu.matmul %491, %54, %cst_99 {dimension_numbers = #tpu.dot_dimension_numbers<[1], [0], [0], [1], [0, 0, 1, 1], [], []>} : vector<8x128xf32>, vector<128x512xf32>, vector<8x512xf32> -> vector<8x512xf32>
    %495 = arith.addf %493, %494 : vector<8x512xf32>
    %496 = vector.extract_strided_slice %495 {offsets = [0, 0], sizes = [8, 128], strides = [1, 1]} : vector<8x512xf32> to vector<8x128xf32>
    %497 = arith.negf %496 : vector<8x128xf32>
    %498 = math.exp %497 : vector<8x128xf32>
    %cst_100 = arith.constant 1.000000e+00 : f32
    %499 = vector.broadcast %cst_100 : f32 to vector<8x128xf32>
    %500 = arith.addf %499, %498 : vector<8x128xf32>
    %501 = arith.divf %499, %500 : vector<8x128xf32>
    %502 = vector.extract_strided_slice %495 {offsets = [0, 128], sizes = [8, 128], strides = [1, 1]} : vector<8x512xf32> to vector<8x128xf32>
    %503 = arith.negf %502 : vector<8x128xf32>
    %504 = math.exp %503 : vector<8x128xf32>
    %cst_101 = arith.constant 1.000000e+00 : f32
    %505 = vector.broadcast %cst_101 : f32 to vector<8x128xf32>
    %506 = arith.addf %505, %504 : vector<8x128xf32>
    %507 = arith.divf %505, %506 : vector<8x128xf32>
    %508 = vector.extract_strided_slice %495 {offsets = [0, 256], sizes = [8, 128], strides = [1, 1]} : vector<8x512xf32> to vector<8x128xf32>
    %509 = math.tanh %508 : vector<8x128xf32>
    %510 = vector.extract_strided_slice %495 {offsets = [0, 384], sizes = [8, 128], strides = [1, 1]} : vector<8x512xf32> to vector<8x128xf32>
    %511 = arith.negf %510 : vector<8x128xf32>
    %512 = math.exp %511 : vector<8x128xf32>
    %cst_102 = arith.constant 1.000000e+00 : f32
    %513 = vector.broadcast %cst_102 : f32 to vector<8x128xf32>
    %514 = arith.addf %513, %512 : vector<8x128xf32>
    %515 = arith.divf %513, %514 : vector<8x128xf32>
    %516 = arith.mulf %507, %489 : vector<8x128xf32>
    %517 = arith.mulf %501, %509 : vector<8x128xf32>
    %518 = arith.addf %516, %517 : vector<8x128xf32>
    %519 = math.tanh %518 : vector<8x128xf32>
    %520 = arith.mulf %515, %519 : vector<8x128xf32>
    %c0_103 = arith.constant 0 : index
    %c0_104 = arith.constant 0 : index
    %521 = vector.load %arg9[%c0_103, %c0_104] : memref<128x32xf32, #tpu.memory_space<vmem>>, vector<128x32xf32>
    %cst_105 = arith.constant dense<0.000000e+00> : vector<8x32xf32>
    %522 = tpu.matmul %520, %521, %cst_105 {dimension_numbers = #tpu.dot_dimension_numbers<[1], [0], [0], [1], [0, 0, 1, 1], [], []>} : vector<8x128xf32>, vector<128x32xf32>, vector<8x32xf32> -> vector<8x32xf32>
    %c0_106 = arith.constant 0 : index
    %c0_107 = arith.constant 0 : index
    %523 = vector.load %arg10[%c0_106, %c0_107] : memref<1x32xf32, #tpu.memory_space<vmem>>, vector<1x32xf32>
    %524 = vector.broadcast %523 : vector<1x32xf32> to vector<8x32xf32>
    %525 = arith.addf %522, %524 : vector<8x32xf32>
    %c0_108 = arith.constant 0 : index
    %c0_109 = arith.constant 0 : index
    %526 = vector.load %arg11[%c0_108, %c0_109] : memref<1x32xf32, #tpu.memory_space<vmem>>, vector<1x32xf32>
    %527 = vector.broadcast %526 : vector<1x32xf32> to vector<8x32xf32>
    %528 = arith.mulf %525, %527 : vector<8x32xf32>
    %cst_110 = arith.constant dense<0.000000e+00> : vector<8xf32>
    %529 = vector.multi_reduction <add>, %528, %cst_110 [1] : vector<8x32xf32> to vector<8xf32>
    %530 = vector.shape_cast %529 : vector<8xf32> to vector<8x1xf32>
    %c0_111 = arith.constant 0 : index
    %c0_112 = arith.constant 0 : index
    %531 = vector.load %arg12[%c0_111, %c0_112] : memref<1x1xf32, #tpu.memory_space<vmem>>, vector<1x1xf32>
    %532 = vector.broadcast %531 : vector<1x1xf32> to vector<8x1xf32>
    %533 = arith.addf %530, %532 : vector<8x1xf32>
    %c0_113 = arith.constant 0 : index
    %c0_114 = arith.constant 0 : index
    %534 = vector.load %arg13[%c0_113, %c0_114] : memref<8x1xf32, #tpu.memory_space<vmem>>, vector<8x1xf32>
    tpu.vector_store %arg13[%c0_113, %c0_114], %533 {strides = array<i32>} : memref<8x1xf32, #tpu.memory_space<vmem>>, vector<8x1xf32>,
    return
  }
  func.func @transform_0(%arg0: i32) -> (i32, i32, i32) {
    %c0_i32 = arith.constant 0 : i32
    %c0_i32_0 = arith.constant 0 : i32
    %c0_i32_1 = arith.constant 0 : i32
    return %c0_i32, %arg0, %c0_i32_0 : i32, i32, i32
  }
  func.func @transform_1(%arg0: i32) -> (i32, i32, i32) {
    %c0_i32 = arith.constant 0 : i32
    %c0_i32_0 = arith.constant 0 : i32
    %c0_i32_1 = arith.constant 0 : i32
    %c0_i32_2 = arith.constant 0 : i32
    return %c0_i32, %c0_i32_0, %c0_i32_1 : i32, i32, i32
  }
  func.func @transform_2(%arg0: i32) -> (i32, i32) {
    %c0_i32 = arith.constant 0 : i32
    %c0_i32_0 = arith.constant 0 : i32
    %c0_i32_1 = arith.constant 0 : i32
    return %c0_i32, %c0_i32_0 : i32, i32
  }
  func.func @transform_3(%arg0: i32) -> (i32, i32, i32) {
    %c0_i32 = arith.constant 0 : i32
    %c0_i32_0 = arith.constant 0 : i32
    %c0_i32_1 = arith.constant 0 : i32
    %c0_i32_2 = arith.constant 0 : i32
    return %c0_i32, %c0_i32_0, %c0_i32_1 : i32, i32, i32
  }
  func.func @transform_4(%arg0: i32) -> (i32, i32) {
    %c0_i32 = arith.constant 0 : i32
    %c0_i32_0 = arith.constant 0 : i32
    %c0_i32_1 = arith.constant 0 : i32
    return %c0_i32, %c0_i32_0 : i32, i32
  }
  func.func @transform_5(%arg0: i32) -> (i32, i32) {
    %c0_i32 = arith.constant 0 : i32
    %c0_i32_0 = arith.constant 0 : i32
    %c0_i32_1 = arith.constant 0 : i32
    return %c0_i32, %c0_i32_0 : i32, i32
  }
  func.func @transform_6(%arg0: i32) -> (i32, i32) {
    %c0_i32 = arith.constant 0 : i32
    %c0_i32_0 = arith.constant 0 : i32
    %c0_i32_1 = arith.constant 0 : i32
    return %c0_i32, %c0_i32_0 : i32, i32
  }
  func.func @transform_7(%arg0: i32) -> (i32, i32) {
    %c0_i32 = arith.constant 0 : i32
    %c0_i32_0 = arith.constant 0 : i32
    %c0_i32_1 = arith.constant 0 : i32
    return %c0_i32, %c0_i32_0 : i32, i32
  }
  func.func @transform_8(%arg0: i32) -> (i32, i32) {
    %c0_i32 = arith.constant 0 : i32
    %c0_i32_0 = arith.constant 0 : i32
    %c0_i32_1 = arith.constant 0 : i32
    return %c0_i32, %c0_i32_0 : i32, i32
  }
  func.func @transform_9(%arg0: i32) -> (i32, i32) {
    %c0_i32 = arith.constant 0 : i32
    %c0_i32_0 = arith.constant 0 : i32
    %c0_i32_1 = arith.constant 0 : i32
    return %c0_i32, %c0_i32_0 : i32, i32
  }
  func.func @transform_10(%arg0: i32) -> (i32, i32) {
    %c0_i32 = arith.constant 0 : i32
    %c0_i32_0 = arith.constant 0 : i32
    %c0_i32_1 = arith.constant 0 : i32
    return %c0_i32, %c0_i32_0 : i32, i32
  }
  func.func @transform_11(%arg0: i32) -> (i32, i32) {
    %c0_i32 = arith.constant 0 : i32
    %c0_i32_0 = arith.constant 0 : i32
    %c0_i32_1 = arith.constant 0 : i32
    return %c0_i32, %c0_i32_0 : i32, i32
  }
  func.func @transform_12(%arg0: i32) -> (i32, i32) {
    %c0_i32 = arith.constant 0 : i32
    %c0_i32_0 = arith.constant 0 : i32
    return %arg0, %c0_i32 : i32, i32
  }
}

</mosaic_0001>

<bundles_post_ra>
// kernel: tpu_custom_call.1
= control target key start
LH: loop header
LB: loop body
LE: loop exit
PB: predicated region body
PF: predicated region fallthrough
CT: control target
= control target key end

     0   :  { %s7815_s0 = inlined_call_operand.vmem [shape: f32[18,8,4], index: 0, kind: input, shape index: {}]   ;;  %s7816_s1 = inlined_call_operand.vmem [shape: f32[3,4,16], index: 1, kind: input, shape index: {}]   ;;  %s7817_s2 = inlined_call_operand.vmem [shape: f32[1,16], index: 2, kind: input, shape index: {}]   ;;  %s7818_s3 = inlined_call_operand.vmem [shape: f32[3,16,32], index: 3, kind: input, shape index: {}]   ;;  %s7819_s4 = inlined_call_operand.vmem [shape: f32[1,32], index: 4, kind: input, shape index: {}]   ;;  %s7820_s5 = inlined_call_operand.vmem [shape: f32[32,512], index: 5, kind: input, shape index: {}]   ;;  %s7821_s6 = inlined_call_operand.hbm [shape: f32[128,512], index: 6, kind: input, shape index: {}]   ;;  %s7822_s7 = inlined_call_operand.vmem [shape: f32[1,512], index: 7, kind: input, shape index: {}]   ;;  %s7823_s8 = inlined_call_operand.vmem [shape: f32[128,32], index: 8, kind: input, shape index: {}]   ;;  %s7824_s9 = inlined_call_operand.vmem [shape: f32[1,32], index: 9, kind: input, shape index: {}]   ;;  %s7825_s10 = inlined_call_operand.vmem [shape: f32[1,32], index: 10, kind: input, shape index: {}]   ;;  %s7826_s11 = inlined_call_operand.<no memory space> [shape: f32[1,1], index: 11, kind: input, shape index: {}]   ;;  %s7827_s12 = inlined_call_operand.vmem [shape: f32[8,1], index: 12, kind: output, shape index: {}]  }
   0x1   :  { %v17_v0 = vstv %s7826_s11 }
   0x2   :  { %18 = vst [vmem:[#allocation2] sm:$0x1] %v17_v0 }
   0x3   :  { %19 = vsyncpa [#allocation4], 0  ;;  %s6528_s23 = smov [#allocation3]   ;;  %s6504_s27 = scalar_lea.hbm %s7821_s6, 8192 }
   0x4   :  { %s37_s24 = sshll.u32 %s6528_s23, 4  ;;  %p6505_p0 = scmp.ne.s32.totalorder %s7821_s6, %s6504_s27  ;;  %s38_s24 = int_to_ptr.vmem [resolvable:$true] %s37_s24 }
   0x5   :  { %p6508_p1 = scmp.lt.u32.totalorder %s6504_s27, %s7821_s6 }
   0x7   :  { %p6510_p2 = pnand %p6508_p1, %p6505_p0 }
   0x9   :  { %6513 = shalt.err (!%p6510_p2)
}
   0xa   :  { %s6514_s11 = scalar_lea.vmem %s38_s24, 8192  ;;  %p6519_p4 = scmp.lt.s32.totalorder %s38_s24, %s38_s24 }
   0xb   :  { %p6515_p3 = scmp.ne.s32.totalorder %s38_s24, %s6514_s11  ;;  %p6520_p5 = scmp.lt.s32.totalorder %s6514_s11, %s6514_s11 }
   0xd   :  { %p6521_p6 = por %p6520_p5, %p6519_p4 }
   0xf   :  { %p6522_p7 = pnand %p6521_p6, %p6515_p3 }
  0x11   :  { %6525 = shalt.err (!%p6522_p7)
}
  0x12   :  { %s6529_s14 = smov 512   ;;  %s6530_s15 = smov 32  }
  0x13   :  { %43 = dma.hbm_to_vmem [thread:$0]  %s7821_s6, 8192, %s38_s24, [#allocation4], %s6529_s14, %s6529_s14, %s6530_s15  }
  0x14   :  { %6526 = dma.done.wait [#allocation4], 8192  }
  0x15   :  { %6527 = vsyncadd [#allocation4], 4294959104  ;;  %vm127_vm0 = vcmask 1043456   ;;  %vm78_vm1 = vcmask 31744   ;;  %v4465_v1 = vld [vmem:[%s7816_s1 + $0x4] sm:$0xf] }
  0x16   :  { %v58_v2 = vld [vmem:[%s7815_s0 + $0x8] sm:$0xff]  ;;  %v6623_v3 = vld [vmem:[%s7815_s0 + $0x10] sm:$0xff]  ;;  %4775 = vmatprep.subr.msk.mxu0 %vm127_vm0, %v4465_v1  ;;  %v75_v4 = vld [vmem:[%s7816_s1] sm:$0xf]  ;;  %6048 = vmatprep.subr.msk.mxu1 %vm127_vm0, %v4465_v1  ;;  %v6531_v28 = vmov 0.0   ;;  %vm624_vm2 = vcmask 130048  }
  0x17   :  { %4777 = vmatprep.mubr.msk.f32.mxu0 %vm78_vm1, %v58_v2  ;;  %v60_v5 = vld [vmem:[%s7815_s0 + $0x18] sm:$0xff]  ;;  %4776 = vmatpush3.msk.msra.mxu0 %vm127_vm0, %v4465_v1  ;;  %v4500_v6 = vld [vmem:[%s7816_s1 + $0x8] sm:$0xf]  ;;  %v61_v7 = vld [vmem:[%s7815_s0 + $0x20] sm:$0xff]  ;;  %vm1191_vm3 = vcmask 261120   ;;  %vm6533_vm4 = vmmov 0  }
  0x18   :  { %4778 = vmatmul.mubr.msk.f32.vlgmr.msra.gmra.mrb[0].mxu0 %vm78_vm1, %v6623_v3  ;;  %4801 = vmatprep.subr.msk.mxu0 %vm127_vm0, %v75_v4  ;;  %v62_v8 = vld [vmem:[%s7815_s0 + $0x28] sm:$0xff]  ;;  %v67_v10 = vld [vmem:[%s7815_s0 + $0x50] sm:$0xff]  ;;  %v68_v11 = vld [vmem:[%s7815_s0 + $0x58] sm:$0xff]  ;;  %vm4458_vm5 = vcmask 7168  }
  0x19   :  { %4802 = vmatpush3.msk.msra.mxu0 %vm127_vm0, %v75_v4  ;;  %4780 = vmatprep.mubr.msk.f32.mxu0 %vm78_vm1, %v60_v5  ;;  %v66_v9 = vld [vmem:[%s7815_s0 + $0x48] sm:$0xff]  ;;  %v4519_v12 = vld [vmem:[%s7818_s3 + $0x10] sm:$0xff]  ;;  %v4520_v13 = vld [vmem:[%s7818_s3 + $0x18] sm:$0xff] }
  0x1a   :  { %4827 = vmatprep.subr.msk.mxu0 %vm127_vm0, %v4500_v6  ;;  %6049 = vmatpush3.msk.msra.mxu1 %vm127_vm0, %v4465_v1  ;;  %v63_v14 = vld [vmem:[%s7815_s0 + $0x30] sm:$0xff]  ;;  %v4972_v15 = vpack.c.bf16 %v4520_v13, %v4519_v12  ;;  %v64_v16 = vld [vmem:[%s7815_s0 + $0x38] sm:$0xff]  ;;  %v69_v17 = vld [vmem:[%s7815_s0 + $0x60] sm:$0xff] }
  0x1b   :  { %4789 = vmatprep.mubr.msk.f32.mxu1 %vm78_vm1, %v66_v9  ;;  %v70_v18 = vld [vmem:[%s7815_s0 + $0x68] sm:$0xff]  ;;  %v65_v19 = vld [vmem:[%s7815_s0 + $0x40] sm:$0xff]  ;;  %v71_v21 = vld [vmem:[%s7815_s0 + $0x70] sm:$0xff] }
  0x1c   :  { %4781 = vmatmul.mubr.msk.f32.gmra.mrb[2].mxu0 %vm78_vm1, %v61_v7  ;;  %4790 = vmatmul.mubr.msk.f32.vlgmr.msra.gmra.mrb[0].mxu1 %vm78_vm1, %v67_v10  ;;  %v57_v20 = vld [vmem:[%s7815_s0] sm:$0xff]  ;;  %v72_v22 = vld [vmem:[%s7815_s0 + $0x78] sm:$0xff]  ;;  %v74_v24 = vld [vmem:[%s7815_s0 + $0x88] sm:$0xff] }
  0x1d   :  { %4783 = vmatprep.mubr.msk.f32.mxu0 %vm78_vm1, %v62_v8  ;;  %4792 = vmatprep.mubr.msk.f32.mxu1 %vm78_vm1, %v68_v11  ;;  %v73_v23 = vld [vmem:[%s7815_s0 + $0x80] sm:$0xff]  ;;  %v620_v26 = vld [vmem:[%s7818_s3 + $0x8] sm:$0xff] }
  0x1e   :  { %4973 = vmatprep.subr.bf16.mxu1 %v4972_v15  ;;  %v619_v25 = vld [vmem:[%s7818_s3] sm:$0xff]  ;;  %v1154_v37 = vld [vmem:[%s7820_s5 + $0x8] sm:$0xff] }
  0x1f   :  { %4975 = vmatpush3.bf16.msra.mxu1 %v4972_v15  ;;  %v4976_v27 = vpack.c.bf16 %v620_v26, %v619_v25  ;;  %v1158_v38 = vld [vmem:[%s7820_s5 + $0x28] sm:$0xff]  ;;  %v1153_v39 = vld [vmem:[%s7820_s5] sm:$0xff] }
  0x20   :  { %4784 = vmatmul.mubr.msk.f32.gmra.mrb[4].mxu0 %vm78_vm1, %v63_v14  ;;  %4793 = vmatmul.mubr.msk.f32.gmra.mrb[2].mxu1 %vm78_vm1, %v69_v17  ;;  %v4984_v40 = vpack.c.bf16 %v1158_v38, %v1154_v37  ;;  %v1157_v41 = vld [vmem:[%s7820_s5 + $0x20] sm:$0xff]  ;;  %v1162_v43 = vld [vmem:[%s7820_s5 + $0x48] sm:$0xff]  ;;  %v1168_v37 = vld [vmem:[%s7820_s5 + $0x78] sm:$0xff] }
  0x21   :  { %4786 = vmatprep.mubr.msk.f32.mxu0 %vm78_vm1, %v64_v16  ;;  %4795 = vmatprep.mubr.msk.f32.mxu1 %vm78_vm1, %v70_v18  ;;  %v4986_v42 = vpack.c.bf16 %v1157_v41, %v1153_v39  ;;  %v1166_v44 = vld [vmem:[%s7820_s5 + $0x68] sm:$0xff]  ;;  %v1161_v46 = vld [vmem:[%s7820_s5 + $0x40] sm:$0xff]  ;;  %v1163_v39 = vld [vmem:[%s7820_s5 + $0x50] sm:$0xff] }
  0x22   :  { %4977 = vmatprep.subr.bf16.mxu1 %v4976_v27  ;;  %v4988_v45 = vpack.c.bf16 %v1166_v44, %v1162_v43  ;;  %v1165_v47 = vld [vmem:[%s7820_s5 + $0x60] sm:$0xff]  ;;  %v4553_v52 = vld [vmem:[%s7818_s3 + $0x28] sm:$0xff] }
  0x23   :  { %v4990_v48 = vpack.c.bf16 %v1165_v47, %v1161_v46  ;;  %v4518_v49 = vld [vmem:[%s7817_s2] ss:$0 sm:$0xff]  ;;  %v1567_v43 = vld [vmem:[#allocation3 + $0x28] sm:$0xff] }
  0x24   :  { %4787 = vmatmul.mubr.msk.f32.gmra.mrb[6].mxu0 %vm78_vm1, %v65_v19  ;;  %4796 = vmatmul.mubr.msk.f32.gmra.mrb[4].mxu1 %vm78_vm1, %v71_v21  ;;  %v4552_v51 = vld [vmem:[%s7818_s3 + $0x20] sm:$0xff] }
  0x25   :  { %4803 = vmatprep.mubr.msk.f32.mxu0 %vm78_vm1, %v57_v20  ;;  %4798 = vmatprep.mubr.msk.f32.mxu1 %vm78_vm1, %v72_v22  ;;  %v4980_v56 = vpack.c.bf16 %v4553_v52, %v4552_v51  ;;  %v1569_v46 = vld [vmem:[#allocation3 + $0x38] sm:$0xff]  ;;  %v1571_v51 = vld [vmem:[#allocation3 + $0x48] sm:$0xff] }
  0x26   :  { %v1575_v52 = vld [vmem:[#allocation3 + $0x68] sm:$0xff] }
  0x28   :  { %4804 = vmatmul.mubr.msk.f32.vlgmr.msra.gmra.mrb[0].mxu0 %vm78_vm1, %v58_v2  ;;  %4799 = vmatmul.mubr.msk.f32.gmra.mrb[6].mxu1 %vm78_vm1, %v73_v23 }
  0x29   :  { %4828 = vmatpush3.msk.msra.mxu0 %vm127_vm0, %v4500_v6  ;;  %4806 = vmatprep.mubr.msk.f32.mxu0 %vm78_vm1, %v6623_v3 }
  0x2a   :  { %4985 = vmatprep.subr.bf16.mxu0 %v4984_v40  ;;  %v1167_v40 = vld [vmem:[%s7820_s5 + $0x70] sm:$0xff] }
  0x2b   :  { %v4998_v41 = vpack.c.bf16 %v1167_v40, %v1163_v39  ;;  %v1594_v40 = vld [vmem:[#allocation3 + $0x100] sm:$0xff] }
  0x2c   :  { %4807 = vmatmul.mubr.msk.f32.gmra.mrb[2].mxu0 %vm78_vm1, %v60_v5 }
  0x2d   :  { %4809 = vmatprep.mubr.msk.f32.mxu0 %vm78_vm1, %v61_v7 }
  0x30   :  { %4810 = vmatmul.mubr.msk.f32.gmra.mrb[4].mxu0 %vm78_vm1, %v62_v8 }
  0x31   :  { %4812 = vmatprep.mubr.msk.f32.mxu0 %vm78_vm1, %v63_v14 }
  0x34   :  { %4813 = vmatmul.mubr.msk.f32.gmra.mrb[6].mxu0 %vm78_vm1, %v64_v16 }
  0x35   :  { %4815 = vmatprep.mubr.msk.f32.mxu0 %vm78_vm1, %v65_v19 }
  0x38   :  { %4816 = vmatmul.mubr.msk.f32.gmra.mrb[8].mxu0 %vm78_vm1, %v66_v9 }
  0x39   :  { %4818 = vmatprep.mubr.msk.f32.mxu0 %vm78_vm1, %v67_v10 }
  0x3c   :  { %4819 = vmatmul.mubr.msk.f32.gmra.mrb[10].mxu0 %vm78_vm1, %v68_v11 }
  0x3d   :  { %4821 = vmatprep.mubr.msk.f32.mxu0 %vm78_vm1, %v69_v17 }
  0x40   :  { %4822 = vmatmul.mubr.msk.f32.gmra.mrb[12].mxu0 %vm78_vm1, %v70_v18 }
  0x41   :  { %4824 = vmatprep.mubr.msk.f32.mxu0 %vm78_vm1, %v71_v21 }
  0x44   :  { %4825 = vmatmul.mubr.msk.f32.gmra.mrb[14].mxu0 %vm78_vm1, %v72_v22 }
  0x45   :  { %4829 = vmatprep.mubr.msk.f32.mxu0 %vm78_vm1, %v6623_v3 }
  0x48   :  { %4830 = vmatmul.mubr.msk.f32.vlgmr.msra.gmra.mrb[0].mxu0 %vm78_vm1, %v60_v5 }
  0x49   :  { %4832 = vmatprep.mubr.msk.f32.mxu0 %vm78_vm1, %v61_v7  ;;  %4987 = vmatpush1.bf16.msra.mxu0 %v4986_v42  ;;  %v1563_v42 = vld [vmem:[#allocation3 + $0x8] sm:$0xff] }
  0x4a   :  { %4989 = vmatprep.subr.bf16.mxu0 %v4988_v45  ;;  %v6904_v44 = vpack.c.bf16 %v1567_v43, %v1563_v42  ;;  %v1565_v45 = vld [vmem:[#allocation3 + $0x18] sm:$0xff] }
  0x4b   :  { %v6907_v47 = vpack.c.bf16 %v1569_v46, %v1565_v45  ;;  %v1603_v45 = vld [vmem:[#allocation3 + $0x148] sm:$0xff] }
  0x4c   :  { %4833 = vmatmul.mubr.msk.f32.gmra.mrb[2].mxu0 %vm78_vm1, %v62_v8 }
  0x4d   :  { %4835 = vmatprep.mubr.msk.f32.mxu0 %vm78_vm1, %v63_v14  ;;  %4991 = vmatpush1.bf16.msra.mxu0 %v4990_v48  ;;  %v1562_v48 = vld [vmem:[#allocation3] sm:$0xff] }
  0x4e   :  { %5001 = vmatprep.subr.bf16.mxu0 %v6904_v44 }
  0x50   :  { %4836 = vmatmul.mubr.msk.f32.gmra.mrb[4].mxu0 %vm78_vm1, %v64_v16 }
  0x51   :  { %4838 = vmatprep.mubr.msk.f32.mxu0 %vm78_vm1, %v65_v19 }
  0x54   :  { %4839 = vmatmul.mubr.msk.f32.gmra.mrb[6].mxu0 %vm78_vm1, %v66_v9 }
  0x55   :  { %4841 = vmatprep.mubr.msk.f32.mxu0 %vm78_vm1, %v67_v10 }
  0x58   :  { %4842 = vmatmul.mubr.msk.f32.gmra.mrb[8].mxu0 %vm78_vm1, %v68_v11 }
  0x59   :  { %4844 = vmatprep.mubr.msk.f32.mxu0 %vm78_vm1, %v69_v17 }
  0x5c   :  { %4845 = vmatmul.mubr.msk.f32.gmra.mrb[10].mxu0 %vm78_vm1, %v70_v18 }
  0x5d   :  { %4847 = vmatprep.mubr.msk.f32.mxu0 %vm78_vm1, %v71_v21 }
  0x60   :  { %4848 = vmatmul.mubr.msk.f32.gmra.mrb[12].mxu0 %vm78_vm1, %v72_v22 }
  0x61   :  { %4850 = vmatprep.mubr.msk.f32.mxu0 %vm78_vm1, %v73_v23 }
  0x64   :  { %4851 = vmatmul.mubr.msk.f32.gmra.mrb[14].mxu0 %vm78_vm1, %v74_v24 }
  0x65   :  { %1304 = vmatprep.mubr.f32.mxu0 %v6531_v28 }
  0xef   :  { %v4791_v29 = vpop.f32.mrb[0].mxu1 }
  0xf0   :  { %v237_v30 = vpop.f32.mrb[1].mxu1 }
  0xf3   :  { %v4794_v31 = vpop.f32.mrb[2].mxu1 }
  0xf4   :  { %v247_v32 = vpop.f32.mrb[3].mxu1 }
  0xf7   :  { %v6751_v33 = vpop.f32.mrb[4].mxu1 }
  0xf8   :  { %v6753_v34 = vpop.f32.mrb[5].mxu1 }
  0xfb   :  { %v6755_v35 = vpop.f32.mrb[6].mxu1 }
  0xfc   :  { %v6757_v36 = vpop.f32.mrb[7].mxu1 }
 0x11b   :  { %v4831_v50 = vpop.f32.mrb[0].mxu0 }
 0x11c   :  { %v501_v53 = vpop.f32.mrb[1].mxu0  ;;  %v6792_v55 = vadd.f32 %v4831_v50, %v4518_v49  ;;  %v6913_v50 = vld [vmem:[%s7819_s4] ss:$0 sm:$0xff] }
 0x11d   :  { %v603_v54 = vadd.f32 %v4518_v49, %v501_v53 }
 0x11f   :  { %v4834_v57 = vpop.f32.mrb[2].mxu0  ;;  %4857 = vmatprep.mubr.msk.f32.mxu1 %vm624_vm2, %v603_v54 }
 0x120   :  { %v511_v58 = vpop.f32.mrb[3].mxu0  ;;  %4858 = vmatmul.mubr.msk.f32.vlgmr.msra.gmra.mrb[8].mxu1 %vm624_vm2, %v6792_v55  ;;  %v6799_v60 = vadd.f32 %v4834_v57, %v4518_v49 }
 0x121   :  { %v6797_v59 = vadd.f32 %v4518_v49, %v511_v58  ;;  %4979 = vmatpush3.bf16.msra.mxu1 %v4976_v27 }
 0x122   :  { %4981 = vmatprep.subr.bf16.mxu1 %v4980_v56 }
 0x123   :  { %v4837_v61 = vpop.f32.mrb[4].mxu0  ;;  %4860 = vmatprep.mubr.msk.f32.mxu1 %vm624_vm2, %v6797_v59 }
 0x124   :  { %v521_v62 = vpop.f32.mrb[5].mxu0  ;;  %4861 = vmatmul.mubr.msk.f32.gmra.mrb[10].mxu1 %vm624_vm2, %v6799_v60  ;;  %v6807_v0 = vadd.f32 %v4837_v61, %v4518_v49  ;;  %v1574_v61 = vld [vmem:[#allocation3 + $0x60] sm:$0xff] }
 0x125   :  { %v6805_v63 = vadd.f32 %v4518_v49, %v521_v62  ;;  %v1579_v62 = vld [vmem:[#allocation3 + $0x88] sm:$0xff] }
 0x127   :  { %v4840_v1 = vpop.f32.mrb[6].mxu0  ;;  %4863 = vmatprep.mubr.msk.f32.mxu1 %vm624_vm2, %v6805_v63 }
 0x128   :  { %v531_v2 = vpop.f32.mrb[7].mxu0  ;;  %4864 = vmatmul.mubr.msk.f32.gmra.mrb[12].mxu1 %vm624_vm2, %v6807_v0  ;;  %v6815_v4 = vadd.f32 %v4840_v1, %v4518_v49  ;;  %v1577_v1 = vld [vmem:[#allocation3 + $0x78] sm:$0xff] }
 0x129   :  { %v6813_v3 = vadd.f32 %v4518_v49, %v531_v2 }
 0x12b   :  { %v4843_v5 = vpop.f32.mrb[8].mxu0  ;;  %4866 = vmatprep.mubr.msk.f32.mxu1 %vm624_vm2, %v6813_v3 }
 0x12c   :  { %v6050_v6 = vadd.f32 %v4843_v5, %v4791_v29  ;;  %v541_v7 = vpop.f32.mrb[9].mxu0  ;;  %4867 = vmatmul.mubr.msk.f32.gmra.mrb[14].mxu1 %vm624_vm2, %v6815_v4  ;;  %v1576_v5 = vld [vmem:[#allocation3 + $0x70] sm:$0xff] }
 0x12d   :  { %v6051_v8 = vadd.f32 %v541_v7, %v237_v30  ;;  %v1156_v30 = vld [vmem:[%s7820_s5 + $0x18] sm:$0xff] }
 0x12e   :  { %v612_v11 = vadd.f32 %v6050_v6, %v4518_v49 }
 0x12f   :  { %v611_v9 = vadd.f32 %v6051_v8, %v4518_v49  ;;  %v4846_v10 = vpop.f32.mrb[10].mxu0 }
 0x130   :  { %v6052_v12 = vadd.f32 %v4846_v10, %v4794_v31  ;;  %v551_v13 = vpop.f32.mrb[11].mxu0  ;;  %v1160_v31 = vld [vmem:[%s7820_s5 + $0x38] sm:$0xff]  ;;  %v1582_v10 = vld [vmem:[#allocation3 + $0xa0] sm:$0xff] }
 0x131   :  { %v6053_v14 = vadd.f32 %v551_v13, %v247_v32  ;;  %4869 = vmatprep.mubr.msk.f32.mxu1 %vm624_vm2, %v611_v9  ;;  %v4992_v32 = vpack.c.bf16 %v1160_v31, %v1156_v30  ;;  %v1587_v13 = vld [vmem:[#allocation3 + $0xc8] sm:$0xff]  ;;  %v1589_v31 = vld [vmem:[#allocation3 + $0xd8] sm:$0xff] }
 0x132   :  { %4870 = vmatmul.mubr.msk.f32.gmra.mrb[16].mxu1 %vm624_vm2, %v612_v11  ;;  %v614_v17 = vadd.f32 %v6052_v12, %v4518_v49 }
 0x133   :  { %v613_v15 = vadd.f32 %v6053_v14, %v4518_v49  ;;  %v4849_v16 = vpop.f32.mrb[12].mxu0 }
 0x134   :  { %v6054_v18 = vadd.f32 %v4849_v16, %v6751_v33  ;;  %v561_v19 = vpop.f32.mrb[13].mxu0  ;;  %v1155_v33 = vld [vmem:[%s7820_s5 + $0x10] sm:$0xff]  ;;  %v1585_v16 = vld [vmem:[#allocation3 + $0xb8] sm:$0xff] }
 0x135   :  { %v6055_v20 = vadd.f32 %v561_v19, %v6753_v34  ;;  %4872 = vmatprep.mubr.msk.f32.mxu1 %vm624_vm2, %v613_v15  ;;  %v1159_v34 = vld [vmem:[%s7820_s5 + $0x30] sm:$0xff] }
 0x136   :  { %4873 = vmatmul.mubr.msk.f32.gmra.mrb[18].mxu1 %vm624_vm2, %v614_v17  ;;  %v616_v23 = vadd.f32 %v6054_v18, %v4518_v49  ;;  %v1591_v18 = vld [vmem:[#allocation3 + $0xe8] sm:$0xff]  ;;  %v1580_v19 = vld [vmem:[#allocation3 + $0x90] sm:$0xff] }
 0x137   :  { %v615_v21 = vadd.f32 %v6055_v20, %v4518_v49  ;;  %v4852_v22 = vpop.f32.mrb[14].mxu0  ;;  %v1584_v20 = vld [vmem:[#allocation3 + $0xb0] sm:$0xff] }
 0x138   :  { %v6056_v24 = vadd.f32 %v4852_v22, %v6755_v35  ;;  %v571_v25 = vpop.f32.mrb[15].mxu0  ;;  %v4994_v35 = vpack.c.bf16 %v1159_v34, %v1155_v33  ;;  %v6955_v30 = vpack.c.bf16 %v1584_v20, %v1580_v19  ;;  %v1599_v34 = vld [vmem:[#allocation3 + $0x128] sm:$0xff] }
 0x139   :  { %v6057_v26 = vadd.f32 %v571_v25, %v6757_v36  ;;  %4875 = vmatprep.mubr.msk.f32.mxu1 %vm624_vm2, %v615_v21  ;;  %v1164_v36 = vld [vmem:[%s7820_s5 + $0x58] sm:$0xff]  ;;  %v1590_v25 = vld [vmem:[#allocation3 + $0xe0] sm:$0xff] }
 0x13a   :  { %4876 = vmatmul.mubr.msk.f32.gmra.mrb[20].mxu1 %vm624_vm2, %v616_v23  ;;  %v618_v29 = vadd.f32 %v6056_v24, %v4518_v49  ;;  %v4996_v38 = vpack.c.bf16 %v1168_v37, %v1164_v36  ;;  %v1586_v24 = vld [vmem:[#allocation3 + $0xc0] sm:$0xff]  ;;  %v1592_v36 = vld [vmem:[#allocation3 + $0xf0] sm:$0xff] }
 0x13b   :  { %v617_v27 = vadd.f32 %v6057_v26, %v4518_v49  ;;  %v1566_v49 = vld [vmem:[#allocation3 + $0x20] sm:$0xff]  ;;  %v6967_v39 = vpack.c.bf16 %v1590_v25, %v1586_v24  ;;  %v1612_v24 = vld [vmem:[#allocation3 + $0x190] sm:$0xff] }
 0x13c   :  { %v6915_v57 = vpack.c.bf16 %v1566_v49, %v1562_v48  ;;  %v1597_v48 = vld [vmem:[#allocation3 + $0x118] sm:$0xff] }
 0x13d   :  { %4878 = vmatprep.mubr.msk.f32.mxu1 %vm624_vm2, %v617_v27  ;;  %v1601_v49 = vld [vmem:[#allocation3 + $0x138] sm:$0xff] }
 0x13e   :  { %4879 = vmatmul.mubr.msk.f32.gmra.mrb[22].mxu1 %vm624_vm2, %v618_v29 }
 0x13f   :  { %4885 = vmatprep.mubr.f32.mxu1 %v6531_v28 }
 0x142   :  { %4886 = vmatmul.mubr.msk.f32.vlgmr.msra.gmra.mrb[8].mxu1 %vm624_vm2, %v603_v54  ;;  %v1564_v54 = vld [vmem:[#allocation3 + $0x10] sm:$0xff] }
 0x143   :  { %4888 = vmatprep.mubr.msk.f32.mxu1 %vm624_vm2, %v6792_v55  ;;  %4983 = vmatpush3.bf16.msra.mxu1 %v4980_v56 }
 0x144   :  { %4993 = vmatprep.subr.bf16.mxu1 %v4992_v32  ;;  %v1593_v32 = vld [vmem:[#allocation3 + $0xf8] sm:$0xff] }
 0x145   :  { %v6970_v42 = vpack.c.bf16 %v1593_v32, %v1589_v31  ;;  %v1623_v31 = vld [vmem:[#allocation3 + $0x1e8] sm:$0xff]  ;;  %v1616_v32 = vld [vmem:[#allocation3 + $0x1b0] sm:$0xff] }
 0x146   :  { %4889 = vmatmul.mubr.msk.f32.gmra.mrb[10].mxu1 %vm624_vm2, %v6797_v59 }
 0x147   :  { %4891 = vmatprep.mubr.msk.f32.mxu1 %vm624_vm2, %v6799_v60 }
 0x14a   :  { %4892 = vmatmul.mubr.msk.f32.gmra.mrb[12].mxu1 %vm624_vm2, %v6805_v63 }
 0x14b   :  { %4894 = vmatprep.mubr.msk.f32.mxu1 %vm624_vm2, %v6807_v0 }
 0x14e   :  { %4895 = vmatmul.mubr.msk.f32.gmra.mrb[14].mxu1 %vm624_vm2, %v6813_v3 }
 0x14f   :  { %4897 = vmatprep.mubr.msk.f32.mxu1 %vm624_vm2, %v6815_v4 }
 0x152   :  { %4898 = vmatmul.mubr.msk.f32.gmra.mrb[16].mxu1 %vm624_vm2, %v611_v9 }
 0x153   :  { %4900 = vmatprep.mubr.msk.f32.mxu1 %vm624_vm2, %v612_v11 }
 0x156   :  { %4901 = vmatmul.mubr.msk.f32.gmra.mrb[18].mxu1 %vm624_vm2, %v613_v15 }
 0x157   :  { %4903 = vmatprep.mubr.msk.f32.mxu1 %vm624_vm2, %v614_v17 }
 0x15a   :  { %4904 = vmatmul.mubr.msk.f32.gmra.mrb[20].mxu1 %vm624_vm2, %v615_v21 }
 0x15b   :  { %4906 = vmatprep.mubr.msk.f32.mxu1 %vm624_vm2, %v616_v23 }
 0x15e   :  { %4907 = vmatmul.mubr.msk.f32.gmra.mrb[22].mxu1 %vm624_vm2, %v617_v27 }
 0x15f   :  { %4913 = vmatprep.mubr.msk.f32.mxu1 %vm624_vm2, %v6792_v55  ;;  %v1568_v55 = vld [vmem:[#allocation3 + $0x30] sm:$0xff] }
 0x162   :  { %4914 = vmatmul.mubr.msk.f32.vlgmr.msra.gmra.mrb[8].mxu1 %vm624_vm2, %v6797_v59  ;;  %v6918_v59 = vpack.c.bf16 %v1575_v52, %v1571_v51  ;;  %v1607_v52 = vld [vmem:[#allocation3 + $0x168] sm:$0xff] }
 0x163   :  { %4916 = vmatprep.mubr.msk.f32.mxu1 %vm624_vm2, %v6799_v60  ;;  %4995 = vmatpush1.bf16.msra.mxu1 %v4994_v35  ;;  %v1570_v60 = vld [vmem:[#allocation3 + $0x40] sm:$0xff]  ;;  %v1588_v35 = vld [vmem:[#allocation3 + $0xd0] sm:$0xff] }
 0x164   :  { %4997 = vmatprep.subr.bf16.mxu1 %v4996_v38  ;;  %v6929_v8 = vpack.c.bf16 %v1574_v61, %v1570_v60  ;;  %v6976_v46 = vpack.c.bf16 %v1592_v36, %v1588_v35  ;;  %v1602_v60 = vld [vmem:[#allocation3 + $0x140] sm:$0xff] }
 0x165   :  { %v1606_v61 = vld [vmem:[#allocation3 + $0x160] sm:$0xff] }
 0x166   :  { %4917 = vmatmul.mubr.msk.f32.gmra.mrb[10].mxu1 %vm624_vm2, %v6805_v63  ;;  %v6920_v63 = vpack.c.bf16 %v1568_v55, %v1564_v54  ;;  %v1600_v54 = vld [vmem:[#allocation3 + $0x130] sm:$0xff] }
 0x167   :  { %4919 = vmatprep.mubr.msk.f32.mxu1 %vm624_vm2, %v6807_v0  ;;  %4999 = vmatpush1.bf16.msra.mxu1 %v4998_v41  ;;  %v1573_v0 = vld [vmem:[#allocation3 + $0x58] sm:$0xff]  ;;  %v1598_v41 = vld [vmem:[#allocation3 + $0x120] sm:$0xff] }
 0x168   :  { %5033 = vmatprep.subr.bf16.mxu1 %v6907_v47 }
 0x16a   :  { %4920 = vmatmul.mubr.msk.f32.gmra.mrb[12].mxu1 %vm624_vm2, %v6813_v3  ;;  %v1583_v3 = vld [vmem:[#allocation3 + $0xa8] sm:$0xff] }
 0x16b   :  { %4922 = vmatprep.mubr.msk.f32.mxu1 %vm624_vm2, %v6815_v4  ;;  %v1572_v4 = vld [vmem:[#allocation3 + $0x50] sm:$0xff]  ;;  %v6933_v12 = vpack.c.bf16 %v1583_v3, %v1579_v62  ;;  %v6991_v62 = vpack.c.bf16 %v1601_v49, %v1597_v48  ;;  %v1605_v3 = vld [vmem:[#allocation3 + $0x158] sm:$0xff]  ;;  %v7039_v48 = vpack.c.bf16 %v1616_v32, %v1612_v24 }
 0x16c   :  { %v6936_v14 = vpack.c.bf16 %v1576_v5, %v1572_v4  ;;  %v1609_v4 = vld [vmem:[#allocation3 + $0x178] sm:$0xff] }
 0x16d   :  { %v7013_v19 = vpack.c.bf16 %v1609_v4, %v1605_v3  ;;  %v1621_v49 = vld [vmem:[#allocation3 + $0x1d8] sm:$0xff] }
 0x16e   :  { %4923 = vmatmul.mubr.msk.f32.gmra.mrb[14].mxu1 %vm624_vm2, %v611_v9  ;;  %v1578_v9 = vld [vmem:[#allocation3 + $0x80] sm:$0xff] }
 0x16f   :  { %4925 = vmatprep.mubr.msk.f32.mxu1 %vm624_vm2, %v612_v11  ;;  %v6931_v11 = vpack.c.bf16 %v1577_v1, %v1573_v0  ;;  %v6994_v0 = vpack.c.bf16 %v1607_v52, %v1603_v45  ;;  %v1611_v1 = vld [vmem:[#allocation3 + $0x188] sm:$0xff]  ;;  %v1622_v45 = vld [vmem:[#allocation3 + $0x1e0] sm:$0xff] }
 0x172   :  { %4926 = vmatmul.mubr.msk.f32.gmra.mrb[16].mxu1 %vm624_vm2, %v613_v15  ;;  %v1581_v15 = vld [vmem:[#allocation3 + $0x98] sm:$0xff] }
 0x173   :  { %4928 = vmatprep.mubr.msk.f32.mxu1 %vm624_vm2, %v614_v17  ;;  %v6949_v26 = vpack.c.bf16 %v1585_v16, %v1581_v15  ;;  %v7010_v15 = vpack.c.bf16 %v1606_v61, %v1602_v60  ;;  %v1610_v16 = vld [vmem:[#allocation3 + $0x180] sm:$0xff] }
 0x176   :  { %4929 = vmatmul.mubr.msk.f32.gmra.mrb[18].mxu1 %vm624_vm2, %v615_v21 }
 0x177   :  { %4931 = vmatprep.mubr.msk.f32.mxu1 %vm624_vm2, %v616_v23  ;;  %v6946_v23 = vpack.c.bf16 %v1582_v10, %v1578_v9  ;;  %v1608_v9 = vld [vmem:[#allocation3 + $0x170] sm:$0xff] }
 0x17a   :  { %4932 = vmatmul.mubr.msk.f32.gmra.mrb[20].mxu1 %vm624_vm2, %v617_v27  ;;  %v6952_v27 = vpack.c.bf16 %v1591_v18, %v1587_v13  ;;  %v1614_v18 = vld [vmem:[#allocation3 + $0x1a0] sm:$0xff] }
 0x17b   :  { %4934 = vmatprep.mubr.msk.f32.mxu1 %vm624_vm2, %v618_v29  ;;  %v1595_v29 = vld [vmem:[#allocation3 + $0x108] sm:$0xff]  ;;  %v7030_v36 = vpack.c.bf16 %v1614_v18, %v1610_v16  ;;  %v1169_v16 = vld [vmem:[%s7822_s7] sm:$0xf] }
 0x17c   :  { %v6973_v43 = vpack.c.bf16 %v1599_v34, %v1595_v29  ;;  %v1619_v29 = vld [vmem:[#allocation3 + $0x1c8] sm:$0xff] }
 0x17e   :  { %4935 = vmatmul.mubr.f32.gmra.mrb[22].mxu1 %v6531_v28 }
 0x17f   :  { %1465 = vmatprep.mubr.f32.mxu1 %v6531_v28 }
 0x235   :  { %v4915_v53 = vpop.f32.mrb[8].mxu1 }
 0x236   :  { %v1035_v56 = vpop.f32.mrb[9].mxu1  ;;  %v1138_v7 = vadd.f32 %v4915_v53, %v6913_v50  ;;  %v1596_v53 = vld [vmem:[#allocation3 + $0x110] sm:$0xff] }
 0x237   :  { %v1137_v58 = vadd.f32 %v6913_v50, %v1035_v56 }
 0x239   :  { %v4918_v2 = vpop.f32.mrb[10].mxu1  ;;  %4570 = vmatmul.mubr.msk.f32.vlgmr.msra.gmra.mrb[16].mxu0 %vm1191_vm3, %v1137_v58  ;;  %4586 = vmatmul.mubr.msk.f32.vlgmr.msra.gmra.mrb[24].mxu1 %vm1191_vm3, %v1137_v58  ;;  %v6988_v58 = vpack.c.bf16 %v1598_v41, %v1594_v40  ;;  %v1618_v40 = vld [vmem:[#allocation3 + $0x1c0] sm:$0xff]  ;;  %v7037_v41 = vpack.c.bf16 %v1623_v31, %v1619_v29 }
 0x23a   :  { %v1045_v6 = vpop.f32.mrb[11].mxu1  ;;  %5003 = vmatpush1.bf16.msra.mxu0 %v6915_v57  ;;  %1310 = vmatprep.mubr.f32.mxu0 %v6531_v28  ;;  %v1140_v38 = vadd.f32 %v4918_v2, %v6913_v50  ;;  %v6997_v2 = vpack.c.bf16 %v1600_v54, %v1596_v53  ;;  %v1620_v53 = vld [vmem:[#allocation3 + $0x1d0] sm:$0xff]  ;;  %v7049_v61 = vpack.c.bf16 %v1622_v45, %v1618_v40 }
 0x23b   :  { %1471 = vmatprep.mubr.f32.mxu1 %v6531_v28  ;;  %5005 = vmatprep.subr.bf16.mxu0 %v6918_v59  ;;  %v1139_v22 = vadd.f32 %v6913_v50, %v1045_v6  ;;  %v1615_v6 = vld [vmem:[#allocation3 + $0x1a8] sm:$0xff]  ;;  %v1624_v54 = vld [vmem:[#allocation3 + $0x1f0] sm:$0xff] }
 0x23c   :  { %5035 = vmatpush1.bf16.msra.mxu1 %v6920_v63  ;;  %v7016_v20 = vpack.c.bf16 %v1615_v6, %v1611_v1  ;;  %v7055_v3 = vpack.c.bf16 %v1624_v54, %v1620_v53 }
 0x23d   :  { %v6938_v17 = vpop.f32.mrb[12].mxu1  ;;  %4571 = vmatmul.mubr.msk.f32.gmra.mrb[18].mxu0 %vm1191_vm3, %v1138_v7  ;;  %4587 = vmatmul.mubr.msk.f32.gmra.mrb[26].mxu1 %vm1191_vm3, %v1138_v7  ;;  %v1604_v7 = vld [vmem:[#allocation3 + $0x150] sm:$0xff] }
 0x23e   :  { %v1055_v21 = vpop.f32.mrb[13].mxu1  ;;  %1316 = vmatprep.mubr.f32.mxu0 %v6531_v28  ;;  %1477 = vmatprep.mubr.f32.mxu1 %v6531_v28  ;;  %v1142_v13 = vadd.f32 %v6938_v17, %v6913_v50  ;;  %v1617_v17 = vld [vmem:[#allocation3 + $0x1b8] sm:$0xff] }
 0x23f   :  { %5007 = vmatpush1.bf16.msra.mxu0 %v6929_v8  ;;  %5037 = vmatprep.subr.bf16.mxu1 %v6931_v11  ;;  %v1141_v56 = vadd.f32 %v6913_v50, %v1055_v21  ;;  %v7019_v21 = vpack.c.bf16 %v1608_v9, %v1604_v7 }
 0x240   :  { %5009 = vmatprep.subr.bf16.mxu0 %v6933_v12  ;;  %5039 = vmatpush1.bf16.msra.mxu1 %v6936_v14 }
 0x241   :  { %v6957_v33 = vpop.f32.mrb[14].mxu1  ;;  %4572 = vmatmul.mubr.msk.f32.gmra.mrb[20].mxu0 %vm1191_vm3, %v1139_v22  ;;  %4588 = vmatmul.mubr.msk.f32.gmra.mrb[28].mxu1 %vm1191_vm3, %v1139_v22  ;;  %v1613_v22 = vld [vmem:[#allocation3 + $0x198] sm:$0xff] }
 0x242   :  { %v6961_v37 = vpop.f32.mrb[15].mxu1  ;;  %1322 = vmatprep.mubr.f32.mxu0 %v6531_v28  ;;  %1483 = vmatprep.mubr.f32.mxu1 %v6531_v28  ;;  %v1144_v60 = vadd.f32 %v6957_v33, %v6913_v50 }
 0x243   :  { %5011 = vmatpush1.bf16.msra.mxu0 %v6946_v23  ;;  %5041 = vmatprep.subr.bf16.mxu1 %v6949_v26  ;;  %v1143_v35 = vadd.f32 %v6913_v50, %v6961_v37  ;;  %v1625_v37 = vld [vmem:[#allocation3 + $0x1f8] sm:$0xff] }
 0x244   :  { %5013 = vmatprep.subr.bf16.mxu0 %v6952_v27  ;;  %5043 = vmatpush1.bf16.msra.mxu1 %v6955_v30  ;;  %v7051_v1 = vpack.c.bf16 %v1625_v37, %v1621_v49 }
 0x245   :  { %v6978_v51 = vpop.f32.mrb[16].mxu1  ;;  %4573 = vmatmul.mubr.msk.f32.gmra.mrb[22].mxu0 %vm1191_vm3, %v1140_v38  ;;  %4589 = vmatmul.mubr.msk.f32.gmra.mrb[30].mxu1 %vm1191_vm3, %v1140_v38  ;;  %v7033_v38 = vpack.c.bf16 %v1617_v17, %v1613_v22 }
 0x246   :  { %v6982_v55 = vpop.f32.mrb[17].mxu1  ;;  %1328 = vmatprep.mubr.f32.mxu0 %v6531_v28  ;;  %1489 = vmatprep.mubr.f32.mxu1 %v6531_v28  ;;  %v1146_v4 = vadd.f32 %v6978_v51, %v6913_v50 }
 0x247   :  { %5015 = vmatpush1.bf16.msra.mxu0 %v6967_v39  ;;  %5045 = vmatprep.subr.bf16.mxu1 %v6970_v42  ;;  %v1145_v33 = vadd.f32 %v6913_v50, %v6982_v55 }
 0x248   :  { %5017 = vmatprep.subr.bf16.mxu0 %v6973_v43  ;;  %5047 = vmatpush1.bf16.msra.mxu1 %v6976_v46 }
 0x249   :  { %v6999_v5 = vpop.f32.mrb[18].mxu1  ;;  %4574 = vmatmul.mubr.msk.f32.gmra.mrb[24].mxu0 %vm1191_vm3, %v1141_v56  ;;  %4590 = vmatmul.mubr.msk.f32.gmra.mrb[32].mxu1 %vm1191_vm3, %v1141_v56 }
 0x24a   :  { %v7003_v10 = vpop.f32.mrb[19].mxu1  ;;  %1334 = vmatprep.mubr.f32.mxu0 %v6531_v28  ;;  %1495 = vmatprep.mubr.f32.mxu1 %v6531_v28  ;;  %v1148_v51 = vadd.f32 %v6999_v5, %v6913_v50 }
 0x24b   :  { %5019 = vmatpush1.bf16.msra.mxu0 %v6988_v58  ;;  %5049 = vmatprep.subr.bf16.mxu1 %v6991_v62  ;;  %v1147_v55 = vadd.f32 %v6913_v50, %v7003_v10 }
 0x24c   :  { %5021 = vmatprep.subr.bf16.mxu0 %v6994_v0  ;;  %5051 = vmatpush1.bf16.msra.mxu1 %v6997_v2 }
 0x24d   :  { %v7021_v25 = vpop.f32.mrb[20].mxu1  ;;  %4575 = vmatmul.mubr.msk.f32.gmra.mrb[26].mxu0 %vm1191_vm3, %v1142_v13  ;;  %4591 = vmatmul.mubr.msk.f32.gmra.mrb[34].mxu1 %vm1191_vm3, %v1142_v13 }
 0x24e   :  { %v1095_v34 = vpop.f32.mrb[21].mxu1  ;;  %1340 = vmatprep.mubr.f32.mxu0 %v6531_v28  ;;  %1501 = vmatprep.mubr.f32.mxu1 %v6531_v28  ;;  %v1150_v5 = vadd.f32 %v7021_v25, %v6913_v50 }
 0x24f   :  { %5023 = vmatpush1.bf16.msra.mxu0 %v7010_v15  ;;  %5053 = vmatprep.subr.bf16.mxu1 %v7013_v19  ;;  %v1149_v6 = vadd.f32 %v6913_v50, %v1095_v34 }
 0x250   :  { %5025 = vmatprep.subr.bf16.mxu0 %v7016_v20  ;;  %5055 = vmatpush1.bf16.msra.mxu1 %v7019_v21 }
 0x251   :  { %v4936_v52 = vpop.f32.mrb[22].mxu1  ;;  %4576 = vmatmul.mubr.msk.f32.gmra.mrb[28].mxu0 %vm1191_vm3, %v1143_v35  ;;  %4592 = vmatmul.mubr.msk.f32.gmra.mrb[36].mxu1 %vm1191_vm3, %v1143_v35 }
 0x252   :  { %v1105_v56 = vpop.f32.mrb[23].mxu1  ;;  %1346 = vmatprep.mubr.f32.mxu0 %v6531_v28  ;;  %1507 = vmatprep.mubr.f32.mxu1 %v6531_v28  ;;  %v1152_v9 = vadd.f32 %v4936_v52, %v6913_v50 }
 0x253   :  { %5027 = vmatpush1.bf16.msra.mxu0 %v7030_v36  ;;  %5057 = vmatprep.subr.bf16.mxu1 %v7033_v38  ;;  %v1151_v7 = vadd.f32 %v6913_v50, %v1105_v56  ;;  %v1171_v50 = vlaneseq }
 0x254   :  { %5029 = vmatprep.subr.bf16.mxu0 %v7037_v41  ;;  %5059 = vmatpush1.bf16.msra.mxu1 %v7039_v48 }
 0x255   :  { %4577 = vmatmul.mubr.msk.f32.gmra.mrb[30].mxu0 %vm1191_vm3, %v1144_v60  ;;  %4593 = vmatmul.mubr.msk.f32.gmra.mrb[38].mxu1 %vm1191_vm3, %v1144_v60  ;;  %v1172_v10 = vshrl.u32 %v1171_v50, 7 }
 0x256   :  { %1352 = vmatprep.mubr.f32.mxu0 %v6531_v28  ;;  %1513 = vmatprep.mubr.f32.mxu1 %v6531_v28 }
 0x257   :  { %5031 = vmatpush1.bf16.msra.mxu0 %v7049_v61  ;;  %5061 = vmatprep.subr.bf16.mxu1 %v7051_v1  ;;  %v1173_v13 = vsub.s32 0, %v1172_v10  ;;  %v1177_v18 = vsub.s32 1, %v1172_v10  ;;  %v1185_v29 = vsub.s32 3, %v1172_v10  ;;  %v1181_v37 = vsub.s32 2, %v1172_v10 }
 0x258   :  { %5063 = vmatpush1.bf16.msra.mxu1 %v7055_v3  ;;  %5065 = vmatprep.subr.bf16.mxu0 %v6904_v44 }
 0x259   :  { %4578 = vmatmul.mubr.msk.f32.gmra.mrb[32].mxu0 %vm1191_vm3, %v1145_v33  ;;  %4594 = vmatmul.mubr.msk.f32.gmra.mrb[40].mxu1 %vm1191_vm3, %v1145_v33  ;;  %v7150_v22 = vrot.slane %v1169_v16, %v1173_v13  ;;  %v7152_v17 = vrot.slane %v1169_v16, %v1177_v18  ;;  %v7156_v49 = vrot.slane %v1169_v16, %v1185_v29 }
 0x25a   :  { %1358 = vmatprep.mubr.f32.mxu0 %v6531_v28  ;;  %1519 = vmatprep.mubr.f32.mxu1 %v6531_v28  ;;  %v7159_v53 = vrot.slane %v1169_v16, %v1181_v37 }
 0x25b   :  { %5097 = vmatprep.subr.bf16.mxu1 %v6907_v47 }
 0x25d   :  { %4579 = vmatmul.mubr.msk.f32.gmra.mrb[34].mxu0 %vm1191_vm3, %v1146_v4  ;;  %4595 = vmatmul.mubr.msk.f32.gmra.mrb[42].mxu1 %vm1191_vm3, %v1146_v4 }
 0x25e   :  { %1364 = vmatprep.mubr.f32.mxu0 %v6531_v28  ;;  %1525 = vmatprep.mubr.f32.mxu1 %v6531_v28 }
 0x261   :  { %4580 = vmatmul.mubr.msk.f32.gmra.mrb[36].mxu0 %vm1191_vm3, %v1147_v55  ;;  %4596 = vmatmul.mubr.msk.f32.gmra.mrb[44].mxu1 %vm1191_vm3, %v1147_v55 }
 0x262   :  { %1370 = vmatprep.mubr.f32.mxu0 %v6531_v28  ;;  %1531 = vmatprep.mubr.f32.mxu1 %v6531_v28 }
 0x265   :  { %4581 = vmatmul.mubr.msk.f32.gmra.mrb[38].mxu0 %vm1191_vm3, %v1148_v51  ;;  %4597 = vmatmul.mubr.msk.f32.gmra.mrb[46].mxu1 %vm1191_vm3, %v1148_v51 }
 0x266   :  { %1376 = vmatprep.mubr.f32.mxu0 %v6531_v28  ;;  %1537 = vmatprep.mubr.f32.mxu1 %v6531_v28 }
 0x269   :  { %4582 = vmatmul.mubr.msk.f32.gmra.mrb[40].mxu0 %vm1191_vm3, %v1149_v6  ;;  %4598 = vmatmul.mubr.msk.f32.gmra.mrb[48].mxu1 %vm1191_vm3, %v1149_v6 }
 0x26a   :  { %1382 = vmatprep.mubr.f32.mxu0 %v6531_v28  ;;  %1543 = vmatprep.mubr.f32.mxu1 %v6531_v28 }
 0x26d   :  { %4583 = vmatmul.mubr.msk.f32.gmra.mrb[42].mxu0 %vm1191_vm3, %v1150_v5  ;;  %4599 = vmatmul.mubr.msk.f32.gmra.mrb[50].mxu1 %vm1191_vm3, %v1150_v5 }
 0x26e   :  { %1388 = vmatprep.mubr.f32.mxu0 %v6531_v28  ;;  %1549 = vmatprep.mubr.f32.mxu1 %v6531_v28 }
 0x271   :  { %4584 = vmatmul.mubr.msk.f32.gmra.mrb[44].mxu0 %vm1191_vm3, %v1151_v7  ;;  %4600 = vmatmul.mubr.msk.f32.gmra.mrb[52].mxu1 %vm1191_vm3, %v1151_v7 }
 0x272   :  { %1394 = vmatprep.mubr.f32.mxu0 %v6531_v28  ;;  %1555 = vmatprep.mubr.f32.mxu1 %v6531_v28 }
 0x275   :  { %4585 = vmatmul.mubr.msk.f32.gmra.mrb[46].mxu0 %vm1191_vm3, %v1152_v9  ;;  %4601 = vmatmul.mubr.msk.f32.gmra.mrb[54].mxu1 %vm1191_vm3, %v1152_v9 }
 0x276   :  { %1690 = vmatprep.mubr.f32.mxu0 %v6531_v28  ;;  %1761 = vmatprep.mubr.f32.mxu1 %v6531_v28 }
 0x279   :  { %1691 = vmatmul.mubr.f32.vlgmr.msra.gmra.mrb[16].mxu0 %v6531_v28  ;;  %1762 = vmatmul.mubr.f32.vlgmr.msra.gmra.mrb[24].mxu1 %v6531_v28 }
 0x27a   :  { %5067 = vmatpush1.bf16.msra.mxu0 %v6915_v57  ;;  %5099 = vmatpush1.bf16.msra.mxu1 %v6920_v63 }
 0x27b   :  { %5069 = vmatprep.subr.bf16.mxu0 %v6918_v59  ;;  %5101 = vmatprep.subr.bf16.mxu1 %v6931_v11 }
 0x27c   :  { %1860 = vmatprep.mubr.f32.mxu0 %v6531_v28  ;;  %1931 = vmatprep.mubr.f32.mxu1 %v6531_v28 }
 0x27e   :  { %5071 = vmatpush1.bf16.msra.mxu0 %v6929_v8  ;;  %5103 = vmatpush1.bf16.msra.mxu1 %v6936_v14 }
 0x27f   :  { %5073 = vmatprep.subr.bf16.mxu0 %v6933_v12  ;;  %5105 = vmatprep.subr.bf16.mxu1 %v6949_v26 }
 0x282   :  { %5075 = vmatpush1.bf16.msra.mxu0 %v6946_v23  ;;  %5107 = vmatpush1.bf16.msra.mxu1 %v6955_v30 }
 0x283   :  { %5077 = vmatprep.subr.bf16.mxu0 %v6952_v27  ;;  %5109 = vmatprep.subr.bf16.mxu1 %v6970_v42 }
 0x286   :  { %5079 = vmatpush1.bf16.msra.mxu0 %v6967_v39  ;;  %5111 = vmatpush1.bf16.msra.mxu1 %v6976_v46 }
 0x287   :  { %5081 = vmatprep.subr.bf16.mxu0 %v6973_v43  ;;  %5113 = vmatprep.subr.bf16.mxu1 %v6991_v62 }
 0x28a   :  { %5083 = vmatpush1.bf16.msra.mxu0 %v6988_v58  ;;  %5115 = vmatpush1.bf16.msra.mxu1 %v6997_v2 }
 0x28b   :  { %5085 = vmatprep.subr.bf16.mxu0 %v6994_v0  ;;  %5117 = vmatprep.subr.bf16.mxu1 %v7013_v19 }
 0x28e   :  { %5087 = vmatpush1.bf16.msra.mxu0 %v7010_v15  ;;  %5119 = vmatpush1.bf16.msra.mxu1 %v7019_v21 }
 0x28f   :  { %5089 = vmatprep.subr.bf16.mxu0 %v7016_v20  ;;  %5121 = vmatprep.subr.bf16.mxu1 %v7033_v38 }
 0x292   :  { %5091 = vmatpush1.bf16.msra.mxu0 %v7030_v36  ;;  %5123 = vmatpush1.bf16.msra.mxu1 %v7039_v48 }
 0x293   :  { %5093 = vmatprep.subr.bf16.mxu0 %v7037_v41  ;;  %5125 = vmatprep.subr.bf16.mxu1 %v7051_v1 }
 0x296   :  { %5095 = vmatpush1.bf16.msra.mxu0 %v7049_v61  ;;  %5127 = vmatpush1.bf16.msra.mxu1 %v7055_v3 }
 0x297   :  { %5129 = vmatprep.subr.bf16.mxu0 %v6904_v44  ;;  %5161 = vmatprep.subr.bf16.mxu1 %v6907_v47 }
 0x34c   :  { %v1692_v24 = vpop.f32.mrb[16].mxu0  ;;  %v1763_v25 = vpop.f32.mrb[24].mxu1 }
 0x34d   :  { %v6058_v31 = vadd.f32 %v1692_v24, %v7150_v22  ;;  %v1694_v32 = vpop.f32.mrb[17].mxu0  ;;  %v1765_v34 = vpop.f32.mrb[25].mxu1  ;;  %v6090_v56 = vadd.f32 %v1763_v25, %v7159_v53 }
 0x34e   :  { %v6059_v35 = vadd.f32 %v1694_v32, %v7152_v17  ;;  %v6091_v52 = vadd.f32 %v1765_v34, %v7156_v49 }
 0x34f   :  { %v4602_v40 = vmul.f32 -1.442695, %v6058_v31 }
 0x350   :  { %v4603_v45 = vmul.f32 -1.442695, %v6059_v35  ;;  %v4604_v54 = vmul.f32 -1.442695, %v6091_v52 }
 0x351   :  { %6248 = vpow2.f32 %v4602_v40 }
 0x352   :  { %6250 = vpow2.f32 %v4603_v45 }
 0x353   :  { %6252 = vpow2.f32 %v4604_v54 }
 0x354   :  { %6254 = vtanh.f32 %v6090_v56 }
 0x35b   :  { %v6249_v60 = vpop.eup %6248 }
 0x35c   :  { %v6251_v33 = vpop.eup %6250  ;;  %v1775_v4 = vadd.f32 1.0, %v6249_v60 }
 0x35d   :  { %v1781_v55 = vadd.f32 1.0, %v6251_v33  ;;  %v6253_v51 = vpop.eup %6252 }
 0x35e   :  { %6256 = vrcp.f32 %v1775_v4  ;;  %v6255_v6 = vpop.eup %6254  ;;  %v1788_v50 = vadd.f32 1.0, %v6253_v51 }
 0x35f   :  { %6258 = vrcp.f32 %v1781_v55 }
 0x360   :  { %6260 = vrcp.f32 %v1788_v50 }
 0x368   :  { %v6257_v5 = vpop.eup %6256 }
 0x369   :  { %v6259_v7 = vpop.eup %6258  ;;  %v1792_v9 = vmul.f32 %v6257_v5, %v6255_v6 }
 0x36a   :  { %v1791_v10 = vmul.f32 0.0, %v6259_v7  ;;  %v6261_v16 = vpop.eup %6260 }
 0x36c   :  { %v7162_v13 = vadd.f32 %v1792_v9, %v1791_v10 }
 0x36e   :  { %6262 = vtanh.f32 %v7162_v13 }
 0x378   :  { %v6263_v18 = vpop.eup %6262 }
 0x379   :  { %v1795_v24 = vmul.f32 %v6263_v18, %v6261_v16 }
 0x37b   :  { %1861 = vmatmul.mubr.f32.vlgmr.msra.gmra.mrb[18].mxu0 %v1795_v24  ;;  %1932 = vmatmul.mubr.f32.vlgmr.msra.gmra.mrb[26].mxu1 %v1795_v24 }
 0x37c   :  { %5131 = vmatpush1.bf16.msra.mxu0 %v6915_v57  ;;  %5163 = vmatpush1.bf16.msra.mxu1 %v6920_v63 }
 0x37d   :  { %5133 = vmatprep.subr.bf16.mxu0 %v6918_v59  ;;  %5165 = vmatprep.subr.bf16.mxu1 %v6931_v11 }
 0x37e   :  { %2030 = vmatprep.mubr.f32.mxu0 %v6531_v28  ;;  %2101 = vmatprep.mubr.f32.mxu1 %v6531_v28 }
 0x380   :  { %5135 = vmatpush1.bf16.msra.mxu0 %v6929_v8  ;;  %5167 = vmatpush1.bf16.msra.mxu1 %v6936_v14 }
 0x381   :  { %5137 = vmatprep.subr.bf16.mxu0 %v6933_v12  ;;  %5169 = vmatprep.subr.bf16.mxu1 %v6949_v26 }
 0x384   :  { %5139 = vmatpush1.bf16.msra.mxu0 %v6946_v23  ;;  %5171 = vmatpush1.bf16.msra.mxu1 %v6955_v30 }
 0x385   :  { %5141 = vmatprep.subr.bf16.mxu0 %v6952_v27  ;;  %5173 = vmatprep.subr.bf16.mxu1 %v6970_v42 }
 0x388   :  { %5143 = vmatpush1.bf16.msra.mxu0 %v6967_v39  ;;  %5175 = vmatpush1.bf16.msra.mxu1 %v6976_v46 }
 0x389   :  { %5145 = vmatprep.subr.bf16.mxu0 %v6973_v43  ;;  %5177 = vmatprep.subr.bf16.mxu1 %v6991_v62 }
 0x38c   :  { %5147 = vmatpush1.bf16.msra.mxu0 %v6988_v58  ;;  %5179 = vmatpush1.bf16.msra.mxu1 %v6997_v2 }
 0x38d   :  { %5149 = vmatprep.subr.bf16.mxu0 %v6994_v0  ;;  %5181 = vmatprep.subr.bf16.mxu1 %v7013_v19 }
 0x390   :  { %5151 = vmatpush1.bf16.msra.mxu0 %v7010_v15  ;;  %5183 = vmatpush1.bf16.msra.mxu1 %v7019_v21 }
 0x391   :  { %5153 = vmatprep.subr.bf16.mxu0 %v7016_v20  ;;  %5185 = vmatprep.subr.bf16.mxu1 %v7033_v38 }
 0x394   :  { %5155 = vmatpush1.bf16.msra.mxu0 %v7030_v36  ;;  %5187 = vmatpush1.bf16.msra.mxu1 %v7039_v48 }
 0x395   :  { %5157 = vmatprep.subr.bf16.mxu0 %v7037_v41  ;;  %5189 = vmatprep.subr.bf16.mxu1 %v7051_v1 }
 0x398   :  { %5159 = vmatpush1.bf16.msra.mxu0 %v7049_v61  ;;  %5191 = vmatpush1.bf16.msra.mxu1 %v7055_v3 }
 0x399   :  { %5193 = vmatprep.subr.bf16.mxu0 %v6904_v44  ;;  %5225 = vmatprep.subr.bf16.mxu1 %v6907_v47 }
 0x44e   :  { %v1862_v25 = vpop.f32.mrb[18].mxu0  ;;  %v1933_v29 = vpop.f32.mrb[26].mxu1 }
 0x44f   :  { %v6060_v31 = vadd.f32 %v1862_v25, %v7150_v22  ;;  %v1864_v32 = vpop.f32.mrb[19].mxu0  ;;  %v1935_v34 = vpop.f32.mrb[27].mxu1  ;;  %v6092_v54 = vadd.f32 %v1933_v29, %v7159_v53 }
 0x450   :  { %v6061_v35 = vadd.f32 %v1864_v32, %v7152_v17  ;;  %v6093_v37 = vadd.f32 %v1935_v34, %v7156_v49 }
 0x451   :  { %v4605_v40 = vmul.f32 -1.442695, %v6060_v31 }
 0x452   :  { %v4606_v45 = vmul.f32 -1.442695, %v6061_v35  ;;  %v4607_v52 = vmul.f32 -1.442695, %v6093_v37 }
 0x453   :  { %6264 = vpow2.f32 %v4605_v40 }
 0x454   :  { %6266 = vpow2.f32 %v4606_v45 }
 0x455   :  { %6268 = vpow2.f32 %v4607_v52 }
 0x456   :  { %6270 = vtanh.f32 %v6092_v54 }
 0x45d   :  { %v6265_v56 = vpop.eup %6264 }
 0x45e   :  { %v6267_v60 = vpop.eup %6266  ;;  %v1945_v33 = vadd.f32 1.0, %v6265_v56 }
 0x45f   :  { %v1951_v4 = vadd.f32 1.0, %v6267_v60  ;;  %v6269_v55 = vpop.eup %6268 }
 0x460   :  { %6272 = vrcp.f32 %v1945_v33  ;;  %v6271_v51 = vpop.eup %6270  ;;  %v1958_v9 = vadd.f32 1.0, %v6269_v55 }
 0x461   :  { %6274 = vrcp.f32 %v1951_v4 }
 0x462   :  { %6276 = vrcp.f32 %v1958_v9 }
 0x46a   :  { %v6273_v6 = vpop.eup %6272 }
 0x46b   :  { %v6275_v5 = vpop.eup %6274  ;;  %v1962_v7 = vmul.f32 %v6273_v6, %v6271_v51 }
 0x46c   :  { %v1961_v50 = vmul.f32 %v6275_v5, %v7162_v13  ;;  %v6277_v16 = vpop.eup %6276 }
 0x46e   :  { %v7204_v10 = vadd.f32 %v1962_v7, %v1961_v50 }
 0x470   :  { %6278 = vtanh.f32 %v7204_v10 }
 0x47a   :  { %v6279_v18 = vpop.eup %6278 }
 0x47b   :  { %v1965_v24 = vmul.f32 %v6279_v18, %v6277_v16 }
 0x47d   :  { %2031 = vmatmul.mubr.f32.vlgmr.msra.gmra.mrb[20].mxu0 %v1965_v24  ;;  %2102 = vmatmul.mubr.f32.vlgmr.msra.gmra.mrb[28].mxu1 %v1965_v24 }
 0x47e   :  { %5195 = vmatpush1.bf16.msra.mxu0 %v6915_v57  ;;  %5227 = vmatpush1.bf16.msra.mxu1 %v6920_v63 }
 0x47f   :  { %5197 = vmatprep.subr.bf16.mxu0 %v6918_v59  ;;  %5229 = vmatprep.subr.bf16.mxu1 %v6931_v11 }
 0x480   :  { %2200 = vmatprep.mubr.f32.mxu0 %v6531_v28  ;;  %2271 = vmatprep.mubr.f32.mxu1 %v6531_v28 }
 0x482   :  { %5199 = vmatpush1.bf16.msra.mxu0 %v6929_v8  ;;  %5231 = vmatpush1.bf16.msra.mxu1 %v6936_v14 }
 0x483   :  { %5201 = vmatprep.subr.bf16.mxu0 %v6933_v12  ;;  %5233 = vmatprep.subr.bf16.mxu1 %v6949_v26 }
 0x486   :  { %5203 = vmatpush1.bf16.msra.mxu0 %v6946_v23  ;;  %5235 = vmatpush1.bf16.msra.mxu1 %v6955_v30 }
 0x487   :  { %5205 = vmatprep.subr.bf16.mxu0 %v6952_v27  ;;  %5237 = vmatprep.subr.bf16.mxu1 %v6970_v42 }
 0x48a   :  { %5207 = vmatpush1.bf16.msra.mxu0 %v6967_v39  ;;  %5239 = vmatpush1.bf16.msra.mxu1 %v6976_v46 }
 0x48b   :  { %5209 = vmatprep.subr.bf16.mxu0 %v6973_v43  ;;  %5241 = vmatprep.subr.bf16.mxu1 %v6991_v62 }
 0x48e   :  { %5211 = vmatpush1.bf16.msra.mxu0 %v6988_v58  ;;  %5243 = vmatpush1.bf16.msra.mxu1 %v6997_v2 }
 0x48f   :  { %5213 = vmatprep.subr.bf16.mxu0 %v6994_v0  ;;  %5245 = vmatprep.subr.bf16.mxu1 %v7013_v19 }
 0x492   :  { %5215 = vmatpush1.bf16.msra.mxu0 %v7010_v15  ;;  %5247 = vmatpush1.bf16.msra.mxu1 %v7019_v21 }
 0x493   :  { %5217 = vmatprep.subr.bf16.mxu0 %v7016_v20  ;;  %5249 = vmatprep.subr.bf16.mxu1 %v7033_v38 }
 0x496   :  { %5219 = vmatpush1.bf16.msra.mxu0 %v7030_v36  ;;  %5251 = vmatpush1.bf16.msra.mxu1 %v7039_v48 }
 0x497   :  { %5221 = vmatprep.subr.bf16.mxu0 %v7037_v41  ;;  %5253 = vmatprep.subr.bf16.mxu1 %v7051_v1 }
 0x49a   :  { %5223 = vmatpush1.bf16.msra.mxu0 %v7049_v61  ;;  %5255 = vmatpush1.bf16.msra.mxu1 %v7055_v3 }
 0x49b   :  { %5257 = vmatprep.subr.bf16.mxu0 %v6904_v44  ;;  %5289 = vmatprep.subr.bf16.mxu1 %v6907_v47 }
 0x550   :  { %v2032_v13 = vpop.f32.mrb[20].mxu0  ;;  %v2103_v25 = vpop.f32.mrb[28].mxu1 }
 0x551   :  { %v6062_v29 = vadd.f32 %v2032_v13, %v7150_v22  ;;  %v2034_v31 = vpop.f32.mrb[21].mxu0  ;;  %v2105_v32 = vpop.f32.mrb[29].mxu1  ;;  %v6094_v52 = vadd.f32 %v2103_v25, %v7159_v53 }
 0x552   :  { %v6063_v34 = vadd.f32 %v2034_v31, %v7152_v17  ;;  %v6095_v45 = vadd.f32 %v2105_v32, %v7156_v49 }
 0x553   :  { %v4608_v35 = vmul.f32 -1.442695, %v6062_v29 }
 0x554   :  { %v4609_v40 = vmul.f32 -1.442695, %v6063_v34  ;;  %v4610_v37 = vmul.f32 -1.442695, %v6095_v45 }
 0x555   :  { %6280 = vpow2.f32 %v4608_v35 }
 0x556   :  { %6282 = vpow2.f32 %v4609_v40 }
 0x557   :  { %6284 = vpow2.f32 %v4610_v37 }
 0x558   :  { %6286 = vtanh.f32 %v6094_v52 }
 0x55f   :  { %v6281_v54 = vpop.eup %6280 }
 0x560   :  { %v6283_v56 = vpop.eup %6282  ;;  %v2115_v60 = vadd.f32 1.0, %v6281_v54 }
 0x561   :  { %v2121_v33 = vadd.f32 1.0, %v6283_v56  ;;  %v6285_v4 = vpop.eup %6284 }
 0x562   :  { %6288 = vrcp.f32 %v2115_v60  ;;  %v6287_v55 = vpop.eup %6286  ;;  %v2128_v7 = vadd.f32 1.0, %v6285_v4 }
 0x563   :  { %6290 = vrcp.f32 %v2121_v33 }
 0x564   :  { %6292 = vrcp.f32 %v2128_v7 }
 0x56c   :  { %v6289_v51 = vpop.eup %6288 }
 0x56d   :  { %v6291_v6 = vpop.eup %6290  ;;  %v2132_v5 = vmul.f32 %v6289_v51, %v6287_v55 }
 0x56e   :  { %v2131_v9 = vmul.f32 %v6291_v6, %v7204_v10  ;;  %v6293_v16 = vpop.eup %6292 }
 0x570   :  { %v7246_v50 = vadd.f32 %v2132_v5, %v2131_v9 }
 0x572   :  { %6294 = vtanh.f32 %v7246_v50 }
 0x57c   :  { %v6295_v18 = vpop.eup %6294 }
 0x57d   :  { %v2135_v24 = vmul.f32 %v6295_v18, %v6293_v16 }
 0x57f   :  { %2201 = vmatmul.mubr.f32.vlgmr.msra.gmra.mrb[22].mxu0 %v2135_v24  ;;  %2272 = vmatmul.mubr.f32.vlgmr.msra.gmra.mrb[30].mxu1 %v2135_v24 }
 0x580   :  { %5259 = vmatpush1.bf16.msra.mxu0 %v6915_v57  ;;  %5291 = vmatpush1.bf16.msra.mxu1 %v6920_v63 }
 0x581   :  { %5261 = vmatprep.subr.bf16.mxu0 %v6918_v59  ;;  %5293 = vmatprep.subr.bf16.mxu1 %v6931_v11 }
 0x582   :  { %2370 = vmatprep.mubr.f32.mxu0 %v6531_v28  ;;  %2441 = vmatprep.mubr.f32.mxu1 %v6531_v28 }
 0x584   :  { %5263 = vmatpush1.bf16.msra.mxu0 %v6929_v8  ;;  %5295 = vmatpush1.bf16.msra.mxu1 %v6936_v14 }
 0x585   :  { %5265 = vmatprep.subr.bf16.mxu0 %v6933_v12  ;;  %5297 = vmatprep.subr.bf16.mxu1 %v6949_v26 }
 0x588   :  { %5267 = vmatpush1.bf16.msra.mxu0 %v6946_v23  ;;  %5299 = vmatpush1.bf16.msra.mxu1 %v6955_v30 }
 0x589   :  { %5269 = vmatprep.subr.bf16.mxu0 %v6952_v27  ;;  %5301 = vmatprep.subr.bf16.mxu1 %v6970_v42 }
 0x58c   :  { %5271 = vmatpush1.bf16.msra.mxu0 %v6967_v39  ;;  %5303 = vmatpush1.bf16.msra.mxu1 %v6976_v46 }
 0x58d   :  { %5273 = vmatprep.subr.bf16.mxu0 %v6973_v43  ;;  %5305 = vmatprep.subr.bf16.mxu1 %v6991_v62 }
 0x590   :  { %5275 = vmatpush1.bf16.msra.mxu0 %v6988_v58  ;;  %5307 = vmatpush1.bf16.msra.mxu1 %v6997_v2 }
 0x591   :  { %5277 = vmatprep.subr.bf16.mxu0 %v6994_v0  ;;  %5309 = vmatprep.subr.bf16.mxu1 %v7013_v19 }
 0x594   :  { %5279 = vmatpush1.bf16.msra.mxu0 %v7010_v15  ;;  %5311 = vmatpush1.bf16.msra.mxu1 %v7019_v21 }
 0x595   :  { %5281 = vmatprep.subr.bf16.mxu0 %v7016_v20  ;;  %5313 = vmatprep.subr.bf16.mxu1 %v7033_v38 }
 0x598   :  { %5283 = vmatpush1.bf16.msra.mxu0 %v7030_v36  ;;  %5315 = vmatpush1.bf16.msra.mxu1 %v7039_v48 }
 0x599   :  { %5285 = vmatprep.subr.bf16.mxu0 %v7037_v41  ;;  %5317 = vmatprep.subr.bf16.mxu1 %v7051_v1 }
 0x59c   :  { %5287 = vmatpush1.bf16.msra.mxu0 %v7049_v61  ;;  %5319 = vmatpush1.bf16.msra.mxu1 %v7055_v3 }
 0x59d   :  { %5321 = vmatprep.subr.bf16.mxu0 %v6904_v44  ;;  %5353 = vmatprep.subr.bf16.mxu1 %v6907_v47 }
 0x652   :  { %v2202_v10 = vpop.f32.mrb[22].mxu0  ;;  %v2273_v13 = vpop.f32.mrb[30].mxu1 }
 0x653   :  { %v6064_v25 = vadd.f32 %v2202_v10, %v7150_v22  ;;  %v2204_v29 = vpop.f32.mrb[23].mxu0  ;;  %v2275_v31 = vpop.f32.mrb[31].mxu1  ;;  %v6096_v37 = vadd.f32 %v2273_v13, %v7159_v53 }
 0x654   :  { %v6065_v32 = vadd.f32 %v2204_v29, %v7152_v17  ;;  %v6097_v40 = vadd.f32 %v2275_v31, %v7156_v49 }
 0x655   :  { %v4611_v34 = vmul.f32 -1.442695, %v6064_v25 }
 0x656   :  { %v4612_v35 = vmul.f32 -1.442695, %v6065_v32  ;;  %v4613_v45 = vmul.f32 -1.442695, %v6097_v40 }
 0x657   :  { %6296 = vpow2.f32 %v4611_v34 }
 0x658   :  { %6298 = vpow2.f32 %v4612_v35 }
 0x659   :  { %6300 = vpow2.f32 %v4613_v45 }
 0x65a   :  { %6302 = vtanh.f32 %v6096_v37 }
 0x661   :  { %v6297_v52 = vpop.eup %6296 }
 0x662   :  { %v6299_v54 = vpop.eup %6298  ;;  %v2285_v56 = vadd.f32 1.0, %v6297_v52 }
 0x663   :  { %v2291_v60 = vadd.f32 1.0, %v6299_v54  ;;  %v6301_v33 = vpop.eup %6300 }
 0x664   :  { %6304 = vrcp.f32 %v2285_v56  ;;  %v6303_v4 = vpop.eup %6302  ;;  %v2298_v5 = vadd.f32 1.0, %v6301_v33 }
 0x665   :  { %6306 = vrcp.f32 %v2291_v60 }
 0x666   :  { %6308 = vrcp.f32 %v2298_v5 }
 0x66e   :  { %v6305_v55 = vpop.eup %6304 }
 0x66f   :  { %v6307_v51 = vpop.eup %6306  ;;  %v2302_v6 = vmul.f32 %v6305_v55, %v6303_v4 }
 0x670   :  { %v2301_v7 = vmul.f32 %v6307_v51, %v7246_v50  ;;  %v6309_v16 = vpop.eup %6308 }
 0x672   :  { %v7288_v9 = vadd.f32 %v2302_v6, %v2301_v7 }
 0x674   :  { %6310 = vtanh.f32 %v7288_v9 }
 0x67e   :  { %v6311_v18 = vpop.eup %6310 }
 0x67f   :  { %v2305_v24 = vmul.f32 %v6311_v18, %v6309_v16 }
 0x681   :  { %2371 = vmatmul.mubr.f32.vlgmr.msra.gmra.mrb[24].mxu0 %v2305_v24  ;;  %2442 = vmatmul.mubr.f32.vlgmr.msra.gmra.mrb[32].mxu1 %v2305_v24 }
 0x682   :  { %5323 = vmatpush1.bf16.msra.mxu0 %v6915_v57  ;;  %5355 = vmatpush1.bf16.msra.mxu1 %v6920_v63 }
 0x683   :  { %5325 = vmatprep.subr.bf16.mxu0 %v6918_v59  ;;  %5357 = vmatprep.subr.bf16.mxu1 %v6931_v11 }
 0x684   :  { %2540 = vmatprep.mubr.f32.mxu0 %v6531_v28  ;;  %2611 = vmatprep.mubr.f32.mxu1 %v6531_v28 }
 0x686   :  { %5327 = vmatpush1.bf16.msra.mxu0 %v6929_v8  ;;  %5359 = vmatpush1.bf16.msra.mxu1 %v6936_v14 }
 0x687   :  { %5329 = vmatprep.subr.bf16.mxu0 %v6933_v12  ;;  %5361 = vmatprep.subr.bf16.mxu1 %v6949_v26 }
 0x68a   :  { %5331 = vmatpush1.bf16.msra.mxu0 %v6946_v23  ;;  %5363 = vmatpush1.bf16.msra.mxu1 %v6955_v30 }
 0x68b   :  { %5333 = vmatprep.subr.bf16.mxu0 %v6952_v27  ;;  %5365 = vmatprep.subr.bf16.mxu1 %v6970_v42 }
 0x68e   :  { %5335 = vmatpush1.bf16.msra.mxu0 %v6967_v39  ;;  %5367 = vmatpush1.bf16.msra.mxu1 %v6976_v46 }
 0x68f   :  { %5337 = vmatprep.subr.bf16.mxu0 %v6973_v43  ;;  %5369 = vmatprep.subr.bf16.mxu1 %v6991_v62 }
 0x692   :  { %5339 = vmatpush1.bf16.msra.mxu0 %v6988_v58  ;;  %5371 = vmatpush1.bf16.msra.mxu1 %v6997_v2 }
 0x693   :  { %5341 = vmatprep.subr.bf16.mxu0 %v6994_v0  ;;  %5373 = vmatprep.subr.bf16.mxu1 %v7013_v19 }
 0x696   :  { %5343 = vmatpush1.bf16.msra.mxu0 %v7010_v15  ;;  %5375 = vmatpush1.bf16.msra.mxu1 %v7019_v21 }
 0x697   :  { %5345 = vmatprep.subr.bf16.mxu0 %v7016_v20  ;;  %5377 = vmatprep.subr.bf16.mxu1 %v7033_v38 }
 0x69a   :  { %5347 = vmatpush1.bf16.msra.mxu0 %v7030_v36  ;;  %5379 = vmatpush1.bf16.msra.mxu1 %v7039_v48 }
 0x69b   :  { %5349 = vmatprep.subr.bf16.mxu0 %v7037_v41  ;;  %5381 = vmatprep.subr.bf16.mxu1 %v7051_v1 }
 0x69e   :  { %5351 = vmatpush1.bf16.msra.mxu0 %v7049_v61  ;;  %5383 = vmatpush1.bf16.msra.mxu1 %v7055_v3 }
 0x69f   :  { %5385 = vmatprep.subr.bf16.mxu0 %v6904_v44  ;;  %5417 = vmatprep.subr.bf16.mxu1 %v6907_v47 }
 0x754   :  { %v2372_v50 = vpop.f32.mrb[24].mxu0  ;;  %v2443_v10 = vpop.f32.mrb[32].mxu1 }
 0x755   :  { %v6066_v13 = vadd.f32 %v2372_v50, %v7150_v22  ;;  %v2374_v25 = vpop.f32.mrb[25].mxu0  ;;  %v2445_v29 = vpop.f32.mrb[33].mxu1  ;;  %v6098_v45 = vadd.f32 %v2443_v10, %v7159_v53 }
 0x756   :  { %v6067_v31 = vadd.f32 %v2374_v25, %v7152_v17  ;;  %v6099_v35 = vadd.f32 %v2445_v29, %v7156_v49 }
 0x757   :  { %v4614_v32 = vmul.f32 -1.442695, %v6066_v13 }
 0x758   :  { %v4615_v34 = vmul.f32 -1.442695, %v6067_v31  ;;  %v4616_v40 = vmul.f32 -1.442695, %v6099_v35 }
 0x759   :  { %6312 = vpow2.f32 %v4614_v32 }
 0x75a   :  { %6314 = vpow2.f32 %v4615_v34 }
 0x75b   :  { %6316 = vpow2.f32 %v4616_v40 }
 0x75c   :  { %6318 = vtanh.f32 %v6098_v45 }
 0x763   :  { %v6313_v37 = vpop.eup %6312 }
 0x764   :  { %v6315_v52 = vpop.eup %6314  ;;  %v2455_v54 = vadd.f32 1.0, %v6313_v37 }
 0x765   :  { %v2461_v56 = vadd.f32 1.0, %v6315_v52  ;;  %v6317_v60 = vpop.eup %6316 }
 0x766   :  { %6320 = vrcp.f32 %v2455_v54  ;;  %v6319_v33 = vpop.eup %6318  ;;  %v2468_v6 = vadd.f32 1.0, %v6317_v60 }
 0x767   :  { %6322 = vrcp.f32 %v2461_v56 }
 0x768   :  { %6324 = vrcp.f32 %v2468_v6 }
 0x770   :  { %v6321_v4 = vpop.eup %6320 }
 0x771   :  { %v6323_v55 = vpop.eup %6322  ;;  %v2472_v51 = vmul.f32 %v6321_v4, %v6319_v33 }
 0x772   :  { %v2471_v5 = vmul.f32 %v6323_v55, %v7288_v9  ;;  %v6325_v16 = vpop.eup %6324 }
 0x774   :  { %v7330_v7 = vadd.f32 %v2472_v51, %v2471_v5 }
 0x776   :  { %6326 = vtanh.f32 %v7330_v7 }
 0x780   :  { %v6327_v18 = vpop.eup %6326 }
 0x781   :  { %v2475_v24 = vmul.f32 %v6327_v18, %v6325_v16 }
 0x783   :  { %2541 = vmatmul.mubr.f32.vlgmr.msra.gmra.mrb[26].mxu0 %v2475_v24  ;;  %2612 = vmatmul.mubr.f32.vlgmr.msra.gmra.mrb[34].mxu1 %v2475_v24 }
 0x784   :  { %5387 = vmatpush1.bf16.msra.mxu0 %v6915_v57  ;;  %5419 = vmatpush1.bf16.msra.mxu1 %v6920_v63 }
 0x785   :  { %5389 = vmatprep.subr.bf16.mxu0 %v6918_v59  ;;  %5421 = vmatprep.subr.bf16.mxu1 %v6931_v11 }
 0x786   :  { %2710 = vmatprep.mubr.f32.mxu0 %v6531_v28  ;;  %2781 = vmatprep.mubr.f32.mxu1 %v6531_v28 }
 0x788   :  { %5391 = vmatpush1.bf16.msra.mxu0 %v6929_v8  ;;  %5423 = vmatpush1.bf16.msra.mxu1 %v6936_v14 }
 0x789   :  { %5393 = vmatprep.subr.bf16.mxu0 %v6933_v12  ;;  %5425 = vmatprep.subr.bf16.mxu1 %v6949_v26 }
 0x78c   :  { %5395 = vmatpush1.bf16.msra.mxu0 %v6946_v23  ;;  %5427 = vmatpush1.bf16.msra.mxu1 %v6955_v30 }
 0x78d   :  { %5397 = vmatprep.subr.bf16.mxu0 %v6952_v27  ;;  %5429 = vmatprep.subr.bf16.mxu1 %v6970_v42 }
 0x790   :  { %5399 = vmatpush1.bf16.msra.mxu0 %v6967_v39  ;;  %5431 = vmatpush1.bf16.msra.mxu1 %v6976_v46 }
 0x791   :  { %5401 = vmatprep.subr.bf16.mxu0 %v6973_v43  ;;  %5433 = vmatprep.subr.bf16.mxu1 %v6991_v62 }
 0x794   :  { %5403 = vmatpush1.bf16.msra.mxu0 %v6988_v58  ;;  %5435 = vmatpush1.bf16.msra.mxu1 %v6997_v2 }
 0x795   :  { %5405 = vmatprep.subr.bf16.mxu0 %v6994_v0  ;;  %5437 = vmatprep.subr.bf16.mxu1 %v7013_v19 }
 0x798   :  { %5407 = vmatpush1.bf16.msra.mxu0 %v7010_v15  ;;  %5439 = vmatpush1.bf16.msra.mxu1 %v7019_v21 }
 0x799   :  { %5409 = vmatprep.subr.bf16.mxu0 %v7016_v20  ;;  %5441 = vmatprep.subr.bf16.mxu1 %v7033_v38 }
 0x79c   :  { %5411 = vmatpush1.bf16.msra.mxu0 %v7030_v36  ;;  %5443 = vmatpush1.bf16.msra.mxu1 %v7039_v48 }
 0x79d   :  { %5413 = vmatprep.subr.bf16.mxu0 %v7037_v41  ;;  %5445 = vmatprep.subr.bf16.mxu1 %v7051_v1 }
 0x7a0   :  { %5415 = vmatpush1.bf16.msra.mxu0 %v7049_v61  ;;  %5447 = vmatpush1.bf16.msra.mxu1 %v7055_v3 }
 0x7a1   :  { %5449 = vmatprep.subr.bf16.mxu0 %v6904_v44  ;;  %5481 = vmatprep.subr.bf16.mxu1 %v6907_v47 }
 0x856   :  { %v2542_v9 = vpop.f32.mrb[26].mxu0  ;;  %v2613_v50 = vpop.f32.mrb[34].mxu1 }
 0x857   :  { %v6068_v10 = vadd.f32 %v2542_v9, %v7150_v22  ;;  %v2544_v13 = vpop.f32.mrb[27].mxu0  ;;  %v2615_v25 = vpop.f32.mrb[35].mxu1  ;;  %v6100_v40 = vadd.f32 %v2613_v50, %v7159_v53 }
 0x858   :  { %v6069_v29 = vadd.f32 %v2544_v13, %v7152_v17  ;;  %v6101_v34 = vadd.f32 %v2615_v25, %v7156_v49 }
 0x859   :  { %v4617_v31 = vmul.f32 -1.442695, %v6068_v10 }
 0x85a   :  { %v4618_v32 = vmul.f32 -1.442695, %v6069_v29  ;;  %v4619_v35 = vmul.f32 -1.442695, %v6101_v34 }
 0x85b   :  { %6328 = vpow2.f32 %v4617_v31 }
 0x85c   :  { %6330 = vpow2.f32 %v4618_v32 }
 0x85d   :  { %6332 = vpow2.f32 %v4619_v35 }
 0x85e   :  { %6334 = vtanh.f32 %v6100_v40 }
 0x865   :  { %v6329_v45 = vpop.eup %6328 }
 0x866   :  { %v6331_v37 = vpop.eup %6330  ;;  %v2625_v52 = vadd.f32 1.0, %v6329_v45 }
 0x867   :  { %v2631_v54 = vadd.f32 1.0, %v6331_v37  ;;  %v6333_v56 = vpop.eup %6332 }
 0x868   :  { %6336 = vrcp.f32 %v2625_v52  ;;  %v6335_v60 = vpop.eup %6334  ;;  %v2638_v51 = vadd.f32 1.0, %v6333_v56 }
 0x869   :  { %6338 = vrcp.f32 %v2631_v54 }
 0x86a   :  { %6340 = vrcp.f32 %v2638_v51 }
 0x872   :  { %v6337_v33 = vpop.eup %6336 }
 0x873   :  { %v6339_v4 = vpop.eup %6338  ;;  %v2642_v55 = vmul.f32 %v6337_v33, %v6335_v60 }
 0x874   :  { %v2641_v6 = vmul.f32 %v6339_v4, %v7330_v7  ;;  %v6341_v16 = vpop.eup %6340 }
 0x876   :  { %v7372_v5 = vadd.f32 %v2642_v55, %v2641_v6 }
 0x878   :  { %6342 = vtanh.f32 %v7372_v5 }
 0x882   :  { %v6343_v18 = vpop.eup %6342 }
 0x883   :  { %v2645_v24 = vmul.f32 %v6343_v18, %v6341_v16 }
 0x885   :  { %2711 = vmatmul.mubr.f32.vlgmr.msra.gmra.mrb[28].mxu0 %v2645_v24  ;;  %2782 = vmatmul.mubr.f32.vlgmr.msra.gmra.mrb[36].mxu1 %v2645_v24 }
 0x886   :  { %5451 = vmatpush1.bf16.msra.mxu0 %v6915_v57  ;;  %5483 = vmatpush1.bf16.msra.mxu1 %v6920_v63 }
 0x887   :  { %5453 = vmatprep.subr.bf16.mxu0 %v6918_v59  ;;  %5485 = vmatprep.subr.bf16.mxu1 %v6931_v11 }
 0x888   :  { %2880 = vmatprep.mubr.f32.mxu0 %v6531_v28  ;;  %2951 = vmatprep.mubr.f32.mxu1 %v6531_v28 }
 0x88a   :  { %5455 = vmatpush1.bf16.msra.mxu0 %v6929_v8  ;;  %5487 = vmatpush1.bf16.msra.mxu1 %v6936_v14 }
 0x88b   :  { %5457 = vmatprep.subr.bf16.mxu0 %v6933_v12  ;;  %5489 = vmatprep.subr.bf16.mxu1 %v6949_v26 }
 0x88e   :  { %5459 = vmatpush1.bf16.msra.mxu0 %v6946_v23  ;;  %5491 = vmatpush1.bf16.msra.mxu1 %v6955_v30 }
 0x88f   :  { %5461 = vmatprep.subr.bf16.mxu0 %v6952_v27  ;;  %5493 = vmatprep.subr.bf16.mxu1 %v6970_v42 }
 0x892   :  { %5463 = vmatpush1.bf16.msra.mxu0 %v6967_v39  ;;  %5495 = vmatpush1.bf16.msra.mxu1 %v6976_v46 }
 0x893   :  { %5465 = vmatprep.subr.bf16.mxu0 %v6973_v43  ;;  %5497 = vmatprep.subr.bf16.mxu1 %v6991_v62 }
 0x896   :  { %5467 = vmatpush1.bf16.msra.mxu0 %v6988_v58  ;;  %5499 = vmatpush1.bf16.msra.mxu1 %v6997_v2 }
 0x897   :  { %5469 = vmatprep.subr.bf16.mxu0 %v6994_v0  ;;  %5501 = vmatprep.subr.bf16.mxu1 %v7013_v19 }
 0x89a   :  { %5471 = vmatpush1.bf16.msra.mxu0 %v7010_v15  ;;  %5503 = vmatpush1.bf16.msra.mxu1 %v7019_v21 }
 0x89b   :  { %5473 = vmatprep.subr.bf16.mxu0 %v7016_v20  ;;  %5505 = vmatprep.subr.bf16.mxu1 %v7033_v38 }
 0x89e   :  { %5475 = vmatpush1.bf16.msra.mxu0 %v7030_v36  ;;  %5507 = vmatpush1.bf16.msra.mxu1 %v7039_v48 }
 0x89f   :  { %5477 = vmatprep.subr.bf16.mxu0 %v7037_v41  ;;  %5509 = vmatprep.subr.bf16.mxu1 %v7051_v1 }
 0x8a2   :  { %5479 = vmatpush1.bf16.msra.mxu0 %v7049_v61  ;;  %5511 = vmatpush1.bf16.msra.mxu1 %v7055_v3 }
 0x8a3   :  { %5513 = vmatprep.subr.bf16.mxu0 %v6904_v44  ;;  %5545 = vmatprep.subr.bf16.mxu1 %v6907_v47 }
 0x958   :  { %v2712_v7 = vpop.f32.mrb[28].mxu0  ;;  %v2783_v9 = vpop.f32.mrb[36].mxu1 }
 0x959   :  { %v6070_v50 = vadd.f32 %v2712_v7, %v7150_v22  ;;  %v2714_v10 = vpop.f32.mrb[29].mxu0  ;;  %v2785_v13 = vpop.f32.mrb[37].mxu1  ;;  %v6102_v35 = vadd.f32 %v2783_v9, %v7159_v53 }
 0x95a   :  { %v6071_v25 = vadd.f32 %v2714_v10, %v7152_v17  ;;  %v6103_v32 = vadd.f32 %v2785_v13, %v7156_v49 }
 0x95b   :  { %v4620_v29 = vmul.f32 -1.442695, %v6070_v50 }
 0x95c   :  { %v4621_v31 = vmul.f32 -1.442695, %v6071_v25  ;;  %v4622_v34 = vmul.f32 -1.442695, %v6103_v32 }
 0x95d   :  { %6344 = vpow2.f32 %v4620_v29 }
 0x95e   :  { %6346 = vpow2.f32 %v4621_v31 }
 0x95f   :  { %6348 = vpow2.f32 %v4622_v34 }
 0x960   :  { %6350 = vtanh.f32 %v6102_v35 }
 0x967   :  { %v6345_v40 = vpop.eup %6344 }
 0x968   :  { %v6347_v45 = vpop.eup %6346  ;;  %v2795_v37 = vadd.f32 1.0, %v6345_v40 }
 0x969   :  { %v2801_v52 = vadd.f32 1.0, %v6347_v45  ;;  %v6349_v54 = vpop.eup %6348 }
 0x96a   :  { %6352 = vrcp.f32 %v2795_v37  ;;  %v6351_v56 = vpop.eup %6350  ;;  %v2808_v55 = vadd.f32 1.0, %v6349_v54 }
 0x96b   :  { %6354 = vrcp.f32 %v2801_v52 }
 0x96c   :  { %6356 = vrcp.f32 %v2808_v55 }
 0x974   :  { %v6353_v60 = vpop.eup %6352 }
 0x975   :  { %v6355_v33 = vpop.eup %6354  ;;  %v2812_v4 = vmul.f32 %v6353_v60, %v6351_v56 }
 0x976   :  { %v2811_v51 = vmul.f32 %v6355_v33, %v7372_v5  ;;  %v6357_v16 = vpop.eup %6356 }
 0x978   :  { %v7414_v6 = vadd.f32 %v2812_v4, %v2811_v51 }
 0x97a   :  { %6358 = vtanh.f32 %v7414_v6 }
 0x984   :  { %v6359_v18 = vpop.eup %6358 }
 0x985   :  { %v2815_v24 = vmul.f32 %v6359_v18, %v6357_v16 }
 0x987   :  { %2881 = vmatmul.mubr.f32.vlgmr.msra.gmra.mrb[30].mxu0 %v2815_v24  ;;  %2952 = vmatmul.mubr.f32.vlgmr.msra.gmra.mrb[38].mxu1 %v2815_v24 }
 0x988   :  { %5515 = vmatpush1.bf16.msra.mxu0 %v6915_v57  ;;  %5547 = vmatpush1.bf16.msra.mxu1 %v6920_v63 }
 0x989   :  { %5517 = vmatprep.subr.bf16.mxu0 %v6918_v59  ;;  %5549 = vmatprep.subr.bf16.mxu1 %v6931_v11 }
 0x98a   :  { %3050 = vmatprep.mubr.f32.mxu0 %v6531_v28  ;;  %3121 = vmatprep.mubr.f32.mxu1 %v6531_v28 }
 0x98c   :  { %5519 = vmatpush1.bf16.msra.mxu0 %v6929_v8  ;;  %5551 = vmatpush1.bf16.msra.mxu1 %v6936_v14 }
 0x98d   :  { %5521 = vmatprep.subr.bf16.mxu0 %v6933_v12  ;;  %5553 = vmatprep.subr.bf16.mxu1 %v6949_v26 }
 0x990   :  { %5523 = vmatpush1.bf16.msra.mxu0 %v6946_v23  ;;  %5555 = vmatpush1.bf16.msra.mxu1 %v6955_v30 }
 0x991   :  { %5525 = vmatprep.subr.bf16.mxu0 %v6952_v27  ;;  %5557 = vmatprep.subr.bf16.mxu1 %v6970_v42 }
 0x994   :  { %5527 = vmatpush1.bf16.msra.mxu0 %v6967_v39  ;;  %5559 = vmatpush1.bf16.msra.mxu1 %v6976_v46 }
 0x995   :  { %5529 = vmatprep.subr.bf16.mxu0 %v6973_v43  ;;  %5561 = vmatprep.subr.bf16.mxu1 %v6991_v62 }
 0x998   :  { %5531 = vmatpush1.bf16.msra.mxu0 %v6988_v58  ;;  %5563 = vmatpush1.bf16.msra.mxu1 %v6997_v2 }
 0x999   :  { %5533 = vmatprep.subr.bf16.mxu0 %v6994_v0  ;;  %5565 = vmatprep.subr.bf16.mxu1 %v7013_v19 }
 0x99c   :  { %5535 = vmatpush1.bf16.msra.mxu0 %v7010_v15  ;;  %5567 = vmatpush1.bf16.msra.mxu1 %v7019_v21 }
 0x99d   :  { %5537 = vmatprep.subr.bf16.mxu0 %v7016_v20  ;;  %5569 = vmatprep.subr.bf16.mxu1 %v7033_v38 }
 0x9a0   :  { %5539 = vmatpush1.bf16.msra.mxu0 %v7030_v36  ;;  %5571 = vmatpush1.bf16.msra.mxu1 %v7039_v48 }
 0x9a1   :  { %5541 = vmatprep.subr.bf16.mxu0 %v7037_v41  ;;  %5573 = vmatprep.subr.bf16.mxu1 %v7051_v1 }
 0x9a4   :  { %5543 = vmatpush1.bf16.msra.mxu0 %v7049_v61  ;;  %5575 = vmatpush1.bf16.msra.mxu1 %v7055_v3 }
 0x9a5   :  { %5577 = vmatprep.subr.bf16.mxu0 %v6904_v44  ;;  %5609 = vmatprep.subr.bf16.mxu1 %v6907_v47 }
 0xa5a   :  { %v2882_v5 = vpop.f32.mrb[30].mxu0  ;;  %v2953_v7 = vpop.f32.mrb[38].mxu1 }
 0xa5b   :  { %v6072_v9 = vadd.f32 %v2882_v5, %v7150_v22  ;;  %v2884_v50 = vpop.f32.mrb[31].mxu0  ;;  %v2955_v10 = vpop.f32.mrb[39].mxu1  ;;  %v6104_v34 = vadd.f32 %v2953_v7, %v7159_v53 }
 0xa5c   :  { %v6073_v13 = vadd.f32 %v2884_v50, %v7152_v17  ;;  %v6105_v31 = vadd.f32 %v2955_v10, %v7156_v49 }
 0xa5d   :  { %v4623_v25 = vmul.f32 -1.442695, %v6072_v9 }
 0xa5e   :  { %v4624_v29 = vmul.f32 -1.442695, %v6073_v13  ;;  %v4625_v32 = vmul.f32 -1.442695, %v6105_v31 }
 0xa5f   :  { %6360 = vpow2.f32 %v4623_v25 }
 0xa60   :  { %6362 = vpow2.f32 %v4624_v29 }
 0xa61   :  { %6364 = vpow2.f32 %v4625_v32 }
 0xa62   :  { %6366 = vtanh.f32 %v6104_v34 }
 0xa69   :  { %v6361_v35 = vpop.eup %6360 }
 0xa6a   :  { %v6363_v40 = vpop.eup %6362  ;;  %v2965_v45 = vadd.f32 1.0, %v6361_v35 }
 0xa6b   :  { %v2971_v37 = vadd.f32 1.0, %v6363_v40  ;;  %v6365_v52 = vpop.eup %6364 }
 0xa6c   :  { %6368 = vrcp.f32 %v2965_v45  ;;  %v6367_v54 = vpop.eup %6366  ;;  %v2978_v4 = vadd.f32 1.0, %v6365_v52 }
 0xa6d   :  { %6370 = vrcp.f32 %v2971_v37 }
 0xa6e   :  { %6372 = vrcp.f32 %v2978_v4 }
 0xa76   :  { %v6369_v56 = vpop.eup %6368 }
 0xa77   :  { %v6371_v60 = vpop.eup %6370  ;;  %v2982_v33 = vmul.f32 %v6369_v56, %v6367_v54 }
 0xa78   :  { %v2981_v55 = vmul.f32 %v6371_v60, %v7414_v6  ;;  %v6373_v16 = vpop.eup %6372 }
 0xa7a   :  { %v7456_v51 = vadd.f32 %v2982_v33, %v2981_v55 }
 0xa7c   :  { %6374 = vtanh.f32 %v7456_v51 }
 0xa86   :  { %v6375_v18 = vpop.eup %6374 }
 0xa87   :  { %v2985_v24 = vmul.f32 %v6375_v18, %v6373_v16 }
 0xa89   :  { %3051 = vmatmul.mubr.f32.vlgmr.msra.gmra.mrb[32].mxu0 %v2985_v24  ;;  %3122 = vmatmul.mubr.f32.vlgmr.msra.gmra.mrb[40].mxu1 %v2985_v24 }
 0xa8a   :  { %5579 = vmatpush1.bf16.msra.mxu0 %v6915_v57  ;;  %5611 = vmatpush1.bf16.msra.mxu1 %v6920_v63 }
 0xa8b   :  { %5581 = vmatprep.subr.bf16.mxu0 %v6918_v59  ;;  %5613 = vmatprep.subr.bf16.mxu1 %v6931_v11 }
 0xa8c   :  { %3220 = vmatprep.mubr.f32.mxu0 %v6531_v28  ;;  %3291 = vmatprep.mubr.f32.mxu1 %v6531_v28 }
 0xa8e   :  { %5583 = vmatpush1.bf16.msra.mxu0 %v6929_v8  ;;  %5615 = vmatpush1.bf16.msra.mxu1 %v6936_v14 }
 0xa8f   :  { %5585 = vmatprep.subr.bf16.mxu0 %v6933_v12  ;;  %5617 = vmatprep.subr.bf16.mxu1 %v6949_v26 }
 0xa92   :  { %5587 = vmatpush1.bf16.msra.mxu0 %v6946_v23  ;;  %5619 = vmatpush1.bf16.msra.mxu1 %v6955_v30 }
 0xa93   :  { %5589 = vmatprep.subr.bf16.mxu0 %v6952_v27  ;;  %5621 = vmatprep.subr.bf16.mxu1 %v6970_v42 }
 0xa96   :  { %5591 = vmatpush1.bf16.msra.mxu0 %v6967_v39  ;;  %5623 = vmatpush1.bf16.msra.mxu1 %v6976_v46 }
 0xa97   :  { %5593 = vmatprep.subr.bf16.mxu0 %v6973_v43  ;;  %5625 = vmatprep.subr.bf16.mxu1 %v6991_v62 }
 0xa9a   :  { %5595 = vmatpush1.bf16.msra.mxu0 %v6988_v58  ;;  %5627 = vmatpush1.bf16.msra.mxu1 %v6997_v2 }
 0xa9b   :  { %5597 = vmatprep.subr.bf16.mxu0 %v6994_v0  ;;  %5629 = vmatprep.subr.bf16.mxu1 %v7013_v19 }
 0xa9e   :  { %5599 = vmatpush1.bf16.msra.mxu0 %v7010_v15  ;;  %5631 = vmatpush1.bf16.msra.mxu1 %v7019_v21 }
 0xa9f   :  { %5601 = vmatprep.subr.bf16.mxu0 %v7016_v20  ;;  %5633 = vmatprep.subr.bf16.mxu1 %v7033_v38 }
 0xaa2   :  { %5603 = vmatpush1.bf16.msra.mxu0 %v7030_v36  ;;  %5635 = vmatpush1.bf16.msra.mxu1 %v7039_v48 }
 0xaa3   :  { %5605 = vmatprep.subr.bf16.mxu0 %v7037_v41  ;;  %5637 = vmatprep.subr.bf16.mxu1 %v7051_v1 }
 0xaa6   :  { %5607 = vmatpush1.bf16.msra.mxu0 %v7049_v61  ;;  %5639 = vmatpush1.bf16.msra.mxu1 %v7055_v3 }
 0xaa7   :  { %5641 = vmatprep.subr.bf16.mxu0 %v6904_v44  ;;  %5673 = vmatprep.subr.bf16.mxu1 %v6907_v47 }
 0xb5c   :  { %v3052_v6 = vpop.f32.mrb[32].mxu0  ;;  %v3123_v5 = vpop.f32.mrb[40].mxu1 }
 0xb5d   :  { %v6074_v7 = vadd.f32 %v3052_v6, %v7150_v22  ;;  %v3054_v9 = vpop.f32.mrb[33].mxu0  ;;  %v3125_v50 = vpop.f32.mrb[41].mxu1  ;;  %v6106_v32 = vadd.f32 %v3123_v5, %v7159_v53 }
 0xb5e   :  { %v6075_v10 = vadd.f32 %v3054_v9, %v7152_v17  ;;  %v6107_v29 = vadd.f32 %v3125_v50, %v7156_v49 }
 0xb5f   :  { %v4626_v13 = vmul.f32 -1.442695, %v6074_v7 }
 0xb60   :  { %v4627_v25 = vmul.f32 -1.442695, %v6075_v10  ;;  %v4628_v31 = vmul.f32 -1.442695, %v6107_v29 }
 0xb61   :  { %6376 = vpow2.f32 %v4626_v13 }
 0xb62   :  { %6378 = vpow2.f32 %v4627_v25 }
 0xb63   :  { %6380 = vpow2.f32 %v4628_v31 }
 0xb64   :  { %6382 = vtanh.f32 %v6106_v32 }
 0xb6b   :  { %v6377_v34 = vpop.eup %6376 }
 0xb6c   :  { %v6379_v35 = vpop.eup %6378  ;;  %v3135_v40 = vadd.f32 1.0, %v6377_v34 }
 0xb6d   :  { %v3141_v45 = vadd.f32 1.0, %v6379_v35  ;;  %v6381_v37 = vpop.eup %6380 }
 0xb6e   :  { %6384 = vrcp.f32 %v3135_v40  ;;  %v6383_v52 = vpop.eup %6382  ;;  %v3148_v33 = vadd.f32 1.0, %v6381_v37 }
 0xb6f   :  { %6386 = vrcp.f32 %v3141_v45 }
 0xb70   :  { %6388 = vrcp.f32 %v3148_v33 }
 0xb78   :  { %v6385_v54 = vpop.eup %6384 }
 0xb79   :  { %v6387_v56 = vpop.eup %6386  ;;  %v3152_v60 = vmul.f32 %v6385_v54, %v6383_v52 }
 0xb7a   :  { %v3151_v4 = vmul.f32 %v6387_v56, %v7456_v51  ;;  %v6389_v16 = vpop.eup %6388 }
 0xb7c   :  { %v7498_v55 = vadd.f32 %v3152_v60, %v3151_v4 }
 0xb7e   :  { %6390 = vtanh.f32 %v7498_v55 }
 0xb88   :  { %v6391_v18 = vpop.eup %6390 }
 0xb89   :  { %v3155_v24 = vmul.f32 %v6391_v18, %v6389_v16 }
 0xb8b   :  { %3221 = vmatmul.mubr.f32.vlgmr.msra.gmra.mrb[34].mxu0 %v3155_v24  ;;  %3292 = vmatmul.mubr.f32.vlgmr.msra.gmra.mrb[42].mxu1 %v3155_v24 }
 0xb8c   :  { %5643 = vmatpush1.bf16.msra.mxu0 %v6915_v57  ;;  %5675 = vmatpush1.bf16.msra.mxu1 %v6920_v63 }
 0xb8d   :  { %5645 = vmatprep.subr.bf16.mxu0 %v6918_v59  ;;  %5677 = vmatprep.subr.bf16.mxu1 %v6931_v11 }
 0xb8e   :  { %3390 = vmatprep.mubr.f32.mxu0 %v6531_v28  ;;  %3461 = vmatprep.mubr.f32.mxu1 %v6531_v28 }
 0xb90   :  { %5647 = vmatpush1.bf16.msra.mxu0 %v6929_v8  ;;  %5679 = vmatpush1.bf16.msra.mxu1 %v6936_v14 }
 0xb91   :  { %5649 = vmatprep.subr.bf16.mxu0 %v6933_v12  ;;  %5681 = vmatprep.subr.bf16.mxu1 %v6949_v26 }
 0xb94   :  { %5651 = vmatpush1.bf16.msra.mxu0 %v6946_v23  ;;  %5683 = vmatpush1.bf16.msra.mxu1 %v6955_v30 }
 0xb95   :  { %5653 = vmatprep.subr.bf16.mxu0 %v6952_v27  ;;  %5685 = vmatprep.subr.bf16.mxu1 %v6970_v42 }
 0xb98   :  { %5655 = vmatpush1.bf16.msra.mxu0 %v6967_v39  ;;  %5687 = vmatpush1.bf16.msra.mxu1 %v6976_v46 }
 0xb99   :  { %5657 = vmatprep.subr.bf16.mxu0 %v6973_v43  ;;  %5689 = vmatprep.subr.bf16.mxu1 %v6991_v62 }
 0xb9c   :  { %5659 = vmatpush1.bf16.msra.mxu0 %v6988_v58  ;;  %5691 = vmatpush1.bf16.msra.mxu1 %v6997_v2 }
 0xb9d   :  { %5661 = vmatprep.subr.bf16.mxu0 %v6994_v0  ;;  %5693 = vmatprep.subr.bf16.mxu1 %v7013_v19 }
 0xba0   :  { %5663 = vmatpush1.bf16.msra.mxu0 %v7010_v15  ;;  %5695 = vmatpush1.bf16.msra.mxu1 %v7019_v21 }
 0xba1   :  { %5665 = vmatprep.subr.bf16.mxu0 %v7016_v20  ;;  %5697 = vmatprep.subr.bf16.mxu1 %v7033_v38 }
 0xba4   :  { %5667 = vmatpush1.bf16.msra.mxu0 %v7030_v36  ;;  %5699 = vmatpush1.bf16.msra.mxu1 %v7039_v48 }
 0xba5   :  { %5669 = vmatprep.subr.bf16.mxu0 %v7037_v41  ;;  %5701 = vmatprep.subr.bf16.mxu1 %v7051_v1 }
 0xba8   :  { %5671 = vmatpush1.bf16.msra.mxu0 %v7049_v61  ;;  %5703 = vmatpush1.bf16.msra.mxu1 %v7055_v3 }
 0xba9   :  { %5705 = vmatprep.subr.bf16.mxu0 %v6904_v44  ;;  %5737 = vmatprep.subr.bf16.mxu1 %v6907_v47 }
 0xc5e   :  { %v3222_v51 = vpop.f32.mrb[34].mxu0  ;;  %v3293_v6 = vpop.f32.mrb[42].mxu1 }
 0xc5f   :  { %v6076_v5 = vadd.f32 %v3222_v51, %v7150_v22  ;;  %v3224_v7 = vpop.f32.mrb[35].mxu0  ;;  %v3295_v9 = vpop.f32.mrb[43].mxu1  ;;  %v6108_v31 = vadd.f32 %v3293_v6, %v7159_v53 }
 0xc60   :  { %v6077_v50 = vadd.f32 %v3224_v7, %v7152_v17  ;;  %v6109_v25 = vadd.f32 %v3295_v9, %v7156_v49 }
 0xc61   :  { %v4629_v10 = vmul.f32 -1.442695, %v6076_v5 }
 0xc62   :  { %v4630_v13 = vmul.f32 -1.442695, %v6077_v50  ;;  %v4631_v29 = vmul.f32 -1.442695, %v6109_v25 }
 0xc63   :  { %6392 = vpow2.f32 %v4629_v10 }
 0xc64   :  { %6394 = vpow2.f32 %v4630_v13 }
 0xc65   :  { %6396 = vpow2.f32 %v4631_v29 }
 0xc66   :  { %6398 = vtanh.f32 %v6108_v31 }
 0xc6d   :  { %v6393_v32 = vpop.eup %6392 }
 0xc6e   :  { %v6395_v34 = vpop.eup %6394  ;;  %v3305_v35 = vadd.f32 1.0, %v6393_v32 }
 0xc6f   :  { %v3311_v40 = vadd.f32 1.0, %v6395_v34  ;;  %v6397_v45 = vpop.eup %6396 }
 0xc70   :  { %6400 = vrcp.f32 %v3305_v35  ;;  %v6399_v37 = vpop.eup %6398  ;;  %v3318_v60 = vadd.f32 1.0, %v6397_v45 }
 0xc71   :  { %6402 = vrcp.f32 %v3311_v40 }
 0xc72   :  { %6404 = vrcp.f32 %v3318_v60 }
 0xc7a   :  { %v6401_v52 = vpop.eup %6400 }
 0xc7b   :  { %v6403_v54 = vpop.eup %6402  ;;  %v3322_v56 = vmul.f32 %v6401_v52, %v6399_v37 }
 0xc7c   :  { %v3321_v33 = vmul.f32 %v6403_v54, %v7498_v55  ;;  %v6405_v16 = vpop.eup %6404 }
 0xc7e   :  { %v7540_v4 = vadd.f32 %v3322_v56, %v3321_v33 }
 0xc80   :  { %6406 = vtanh.f32 %v7540_v4 }
 0xc8a   :  { %v6407_v18 = vpop.eup %6406 }
 0xc8b   :  { %v3325_v24 = vmul.f32 %v6407_v18, %v6405_v16 }
 0xc8d   :  { %3391 = vmatmul.mubr.f32.vlgmr.msra.gmra.mrb[36].mxu0 %v3325_v24  ;;  %3462 = vmatmul.mubr.f32.vlgmr.msra.gmra.mrb[44].mxu1 %v3325_v24 }
 0xc8e   :  { %5707 = vmatpush1.bf16.msra.mxu0 %v6915_v57  ;;  %5739 = vmatpush1.bf16.msra.mxu1 %v6920_v63 }
 0xc8f   :  { %5709 = vmatprep.subr.bf16.mxu0 %v6918_v59  ;;  %5741 = vmatprep.subr.bf16.mxu1 %v6931_v11 }
 0xc90   :  { %3560 = vmatprep.mubr.f32.mxu0 %v6531_v28  ;;  %3631 = vmatprep.mubr.f32.mxu1 %v6531_v28 }
 0xc92   :  { %5711 = vmatpush1.bf16.msra.mxu0 %v6929_v8  ;;  %5743 = vmatpush1.bf16.msra.mxu1 %v6936_v14 }
 0xc93   :  { %5713 = vmatprep.subr.bf16.mxu0 %v6933_v12  ;;  %5745 = vmatprep.subr.bf16.mxu1 %v6949_v26 }
 0xc96   :  { %5715 = vmatpush1.bf16.msra.mxu0 %v6946_v23  ;;  %5747 = vmatpush1.bf16.msra.mxu1 %v6955_v30 }
 0xc97   :  { %5717 = vmatprep.subr.bf16.mxu0 %v6952_v27  ;;  %5749 = vmatprep.subr.bf16.mxu1 %v6970_v42 }
 0xc9a   :  { %5719 = vmatpush1.bf16.msra.mxu0 %v6967_v39  ;;  %5751 = vmatpush1.bf16.msra.mxu1 %v6976_v46 }
 0xc9b   :  { %5721 = vmatprep.subr.bf16.mxu0 %v6973_v43  ;;  %5753 = vmatprep.subr.bf16.mxu1 %v6991_v62 }
 0xc9e   :  { %5723 = vmatpush1.bf16.msra.mxu0 %v6988_v58  ;;  %5755 = vmatpush1.bf16.msra.mxu1 %v6997_v2 }
 0xc9f   :  { %5725 = vmatprep.subr.bf16.mxu0 %v6994_v0  ;;  %5757 = vmatprep.subr.bf16.mxu1 %v7013_v19 }
 0xca2   :  { %5727 = vmatpush1.bf16.msra.mxu0 %v7010_v15  ;;  %5759 = vmatpush1.bf16.msra.mxu1 %v7019_v21 }
 0xca3   :  { %5729 = vmatprep.subr.bf16.mxu0 %v7016_v20  ;;  %5761 = vmatprep.subr.bf16.mxu1 %v7033_v38 }
 0xca6   :  { %5731 = vmatpush1.bf16.msra.mxu0 %v7030_v36  ;;  %5763 = vmatpush1.bf16.msra.mxu1 %v7039_v48 }
 0xca7   :  { %5733 = vmatprep.subr.bf16.mxu0 %v7037_v41  ;;  %5765 = vmatprep.subr.bf16.mxu1 %v7051_v1 }
 0xcaa   :  { %5735 = vmatpush1.bf16.msra.mxu0 %v7049_v61  ;;  %5767 = vmatpush1.bf16.msra.mxu1 %v7055_v3 }
 0xcab   :  { %5769 = vmatprep.subr.bf16.mxu0 %v6904_v44  ;;  %5801 = vmatprep.subr.bf16.mxu1 %v6907_v47 }
 0xd60   :  { %v3392_v55 = vpop.f32.mrb[36].mxu0  ;;  %v3463_v51 = vpop.f32.mrb[44].mxu1 }
 0xd61   :  { %v6078_v6 = vadd.f32 %v3392_v55, %v7150_v22  ;;  %v3394_v5 = vpop.f32.mrb[37].mxu0  ;;  %v3465_v7 = vpop.f32.mrb[45].mxu1  ;;  %v6110_v29 = vadd.f32 %v3463_v51, %v7159_v53 }
 0xd62   :  { %v6079_v9 = vadd.f32 %v3394_v5, %v7152_v17  ;;  %v6111_v13 = vadd.f32 %v3465_v7, %v7156_v49 }
 0xd63   :  { %v4632_v50 = vmul.f32 -1.442695, %v6078_v6 }
 0xd64   :  { %v4633_v10 = vmul.f32 -1.442695, %v6079_v9  ;;  %v4634_v25 = vmul.f32 -1.442695, %v6111_v13 }
 0xd65   :  { %6408 = vpow2.f32 %v4632_v50 }
 0xd66   :  { %6410 = vpow2.f32 %v4633_v10 }
 0xd67   :  { %6412 = vpow2.f32 %v4634_v25 }
 0xd68   :  { %6414 = vtanh.f32 %v6110_v29 }
 0xd6f   :  { %v6409_v31 = vpop.eup %6408 }
 0xd70   :  { %v6411_v32 = vpop.eup %6410  ;;  %v3475_v34 = vadd.f32 1.0, %v6409_v31 }
 0xd71   :  { %v3481_v35 = vadd.f32 1.0, %v6411_v32  ;;  %v6413_v40 = vpop.eup %6412 }
 0xd72   :  { %6416 = vrcp.f32 %v3475_v34  ;;  %v6415_v45 = vpop.eup %6414  ;;  %v3488_v56 = vadd.f32 1.0, %v6413_v40 }
 0xd73   :  { %6418 = vrcp.f32 %v3481_v35 }
 0xd74   :  { %6420 = vrcp.f32 %v3488_v56 }
 0xd7c   :  { %v6417_v37 = vpop.eup %6416 }
 0xd7d   :  { %v6419_v52 = vpop.eup %6418  ;;  %v3492_v54 = vmul.f32 %v6417_v37, %v6415_v45 }
 0xd7e   :  { %v3491_v60 = vmul.f32 %v6419_v52, %v7540_v4  ;;  %v6421_v16 = vpop.eup %6420 }
 0xd80   :  { %v7582_v33 = vadd.f32 %v3492_v54, %v3491_v60 }
 0xd82   :  { %6422 = vtanh.f32 %v7582_v33 }
 0xd8c   :  { %v6423_v18 = vpop.eup %6422 }
 0xd8d   :  { %v3495_v24 = vmul.f32 %v6423_v18, %v6421_v16 }
 0xd8f   :  { %3561 = vmatmul.mubr.f32.vlgmr.msra.gmra.mrb[38].mxu0 %v3495_v24  ;;  %3632 = vmatmul.mubr.f32.vlgmr.msra.gmra.mrb[46].mxu1 %v3495_v24 }
 0xd90   :  { %5771 = vmatpush1.bf16.msra.mxu0 %v6915_v57  ;;  %5803 = vmatpush1.bf16.msra.mxu1 %v6920_v63 }
 0xd91   :  { %5773 = vmatprep.subr.bf16.mxu0 %v6918_v59  ;;  %5805 = vmatprep.subr.bf16.mxu1 %v6931_v11 }
 0xd92   :  { %3730 = vmatprep.mubr.f32.mxu0 %v6531_v28  ;;  %3801 = vmatprep.mubr.f32.mxu1 %v6531_v28 }
 0xd94   :  { %5775 = vmatpush1.bf16.msra.mxu0 %v6929_v8  ;;  %5807 = vmatpush1.bf16.msra.mxu1 %v6936_v14 }
 0xd95   :  { %5777 = vmatprep.subr.bf16.mxu0 %v6933_v12  ;;  %5809 = vmatprep.subr.bf16.mxu1 %v6949_v26 }
 0xd98   :  { %5779 = vmatpush1.bf16.msra.mxu0 %v6946_v23  ;;  %5811 = vmatpush1.bf16.msra.mxu1 %v6955_v30 }
 0xd99   :  { %5781 = vmatprep.subr.bf16.mxu0 %v6952_v27  ;;  %5813 = vmatprep.subr.bf16.mxu1 %v6970_v42 }
 0xd9c   :  { %5783 = vmatpush1.bf16.msra.mxu0 %v6967_v39  ;;  %5815 = vmatpush1.bf16.msra.mxu1 %v6976_v46 }
 0xd9d   :  { %5785 = vmatprep.subr.bf16.mxu0 %v6973_v43  ;;  %5817 = vmatprep.subr.bf16.mxu1 %v6991_v62 }
 0xda0   :  { %5787 = vmatpush1.bf16.msra.mxu0 %v6988_v58  ;;  %5819 = vmatpush1.bf16.msra.mxu1 %v6997_v2 }
 0xda1   :  { %5789 = vmatprep.subr.bf16.mxu0 %v6994_v0  ;;  %5821 = vmatprep.subr.bf16.mxu1 %v7013_v19 }
 0xda4   :  { %5791 = vmatpush1.bf16.msra.mxu0 %v7010_v15  ;;  %5823 = vmatpush1.bf16.msra.mxu1 %v7019_v21 }
 0xda5   :  { %5793 = vmatprep.subr.bf16.mxu0 %v7016_v20  ;;  %5825 = vmatprep.subr.bf16.mxu1 %v7033_v38 }
 0xda8   :  { %5795 = vmatpush1.bf16.msra.mxu0 %v7030_v36  ;;  %5827 = vmatpush1.bf16.msra.mxu1 %v7039_v48 }
 0xda9   :  { %5797 = vmatprep.subr.bf16.mxu0 %v7037_v41  ;;  %5829 = vmatprep.subr.bf16.mxu1 %v7051_v1 }
 0xdac   :  { %5799 = vmatpush1.bf16.msra.mxu0 %v7049_v61  ;;  %5831 = vmatpush1.bf16.msra.mxu1 %v7055_v3 }
 0xdad   :  { %5833 = vmatprep.subr.bf16.mxu0 %v6904_v44  ;;  %5865 = vmatprep.subr.bf16.mxu1 %v6907_v47 }
 0xe62   :  { %v3562_v4 = vpop.f32.mrb[38].mxu0  ;;  %v3633_v55 = vpop.f32.mrb[46].mxu1 }
 0xe63   :  { %v6080_v51 = vadd.f32 %v3562_v4, %v7150_v22  ;;  %v3564_v6 = vpop.f32.mrb[39].mxu0  ;;  %v3635_v5 = vpop.f32.mrb[47].mxu1  ;;  %v6112_v25 = vadd.f32 %v3633_v55, %v7159_v53 }
 0xe64   :  { %v6081_v7 = vadd.f32 %v3564_v6, %v7152_v17  ;;  %v6113_v10 = vadd.f32 %v3635_v5, %v7156_v49 }
 0xe65   :  { %v4635_v9 = vmul.f32 -1.442695, %v6080_v51 }
 0xe66   :  { %v4636_v50 = vmul.f32 -1.442695, %v6081_v7  ;;  %v4637_v13 = vmul.f32 -1.442695, %v6113_v10 }
 0xe67   :  { %6424 = vpow2.f32 %v4635_v9 }
 0xe68   :  { %6426 = vpow2.f32 %v4636_v50 }
 0xe69   :  { %6428 = vpow2.f32 %v4637_v13 }
 0xe6a   :  { %6430 = vtanh.f32 %v6112_v25 }
 0xe71   :  { %v6425_v29 = vpop.eup %6424 }
 0xe72   :  { %v6427_v31 = vpop.eup %6426  ;;  %v3645_v32 = vadd.f32 1.0, %v6425_v29 }
 0xe73   :  { %v3651_v34 = vadd.f32 1.0, %v6427_v31  ;;  %v6429_v35 = vpop.eup %6428 }
 0xe74   :  { %6432 = vrcp.f32 %v3645_v32  ;;  %v6431_v40 = vpop.eup %6430  ;;  %v3658_v54 = vadd.f32 1.0, %v6429_v35 }
 0xe75   :  { %6434 = vrcp.f32 %v3651_v34 }
 0xe76   :  { %6436 = vrcp.f32 %v3658_v54 }
 0xe7e   :  { %v6433_v45 = vpop.eup %6432 }
 0xe7f   :  { %v6435_v37 = vpop.eup %6434  ;;  %v3662_v52 = vmul.f32 %v6433_v45, %v6431_v40 }
 0xe80   :  { %v3661_v56 = vmul.f32 %v6435_v37, %v7582_v33  ;;  %v6437_v16 = vpop.eup %6436 }
 0xe82   :  { %v7624_v60 = vadd.f32 %v3662_v52, %v3661_v56 }
 0xe84   :  { %6438 = vtanh.f32 %v7624_v60 }
 0xe8e   :  { %v6439_v18 = vpop.eup %6438 }
 0xe8f   :  { %v3665_v24 = vmul.f32 %v6439_v18, %v6437_v16 }
 0xe91   :  { %3731 = vmatmul.mubr.f32.vlgmr.msra.gmra.mrb[40].mxu0 %v3665_v24  ;;  %3802 = vmatmul.mubr.f32.vlgmr.msra.gmra.mrb[48].mxu1 %v3665_v24 }
 0xe92   :  { %5835 = vmatpush1.bf16.msra.mxu0 %v6915_v57  ;;  %5867 = vmatpush1.bf16.msra.mxu1 %v6920_v63 }
 0xe93   :  { %5837 = vmatprep.subr.bf16.mxu0 %v6918_v59  ;;  %5869 = vmatprep.subr.bf16.mxu1 %v6931_v11 }
 0xe94   :  { %3900 = vmatprep.mubr.f32.mxu0 %v6531_v28  ;;  %3971 = vmatprep.mubr.f32.mxu1 %v6531_v28 }
 0xe96   :  { %5839 = vmatpush1.bf16.msra.mxu0 %v6929_v8  ;;  %5871 = vmatpush1.bf16.msra.mxu1 %v6936_v14 }
 0xe97   :  { %5841 = vmatprep.subr.bf16.mxu0 %v6933_v12  ;;  %5873 = vmatprep.subr.bf16.mxu1 %v6949_v26 }
 0xe9a   :  { %5843 = vmatpush1.bf16.msra.mxu0 %v6946_v23  ;;  %5875 = vmatpush1.bf16.msra.mxu1 %v6955_v30 }
 0xe9b   :  { %5845 = vmatprep.subr.bf16.mxu0 %v6952_v27  ;;  %5877 = vmatprep.subr.bf16.mxu1 %v6970_v42 }
 0xe9e   :  { %5847 = vmatpush1.bf16.msra.mxu0 %v6967_v39  ;;  %5879 = vmatpush1.bf16.msra.mxu1 %v6976_v46 }
 0xe9f   :  { %5849 = vmatprep.subr.bf16.mxu0 %v6973_v43  ;;  %5881 = vmatprep.subr.bf16.mxu1 %v6991_v62 }
 0xea2   :  { %5851 = vmatpush1.bf16.msra.mxu0 %v6988_v58  ;;  %5883 = vmatpush1.bf16.msra.mxu1 %v6997_v2 }
 0xea3   :  { %5853 = vmatprep.subr.bf16.mxu0 %v6994_v0  ;;  %5885 = vmatprep.subr.bf16.mxu1 %v7013_v19 }
 0xea6   :  { %5855 = vmatpush1.bf16.msra.mxu0 %v7010_v15  ;;  %5887 = vmatpush1.bf16.msra.mxu1 %v7019_v21 }
 0xea7   :  { %5857 = vmatprep.subr.bf16.mxu0 %v7016_v20  ;;  %5889 = vmatprep.subr.bf16.mxu1 %v7033_v38 }
 0xeaa   :  { %5859 = vmatpush1.bf16.msra.mxu0 %v7030_v36  ;;  %5891 = vmatpush1.bf16.msra.mxu1 %v7039_v48 }
 0xeab   :  { %5861 = vmatprep.subr.bf16.mxu0 %v7037_v41  ;;  %5893 = vmatprep.subr.bf16.mxu1 %v7051_v1 }
 0xeae   :  { %5863 = vmatpush1.bf16.msra.mxu0 %v7049_v61  ;;  %5895 = vmatpush1.bf16.msra.mxu1 %v7055_v3 }
 0xeaf   :  { %5897 = vmatprep.subr.bf16.mxu0 %v6904_v44  ;;  %5929 = vmatprep.subr.bf16.mxu1 %v6907_v47 }
 0xf64   :  { %v3732_v33 = vpop.f32.mrb[40].mxu0  ;;  %v3803_v4 = vpop.f32.mrb[48].mxu1 }
 0xf65   :  { %v6082_v55 = vadd.f32 %v3732_v33, %v7150_v22  ;;  %v3734_v51 = vpop.f32.mrb[41].mxu0  ;;  %v3805_v6 = vpop.f32.mrb[49].mxu1  ;;  %v6114_v13 = vadd.f32 %v3803_v4, %v7159_v53 }
 0xf66   :  { %v6083_v5 = vadd.f32 %v3734_v51, %v7152_v17  ;;  %v6115_v50 = vadd.f32 %v3805_v6, %v7156_v49 }
 0xf67   :  { %v4638_v7 = vmul.f32 -1.442695, %v6082_v55 }
 0xf68   :  { %v4639_v9 = vmul.f32 -1.442695, %v6083_v5  ;;  %v4640_v10 = vmul.f32 -1.442695, %v6115_v50 }
 0xf69   :  { %6440 = vpow2.f32 %v4638_v7 }
 0xf6a   :  { %6442 = vpow2.f32 %v4639_v9 }
 0xf6b   :  { %6444 = vpow2.f32 %v4640_v10 }
 0xf6c   :  { %6446 = vtanh.f32 %v6114_v13 }
 0xf73   :  { %v6441_v25 = vpop.eup %6440 }
 0xf74   :  { %v6443_v29 = vpop.eup %6442  ;;  %v3815_v31 = vadd.f32 1.0, %v6441_v25 }
 0xf75   :  { %v3821_v32 = vadd.f32 1.0, %v6443_v29  ;;  %v6445_v34 = vpop.eup %6444 }
 0xf76   :  { %6448 = vrcp.f32 %v3815_v31  ;;  %v6447_v35 = vpop.eup %6446  ;;  %v3828_v52 = vadd.f32 1.0, %v6445_v34 }
 0xf77   :  { %6450 = vrcp.f32 %v3821_v32 }
 0xf78   :  { %6452 = vrcp.f32 %v3828_v52 }
 0xf80   :  { %v6449_v40 = vpop.eup %6448 }
 0xf81   :  { %v6451_v45 = vpop.eup %6450  ;;  %v3832_v37 = vmul.f32 %v6449_v40, %v6447_v35 }
 0xf82   :  { %v3831_v54 = vmul.f32 %v6451_v45, %v7624_v60  ;;  %v6453_v16 = vpop.eup %6452 }
 0xf84   :  { %v7666_v56 = vadd.f32 %v3832_v37, %v3831_v54 }
 0xf86   :  { %6454 = vtanh.f32 %v7666_v56 }
 0xf90   :  { %v6455_v18 = vpop.eup %6454 }
 0xf91   :  { %v3835_v24 = vmul.f32 %v6455_v18, %v6453_v16  ;;  %v4349_v18 = vld [vmem:[%s7823_s8 + $0x18] sm:$0xff] }
 0xf93   :  { %3901 = vmatmul.mubr.f32.vlgmr.msra.gmra.mrb[42].mxu0 %v3835_v24  ;;  %3972 = vmatmul.mubr.f32.vlgmr.msra.gmra.mrb[50].mxu1 %v3835_v24 }
 0xf94   :  { %5899 = vmatpush1.bf16.msra.mxu0 %v6915_v57  ;;  %5931 = vmatpush1.bf16.msra.mxu1 %v6920_v63 }
 0xf95   :  { %5901 = vmatprep.subr.bf16.mxu0 %v6918_v59  ;;  %5933 = vmatprep.subr.bf16.mxu1 %v6931_v11 }
 0xf96   :  { %4070 = vmatprep.mubr.f32.mxu0 %v6531_v28  ;;  %4141 = vmatprep.mubr.f32.mxu1 %v6531_v28 }
 0xf98   :  { %5903 = vmatpush1.bf16.msra.mxu0 %v6929_v8  ;;  %5935 = vmatpush1.bf16.msra.mxu1 %v6936_v14 }
 0xf99   :  { %5905 = vmatprep.subr.bf16.mxu0 %v6933_v12  ;;  %5937 = vmatprep.subr.bf16.mxu1 %v6949_v26 }
 0xf9c   :  { %5907 = vmatpush1.bf16.msra.mxu0 %v6946_v23  ;;  %5939 = vmatpush1.bf16.msra.mxu1 %v6955_v30 }
 0xf9d   :  { %5909 = vmatprep.subr.bf16.mxu0 %v6952_v27  ;;  %5941 = vmatprep.subr.bf16.mxu1 %v6970_v42 }
 0xfa0   :  { %5911 = vmatpush1.bf16.msra.mxu0 %v6967_v39  ;;  %5943 = vmatpush1.bf16.msra.mxu1 %v6976_v46 }
 0xfa1   :  { %5913 = vmatprep.subr.bf16.mxu0 %v6973_v43  ;;  %5945 = vmatprep.subr.bf16.mxu1 %v6991_v62 }
 0xfa4   :  { %5915 = vmatpush1.bf16.msra.mxu0 %v6988_v58  ;;  %5947 = vmatpush1.bf16.msra.mxu1 %v6997_v2 }
 0xfa5   :  { %5917 = vmatprep.subr.bf16.mxu0 %v6994_v0  ;;  %5949 = vmatprep.subr.bf16.mxu1 %v7013_v19 }
 0xfa8   :  { %5919 = vmatpush1.bf16.msra.mxu0 %v7010_v15  ;;  %5951 = vmatpush1.bf16.msra.mxu1 %v7019_v21 }
 0xfa9   :  { %5921 = vmatprep.subr.bf16.mxu0 %v7016_v20  ;;  %5953 = vmatprep.subr.bf16.mxu1 %v7033_v38 }
 0xfac   :  { %5923 = vmatpush1.bf16.msra.mxu0 %v7030_v36  ;;  %5955 = vmatpush1.bf16.msra.mxu1 %v7039_v48 }
 0xfad   :  { %5925 = vmatprep.subr.bf16.mxu0 %v7037_v41  ;;  %5957 = vmatprep.subr.bf16.mxu1 %v7051_v1 }
 0xfb0   :  { %5927 = vmatpush1.bf16.msra.mxu0 %v7049_v61  ;;  %5959 = vmatpush1.bf16.msra.mxu1 %v7055_v3 }
 0xfb1   :  { %5961 = vmatprep.subr.bf16.mxu0 %v6904_v44  ;;  %5993 = vmatprep.subr.bf16.mxu1 %v6907_v47 }
0x1066   :  { %v3902_v60 = vpop.f32.mrb[42].mxu0  ;;  %v3973_v33 = vpop.f32.mrb[50].mxu1 }
0x1067   :  { %v6084_v4 = vadd.f32 %v3902_v60, %v7150_v22  ;;  %v3904_v55 = vpop.f32.mrb[43].mxu0  ;;  %v3975_v51 = vpop.f32.mrb[51].mxu1  ;;  %v6116_v10 = vadd.f32 %v3973_v33, %v7159_v53  ;;  %v4350_v60 = vld [vmem:[%s7823_s8 + $0x20] sm:$0xff]  ;;  %v4351_v33 = vld [vmem:[%s7823_s8 + $0x28] sm:$0xff] }
0x1068   :  { %v6085_v6 = vadd.f32 %v3904_v55, %v7152_v17  ;;  %v6117_v9 = vadd.f32 %v3975_v51, %v7156_v49  ;;  %v4352_v55 = vld [vmem:[%s7823_s8 + $0x30] sm:$0xff]  ;;  %v4353_v51 = vld [vmem:[%s7823_s8 + $0x38] sm:$0xff] }
0x1069   :  { %v4641_v5 = vmul.f32 -1.442695, %v6084_v4  ;;  %v6031_v4 = vpack.c.bf16 %v4351_v33, %v4350_v60 }
0x106a   :  { %v4642_v7 = vmul.f32 -1.442695, %v6085_v6  ;;  %v4643_v50 = vmul.f32 -1.442695, %v6117_v9  ;;  %v6034_v6 = vpack.c.bf16 %v4353_v51, %v4352_v55 }
0x106b   :  { %6456 = vpow2.f32 %v4641_v5  ;;  %v4354_v5 = vld [vmem:[%s7823_s8 + $0x40] sm:$0xff] }
0x106c   :  { %6458 = vpow2.f32 %v4642_v7  ;;  %v4355_v7 = vld [vmem:[%s7823_s8 + $0x48] sm:$0xff] }
0x106d   :  { %6460 = vpow2.f32 %v4643_v50  ;;  %v6037_v9 = vpack.c.bf16 %v4355_v7, %v4354_v5  ;;  %v4356_v50 = vld [vmem:[%s7823_s8 + $0x50] sm:$0xff] }
0x106e   :  { %6462 = vtanh.f32 %v6116_v10  ;;  %v4357_v10 = vld [vmem:[%s7823_s8 + $0x58] sm:$0xff] }
0x1075   :  { %v6457_v44 = vpop.eup %6456 }
0x1076   :  { %v6459_v13 = vpop.eup %6458  ;;  %v3985_v47 = vadd.f32 1.0, %v6457_v44  ;;  %v4358_v44 = vld [vmem:[%s7823_s8 + $0x60] sm:$0xff] }
0x1077   :  { %v3991_v25 = vadd.f32 1.0, %v6459_v13  ;;  %v6461_v29 = vpop.eup %6460  ;;  %v6040_v13 = vpack.c.bf16 %v4357_v10, %v4356_v50 }
0x1078   :  { %6464 = vrcp.f32 %v3985_v47  ;;  %v6463_v31 = vpop.eup %6462  ;;  %v3998_v40 = vadd.f32 1.0, %v6461_v29  ;;  %v4359_v47 = vld [vmem:[%s7823_s8 + $0x68] sm:$0xff]  ;;  %v4360_v29 = vld [vmem:[%s7823_s8 + $0x70] sm:$0xff] }
0x1079   :  { %6466 = vrcp.f32 %v3991_v25  ;;  %v6043_v25 = vpack.c.bf16 %v4359_v47, %v4358_v44 }
0x107a   :  { %6468 = vrcp.f32 %v3998_v40 }
0x1082   :  { %v6465_v32 = vpop.eup %6464 }
0x1083   :  { %v6467_v34 = vpop.eup %6466  ;;  %v4002_v35 = vmul.f32 %v6465_v32, %v6463_v31  ;;  %v4361_v31 = vld [vmem:[%s7823_s8 + $0x78] sm:$0xff] }
0x1084   :  { %v4001_v45 = vmul.f32 %v6467_v34, %v7666_v56  ;;  %v6469_v52 = vpop.eup %6468  ;;  %v4348_v56 = vld [vmem:[%s7823_s8 + $0x10] sm:$0xff]  ;;  %v6046_v32 = vpack.c.bf16 %v4361_v31, %v4360_v29 }
0x1085   :  { %v6028_v24 = vpack.c.bf16 %v4349_v18, %v4348_v56 }
0x1086   :  { %v7708_v37 = vadd.f32 %v4002_v35, %v4001_v45 }
0x1088   :  { %6470 = vtanh.f32 %v7708_v37 }
0x1092   :  { %v6471_v54 = vpop.eup %6470 }
0x1093   :  { %v4005_v16 = vmul.f32 %v6471_v54, %v6469_v52 }
0x1095   :  { %4071 = vmatmul.mubr.f32.vlgmr.msra.gmra.mrb[44].mxu0 %v4005_v16  ;;  %4142 = vmatmul.mubr.f32.vlgmr.msra.gmra.mrb[52].mxu1 %v4005_v16 }
0x1096   :  { %5963 = vmatpush1.bf16.msra.mxu0 %v6915_v57  ;;  %5995 = vmatpush1.bf16.msra.mxu1 %v6920_v63 }
0x1097   :  { %5965 = vmatprep.subr.bf16.mxu0 %v6918_v59  ;;  %5997 = vmatprep.subr.bf16.mxu1 %v6931_v11 }
0x1098   :  { %4240 = vmatprep.mubr.f32.mxu0 %v6531_v28  ;;  %4311 = vmatprep.mubr.f32.mxu1 %v6531_v28 }
0x109a   :  { %5967 = vmatpush1.bf16.msra.mxu0 %v6929_v8  ;;  %5999 = vmatpush1.bf16.msra.mxu1 %v6936_v14 }
0x109b   :  { %5969 = vmatprep.subr.bf16.mxu0 %v6933_v12  ;;  %6001 = vmatprep.subr.bf16.mxu1 %v6949_v26 }
0x109e   :  { %5971 = vmatpush1.bf16.msra.mxu0 %v6946_v23  ;;  %6003 = vmatpush1.bf16.msra.mxu1 %v6955_v30 }
0x109f   :  { %5973 = vmatprep.subr.bf16.mxu0 %v6952_v27  ;;  %6005 = vmatprep.subr.bf16.mxu1 %v6970_v42 }
0x10a2   :  { %5975 = vmatpush1.bf16.msra.mxu0 %v6967_v39  ;;  %6007 = vmatpush1.bf16.msra.mxu1 %v6976_v46 }
0x10a3   :  { %5977 = vmatprep.subr.bf16.mxu0 %v6973_v43  ;;  %6009 = vmatprep.subr.bf16.mxu1 %v6991_v62 }
0x10a6   :  { %5979 = vmatpush1.bf16.msra.mxu0 %v6988_v58  ;;  %6011 = vmatpush1.bf16.msra.mxu1 %v6997_v2 }
0x10a7   :  { %5981 = vmatprep.subr.bf16.mxu0 %v6994_v0  ;;  %6013 = vmatprep.subr.bf16.mxu1 %v7013_v19 }
0x10aa   :  { %5983 = vmatpush1.bf16.msra.mxu0 %v7010_v15  ;;  %6015 = vmatpush1.bf16.msra.mxu1 %v7019_v21 }
0x10ab   :  { %5985 = vmatprep.subr.bf16.mxu0 %v7016_v20  ;;  %6017 = vmatprep.subr.bf16.mxu1 %v7033_v38 }
0x10ae   :  { %5987 = vmatpush1.bf16.msra.mxu0 %v7030_v36  ;;  %6019 = vmatpush1.bf16.msra.mxu1 %v7039_v48  ;;  %v4346_v48 = vld [vmem:[%s7823_s8] sm:$0xff] }
0x10af   :  { %5989 = vmatprep.subr.bf16.mxu0 %v7037_v41  ;;  %6021 = vmatprep.subr.bf16.mxu1 %v7051_v1 }
0x10b2   :  { %5991 = vmatpush1.bf16.msra.mxu0 %v7049_v61  ;;  %6023 = vmatpush1.bf16.msra.mxu1 %v7055_v3  ;;  %v4347_v61 = vld [vmem:[%s7823_s8 + $0x8] sm:$0xff]  ;;  %v6532_v3 = vmov 0.0|0.0  }
0x10b3   :  { %v6025_v1 = vpack.c.bf16 %v4347_v61, %v4346_v48  ;;  %6024 = vmatprep.subr.bf16.mxu0 %v6532_v3 }
0x1168   :  { %v4072_v57 = vpop.f32.mrb[44].mxu0  ;;  %v4143_v59 = vpop.f32.mrb[52].mxu1 }
0x1169   :  { %v6086_v63 = vadd.f32 %v4072_v57, %v7150_v22  ;;  %v4074_v8 = vpop.f32.mrb[45].mxu0  ;;  %v4145_v11 = vpop.f32.mrb[53].mxu1  ;;  %v6118_v30 = vadd.f32 %v4143_v59, %v7159_v53 }
0x116a   :  { %v6087_v12 = vadd.f32 %v4074_v8, %v7152_v17  ;;  %v6119_v26 = vadd.f32 %v4145_v11, %v7156_v49 }
0x116b   :  { %v4644_v14 = vmul.f32 -1.442695, %v6086_v63 }
0x116c   :  { %v4645_v23 = vmul.f32 -1.442695, %v6087_v12  ;;  %v4646_v27 = vmul.f32 -1.442695, %v6119_v26 }
0x116d   :  { %6472 = vpow2.f32 %v4644_v14 }
0x116e   :  { %6474 = vpow2.f32 %v4645_v23 }
0x116f   :  { %6476 = vpow2.f32 %v4646_v27 }
0x1170   :  { %6478 = vtanh.f32 %v6118_v30 }
0x1177   :  { %v6473_v39 = vpop.eup %6472 }
0x1178   :  { %v6475_v42 = vpop.eup %6474  ;;  %v4155_v43 = vadd.f32 1.0, %v6473_v39 }
0x1179   :  { %v4161_v46 = vadd.f32 1.0, %v6475_v42  ;;  %v6477_v58 = vpop.eup %6476 }
0x117a   :  { %6480 = vrcp.f32 %v4155_v43  ;;  %v6479_v62 = vpop.eup %6478  ;;  %v4168_v19 = vadd.f32 1.0, %v6477_v58  ;;  %v4650_v43 = vld [vmem:[%s7824_s9] ss:$0 sm:$0xff] }
0x117b   :  { %6482 = vrcp.f32 %v4161_v46  ;;  %v4651_v58 = vld [vmem:[%s7825_s10] ss:$0 sm:$0xff] }
0x117c   :  { %6484 = vrcp.f32 %v4168_v19  ;;  %v4652_v19 = vld [vmem:[#allocation2] ss:$0 sm:$0xff] }
0x1184   :  { %v6481_v0 = vpop.eup %6480 }
0x1185   :  { %v6483_v2 = vpop.eup %6482  ;;  %v4172_v15 = vmul.f32 %v6481_v0, %v6479_v62 }
0x1186   :  { %v4171_v20 = vmul.f32 %v6483_v2, %v7708_v37  ;;  %v6485_v36 = vpop.eup %6484 }
0x1188   :  { %v7748_v21 = vadd.f32 %v4172_v15, %v4171_v20 }
0x118a   :  { %6486 = vtanh.f32 %v7748_v21 }
0x1194   :  { %v6487_v38 = vpop.eup %6486 }
0x1195   :  { %v4175_v41 = vmul.f32 %v6487_v38, %v6485_v36 }
0x1197   :  { %4241 = vmatmul.mubr.f32.vlgmr.msra.gmra.mrb[46].mxu0 %v4175_v41  ;;  %4312 = vmatmul.mubr.f32.vlgmr.msra.gmra.mrb[54].mxu1 %v4175_v41 }
0x1198   :  { %6026 = vmatpush3.bf16.msra.mxu0 %v6025_v1  ;;  %4969 = vmatprep.mubr.msk.f32.mxu0 %vm6533_vm4, %v6531_v28 }
0x1199   :  { %6027 = vmatprep.subr.bf16.mxu0 %v6532_v3 }
0x119c   :  { %6029 = vmatpush3.bf16.msra.mxu0 %v6028_v24 }
0x119d   :  { %6030 = vmatprep.subr.bf16.mxu0 %v6532_v3 }
0x11a0   :  { %6032 = vmatpush3.bf16.msra.mxu0 %v6031_v4 }
0x11a1   :  { %6033 = vmatprep.subr.bf16.mxu0 %v6532_v3 }
0x11a4   :  { %6035 = vmatpush3.bf16.msra.mxu0 %v6034_v6 }
0x11a5   :  { %6036 = vmatprep.subr.bf16.mxu0 %v6532_v3 }
0x11a8   :  { %6038 = vmatpush3.bf16.msra.mxu0 %v6037_v9 }
0x11a9   :  { %6039 = vmatprep.subr.bf16.mxu0 %v6532_v3 }
0x11ac   :  { %6041 = vmatpush3.bf16.msra.mxu0 %v6040_v13 }
0x11ad   :  { %6042 = vmatprep.subr.bf16.mxu0 %v6532_v3 }
0x11b0   :  { %6044 = vmatpush3.bf16.msra.mxu0 %v6043_v25 }
0x11b1   :  { %6045 = vmatprep.subr.bf16.mxu0 %v6532_v3 }
0x11b4   :  { %6047 = vmatpush3.bf16.msra.mxu0 %v6046_v32 }
0x126a   :  { %v4242_v34 = vpop.f32.mrb[46].mxu0  ;;  %v4313_v35 = vpop.f32.mrb[54].mxu1 }
0x126b   :  { %v6088_v40 = vadd.f32 %v4242_v34, %v7150_v22  ;;  %v4244_v28 = vpop.f32.mrb[47].mxu0  ;;  %v4315_v45 = vpop.f32.mrb[55].mxu1  ;;  %v6120_v59 = vadd.f32 %v4313_v35, %v7159_v53 }
0x126c   :  { %v6089_v37 = vadd.f32 %v4244_v28, %v7152_v17  ;;  %v6121_v16 = vadd.f32 %v4315_v45, %v7156_v49 }
0x126d   :  { %v4647_v52 = vmul.f32 -1.442695, %v6088_v40 }
0x126e   :  { %v4648_v54 = vmul.f32 -1.442695, %v6089_v37  ;;  %v4649_v57 = vmul.f32 -1.442695, %v6121_v16 }
0x126f   :  { %6488 = vpow2.f32 %v4647_v52 }
0x1270   :  { %6490 = vpow2.f32 %v4648_v54 }
0x1271   :  { %6492 = vpow2.f32 %v4649_v57 }
0x1272   :  { %6494 = vtanh.f32 %v6120_v59 }
0x1279   :  { %v6489_v63 = vpop.eup %6488 }
0x127a   :  { %v6491_v8 = vpop.eup %6490  ;;  %v4325_v11 = vadd.f32 1.0, %v6489_v63 }
0x127b   :  { %v4331_v12 = vadd.f32 1.0, %v6491_v8  ;;  %v6493_v22 = vpop.eup %6492 }
0x127c   :  { %6496 = vrcp.f32 %v4325_v11  ;;  %v6495_v14 = vpop.eup %6494  ;;  %v4338_v27 = vadd.f32 1.0, %v6493_v22 }
0x127d   :  { %6498 = vrcp.f32 %v4331_v12 }
0x127e   :  { %6500 = vrcp.f32 %v4338_v27 }
0x1286   :  { %v6497_v17 = vpop.eup %6496 }
0x1287   :  { %v6499_v23 = vpop.eup %6498  ;;  %v4342_v26 = vmul.f32 %v6497_v17, %v6495_v14 }
0x1288   :  { %v4341_v30 = vmul.f32 %v6499_v23, %v7748_v21  ;;  %v6501_v53 = vpop.eup %6500 }
0x128a   :  { %v4343_v49 = vadd.f32 %v4342_v26, %v4341_v30 }
0x128c   :  { %6502 = vtanh.f32 %v4343_v49 }
0x1296   :  { %v6503_v39 = vpop.eup %6502 }
0x1297   :  { %v4345_v42 = vmul.f32 %v6503_v39, %v6501_v53 }
0x1299   :  { %4970 = vmatmul.mubr.f32.vlgmr.msra.gmra.mrb[48].mxu0 %v4345_v42 }
0x136c   :  { %v4435_v46 = vpop.f32.mrb[48].mxu0 }
0x136d   :  { %v4436_v62 = vadd.f32 %v4650_v43, %v4435_v46  ;;  %v4971_v0 = vpop.f32.mrb[49].mxu0 }
0x136f   :  { %v4446_v2 = vmul.f32 %v4651_v58, %v4436_v62 }
0x1371   :  { %v4447_v15 = vsel %vm1191_vm3, %v4446_v2, 0.0 }
0x1372   :  { %4448 = vadd.xlane.f32.xlu0 %v4447_v15 }
0x13ff   :  { %v4449_v20 = vpop.xlane.xlu0 %4448 }
0x1400   :  { %v4457_v21 = vadd.f32 %v4652_v19, %v4449_v20 }
0x1402   :  { %4459 = vst.msk [vmem:[%s7827_s12] sm:$0xff] %vm4458_vm5, %v4457_v21 }
0x1403   :  { %4464 = vsyncpa [#allocation4], 1 }

</bundles_post_ra>
